<compile_context>
chip_gen: v5e
topology: v5e:2x2
jax: 0.10.0
libtpu: 0.0.40
codegen_flags: <defaults>
</compile_context>

<pallas_src>
import functools

import jax
import jax.numpy as jnp
from jax.experimental import pallas as pl
from jax.experimental.pallas import tpu as pltpu


# ----------------------------------------------------------------------------
# helpers
# ----------------------------------------------------------------------------
def _layernorm(v, g, b):
    mu = jnp.mean(v, axis=-1, keepdims=True)
    var = jnp.mean((v - mu) ** 2, axis=-1, keepdims=True)
    return (v - mu) * jax.lax.rsqrt(var + 1e-5) * g + b


def _gelu_exact(x):
    # matches torch.nn.GELU() default (erf-based)
    return 0.5 * x * (1.0 + jax.lax.erf(x * (2.0 ** -0.5)))


def _pick_tile(n, prefs):
    if n <= prefs[0]:
        return n            # small sequence: one full tile, grid axis collapses
    for t in prefs:
        if n % t == 0:
            return t
    return n


def _vmem_budget_bytes():
    # per-TensorCore physical VMEM with ~25% headroom (v7x: 48 of 64 MiB,
    # v5e/v6e: 96 of 128 MiB).  Conservative 64 MiB fallback if query fails.
    cap = 64 * 1024 * 1024
    try:
        cap = int(pltpu.get_tpu_info().vmem_capacity_bytes)
    except Exception:
        pass
    return int(cap * 3 // 4)


# ----------------------------------------------------------------------------
# Kernel 1: LayerNorm + Q/K/V projection for the whole sequence.
# Output is bf16, head-major (B, heads, N, dim_head); softmax scale is folded
# into Wq ahead of time.  Run once per layer, so K/V are NOT re-projected per
# query tile.
# ----------------------------------------------------------------------------
def qkv_project_kernel(x_ref, lnw_ref, lnb_ref, wq_ref, wk_ref, wv_ref,
                       q_ref, k_ref, v_ref, *, heads, dim_head):
    xn = _layernorm(x_ref[0], lnw_ref[0], lnb_ref[0]).astype(jnp.bfloat16)
    tp = xn.shape[0]

    def proj(w_ref):
        y = jnp.dot(xn, w_ref[...], preferred_element_type=jnp.float32)
        # one relayout per sequence element (not per q-tile x K/V-step)
        return (y.reshape(tp, heads, dim_head)
                 .transpose(1, 0, 2).astype(jnp.bfloat16))

    q_ref[0] = proj(wq_ref)
    k_ref[0] = proj(wk_ref)
    v_ref[0] = proj(wv_ref)


# ----------------------------------------------------------------------------
# Kernel 2: flash attention + fused epilogue (out-proj, residual, MLP,
# optional final LayerNorm).  grid = (B, N//TQ, N//TK); kv axis is "arbitrary".
# ----------------------------------------------------------------------------
def attn_mlp_kernel(x_ref, q_ref, k_ref, v_ref,
                    wo_ref, bo_ref, ln2w_ref, ln2b_ref,
                    w1_ref, b1_ref, w2_ref, b2_ref, fnw_ref, fnb_ref,
                    o_ref,
                    m_scr, l_scr, acc_scr, *, apply_final_norm):
    ki = pl.program_id(2)
    nk = pl.num_programs(2)

    @pl.when(ki == 0)
    def _init():
        m_scr[...] = jnp.full(m_scr.shape, -jnp.inf, m_scr.dtype)
        l_scr[...] = jnp.zeros(l_scr.shape, l_scr.dtype)
        acc_scr[...] = jnp.zeros(acc_scr.shape, acc_scr.dtype)

    # ---- one K/V tile: scores + online-softmax update (head-major, no
    #      reshapes/transposes inside the streamed loop) ---------------------
    q = q_ref[0]                       # (h, TQ, d) bf16 — resident across ki
    k = k_ref[0]                       # (h, TK, d) bf16
    v = v_ref[0]                       # (h, TK, d) bf16
    s = jnp.einsum("hqd,hkd->hqk", q, k,
                   preferred_element_type=jnp.float32)        # (h, TQ, TK)
    m_prev = m_scr[...]
    m_new = jnp.maximum(m_prev, jnp.max(s, axis=-1, keepdims=True))
    alpha = jnp.exp(m_prev - m_new)
    # exp kept in f32 for portability/accuracy (v5e has no bf16 EUP); on
    # v6e/v7x a bf16 exp would ~2x EUP throughput if it becomes the bottleneck.
    p = jnp.exp(s - m_new)
    l_scr[...] = alpha * l_scr[...] + jnp.sum(p, axis=-1, keepdims=True)
    acc_scr[...] = alpha * acc_scr[...] + jnp.einsum(
        "hqk,hkd->hqd", p.astype(jnp.bfloat16), v,
        preferred_element_type=jnp.float32)
    m_scr[...] = m_new

    # ---- epilogue on the last K/V step --------------------------------------
    @pl.when(ki == nk - 1)
    def _finish():
        out_h = (acc_scr[...] *
                 pl.reciprocal(l_scr[...], approx=True)).astype(jnp.bfloat16)
        # per-head out-projection summed over heads == (TQ, h*d) @ Wo, but
        # without transposing the head axis back to lane-major first.
        attn_out = jnp.einsum("hqd,hdD->hqD", out_h, wo_ref[...],
                              preferred_element_type=jnp.float32)
        attn_out = jnp.sum(attn_out, axis=0) + bo_ref[0]
        x1 = attn_out + x_ref[0]                                # residual 1

        xn2 = _layernorm(x1, ln2w_ref[0], ln2b_ref[0])
        hid = jnp.dot(xn2.astype(jnp.bfloat16), w1_ref[...],
                      preferred_element_type=jnp.float32) + b1_ref[0]
        hid = _gelu_exact(hid)
        ff = jnp.dot(hid.astype(jnp.bfloat16), w2_ref[...],
                     preferred_element_type=jnp.float32) + b2_ref[0]
        y = ff + x1                                             # residual 2
        if apply_final_norm:      # Transformer.norm fused into the last layer
            y = _layernorm(y, fnw_ref[0], fnb_ref[0])
        o_ref[0] = y


# ----------------------------------------------------------------------------
# Wrappers
# ----------------------------------------------------------------------------
def _qkv_projection(x, p, heads, dim_head, vmem_limit):
    B, N, D = x.shape
    TP = _pick_tile(N, (512, 256, 128, 64, 32, 16, 8))
    vspec = pl.BlockSpec(memory_space=pltpu.MemorySpace.VMEM)
    out_sds = jax.ShapeDtypeStruct((B, heads, N, dim_head), jnp.bfloat16)
    hm_spec = pl.BlockSpec((1, heads, TP, dim_head), lambda b, pi: (b, 0, pi, 0))
    kernel = functools.partial(qkv_project_kernel, heads=heads, dim_head=dim_head)
    return pl.pallas_call(
        kernel,
        out_shape=(out_sds, out_sds, out_sds),
        grid=(B, N // TP),
        in_specs=[pl.BlockSpec((1, TP, D), lambda b, pi: (b, pi, 0))] + [vspec] * 5,
        out_specs=(hm_spec, hm_spec, hm_spec),
        compiler_params=pltpu.CompilerParams(
            dimension_semantics=("parallel", "parallel"),
            vmem_limit_bytes=vmem_limit),
    )(x, p["ln1_w"], p["ln1_b"], p["wq"], p["wk"], p["wv"])


def _attention_mlp(x, qh, kh, vh, p, final_w, final_b, vmem_limit):
    B, N, D = x.shape
    heads, dim_head = qh.shape[1], qh.shape[3]
    inner = heads * dim_head
    mlp_dim = p["w1"].shape[1]

    TQ = _pick_tile(N, (512, 256, 128, 64, 32, 16, 8))   # big q tile amortizes K/V stream
    TK = _pick_tile(N, (256, 128, 64, 32, 16, 8))        # 256-multiple fills v6e/v7x MXU

    # keep both TensorCores busy on 2-TC chips when B*nq would collapse to 1
    if B * (N // TQ) < 2 and TQ >= 256 and TQ % 2 == 0 and N % (TQ // 2) == 0:
        TQ //= 2

    # shrink TQ if the estimated VMEM working set would overflow the budget
    # (matters on the 64 MiB/TC generation); weights stay whole-array resident.
    def vmem_est(tq):
        w = 2 * (inner * D + D * mlp_dim + mlp_dim * D) + 4 * 8 * max(D, mlp_dim)
        act = (2 * 4 * tq * D                        # x tile   (f32, 2 buffers)
               + 2 * heads * tq * dim_head           # q tile   (bf16)
               + 2 * 2 * 2 * heads * TK * dim_head   # k,v      (bf16, 2 buffers)
               + 2 * 4 * tq * D                      # out tile (f32)
               + 4 * heads * tq * (dim_head + 2)     # m,l,acc scratch
               + 4 * heads * tq * TK                 # score matrix
               + 4 * tq * mlp_dim)                   # GELU intermediate
        return w + act
    while vmem_est(TQ) > vmem_limit and TQ > 8 and TQ % 2 == 0 and N % (TQ // 2) == 0:
        TQ //= 2
    # TODO(synk): if bf16 weights alone exceed the per-TC budget (huge mlp_dim
    # on 64 MiB/TC chips), tile the MLP matmuls over mlp_dim (or use fp8
    # weights) instead of shrinking TQ further.

    apply_final = final_w is not None
    if final_w is None:                      # unused dummies when flag is False
        final_w, final_b = p["ln2_w"], p["ln2_b"]

    vspec = pl.BlockSpec(memory_space=pltpu.MemorySpace.VMEM)
    weights = [p["wo"], p["bo"], p["ln2_w"], p["ln2_b"],
               p["w1"], p["b1"], p["w2"], p["b2"], final_w, final_b]
    kernel = functools.partial(attn_mlp_kernel, apply_final_norm=apply_final)

    return pl.pallas_call(
        kernel,
        out_shape=jax.ShapeDtypeStruct((B, N, D), jnp.float32),
        grid=(B, N // TQ, N // TK),
        in_specs=[pl.BlockSpec((1, TQ, D), lambda b, qi, ki: (b, qi, 0)),
                  pl.BlockSpec((1, heads, TQ, dim_head),
                               lambda b, qi, ki: (b, 0, qi, 0)),
                  pl.BlockSpec((1, heads, TK, dim_head),
                               lambda b, qi, ki: (b, 0, ki, 0)),
                  pl.BlockSpec((1, heads, TK, dim_head),
                               lambda b, qi, ki: (b, 0, ki, 0))]
                 + [vspec] * len(weights),
        out_specs=pl.BlockSpec((1, TQ, D), lambda b, qi, ki: (b, qi, 0)),
        scratch_shapes=[pltpu.VMEM((heads, TQ, 1), jnp.float32),          # m
                        pltpu.VMEM((heads, TQ, 1), jnp.float32),          # l
                        pltpu.VMEM((heads, TQ, dim_head), jnp.float32)],  # acc
        compiler_params=pltpu.CompilerParams(
            dimension_semantics=("parallel", "parallel", "arbitrary"),
            vmem_limit_bytes=vmem_limit),
    )(x, qh, kh, vh, *weights)


def transformer_forward(x, prepped, heads, dim_head):
    B, N, _ = x.shape
    vmem_limit = _vmem_budget_bytes()
    layers = prepped["layers"]
    for i, p in enumerate(layers):
        is_last = i == len(layers) - 1
        qh, kh, vh = _qkv_projection(x, p, heads, dim_head, vmem_limit)
        x = _attention_mlp(x, qh, kh, vh, p,
                           prepped["final_w"] if is_last else None,
                           prepped["final_b"] if is_last else None,
                           vmem_limit)
    # attn.permute(0,2,3,1).mean(-1).mean(-1): softmax rows sum to 1 and
    # dropout=0 / no mask, so the value is exactly 1/N — computed here instead
    # of as a lane-width-1 kernel output.
    attn_map = jnp.full((B, N), 1.0 / N, jnp.float32)
    return x, attn_map


# ----------------------------------------------------------------------------
# One-time parameter preparation (split qkv, fold softmax scale into Wq,
# pre-cast matmul weights to bf16, head-major Wo).  Call once, not per forward.
# ----------------------------------------------------------------------------
def prepare_params(params, heads, dim_head):
    inner = heads * dim_head
    scale = dim_head ** -0.5
    layers = []
    for p in params["layers"]:
        dim = p["wo"].shape[1]
        layers.append(dict(
            ln1_w=p["ln1_w"], ln1_b=p["ln1_b"],
            wq=(p["wqkv"][:, 0 * inner:1 * inner] * scale).astype(jnp.bfloat16),
            wk=p["wqkv"][:, 1 * inner:2 * inner].astype(jnp.bfloat16),
            wv=p["wqkv"][:, 2 * inner:3 * inner].astype(jnp.bfloat16),
            wo=p["wo"].reshape(heads, dim_head, dim).astype(jnp.bfloat16),
            bo=p["bo"],
            ln2_w=p["ln2_w"], ln2_b=p["ln2_b"],
            w1=p["w1"].astype(jnp.bfloat16), b1=p["b1"],
            w2=p["w2"].astype(jnp.bfloat16), b2=p["b2"],
        ))
    return dict(layers=layers,
                final_w=params["final_w"], final_b=params["final_b"])


# ----------------------------------------------------------------------------
# Deterministic parameter init (same shapes nn.Module.__init__ would create)
# ----------------------------------------------------------------------------
def init_params(key, dim, depth, heads, dim_head, mlp_dim):
    inner = heads * dim_head
    layers = []
    for _ in range(depth):
        key, k0, k1, k2, k3, k4 = jax.random.split(key, 6)
        layers.append(dict(
            ln1_w=jnp.ones((1, dim), jnp.float32),
            ln1_b=jnp.zeros((1, dim), jnp.float32),
            wqkv=0.05 * jax.random.normal(k0, (dim, 3 * inner), jnp.float32),
            wo=0.05 * jax.random.normal(k1, (inner, dim), jnp.float32),
            bo=0.01 * jax.random.normal(k2, (1, dim), jnp.float32),
            ln2_w=jnp.ones((1, dim), jnp.float32),
            ln2_b=jnp.zeros((1, dim), jnp.float32),
            w1=0.05 * jax.random.normal(k3, (dim, mlp_dim), jnp.float32),
            b1=jnp.zeros((1, mlp_dim), jnp.float32),
            w2=0.05 * jax.random.normal(k4, (mlp_dim, dim), jnp.float32),
            b2=jnp.zeros((1, dim), jnp.float32),
        ))
    return dict(layers=layers,
                final_w=jnp.ones((1, dim), jnp.float32),
                final_b=jnp.zeros((1, dim), jnp.float32))


# ----------------------------------------------------------------------------
# Pure-JAX reference (sanity check against the Pallas kernels)
# ----------------------------------------------------------------------------
def ref_forward(x, params, heads, dim_head):
    HI = jax.lax.Precision.HIGHEST

    def ln(v, g, b):
        mu = v.mean(-1, keepdims=True)
        var = ((v - mu) ** 2).mean(-1, keepdims=True)
        return (v - mu) / jnp.sqrt(var + 1e-5) * g + b

    inner = heads * dim_head
    amap = None
    for p in params["layers"]:
        xn = ln(x, p["ln1_w"][0], p["ln1_b"][0])
        qkv = jnp.einsum("bnd,de->bne", xn, p["wqkv"], precision=HI)
        q, k, v = jnp.split(qkv, 3, axis=-1)
        split = lambda t: t.reshape(t.shape[0], t.shape[1], heads, dim_head).transpose(0, 2, 1, 3)
        q, k, v = split(q), split(k), split(v)
        dots = jnp.einsum("bhnd,bhmd->bhnm", q, k, precision=HI) * dim_head ** -0.5
        attn = jax.nn.softmax(dots, axis=-1)
        out = jnp.einsum("bhnm,bhmd->bhnd", attn, v, precision=HI)
        out = out.transpose(0, 2, 1, 3).reshape(x.shape[0], x.shape[1], inner)
        out = jnp.einsum("bni,id->bnd", out, p["wo"], precision=HI) + p["bo"][0]
        amap = attn.mean(axis=1).mean(axis=-1)                        # (b, n)
        x = out + x
        xn2 = ln(x, p["ln2_w"][0], p["ln2_b"][0])
        h = jnp.einsum("bnd,dm->bnm", xn2, p["w1"], precision=HI) + p["b1"][0]
        h = 0.5 * h * (1.0 + jax.lax.erf(h * (2.0 ** -0.5)))
        ff = jnp.einsum("bnm,md->bnd", h, p["w2"], precision=HI) + p["b2"][0]
        x = ff + x
    return ln(x, params["final_w"][0], params["final_b"][0]), amap


# ----------------------------------------------------------------------------
if __name__ == "__main__":
    B, N, DIM = 2, 8, 32
    HEADS, DIM_HEAD, MLP_DIM, DEPTH = 4, 8, 64, 2

    key = jax.random.PRNGKey(0)
    kx, kp = jax.random.split(key)
    x = jax.random.normal(kx, (B, N, DIM), jnp.float32)
    params = init_params(kp, DIM, DEPTH, HEADS, DIM_HEAD, MLP_DIM)
    prepped = prepare_params(params, HEADS, DIM_HEAD)   # once, outside forward

    fwd = jax.jit(functools.partial(transformer_forward,
                                    heads=HEADS, dim_head=DIM_HEAD))
    y, attn_map = fwd(x, prepped)
    jax.block_until_ready(y)
    jax.block_until_ready(attn_map)

    y_ref, amap_ref = ref_forward(x, params, HEADS, DIM_HEAD)
    assert y.shape == (B, N, DIM) and attn_map.shape == (B, N)
    assert jnp.allclose(y, y_ref, atol=2e-2, rtol=2e-2)
    assert jnp.allclose(attn_map, amap_ref, atol=2e-2, rtol=2e-2)

    print("KERNEL_OK")
</pallas_src>

<mosaic_0001>
module attributes {stable_mosaic.version = 11 : i64} {
  func.func @qkv_project_kernel(%arg0: i32, %arg1: i32, %arg2: memref<1x8x32xf32, #tpu.memory_space<vmem>>, %arg3: memref<1x32xf32, #tpu.memory_space<vmem>>, %arg4: memref<1x32xf32, #tpu.memory_space<vmem>>, %arg5: memref<32x32xbf16, #tpu.memory_space<vmem>>, %arg6: memref<32x32xbf16, #tpu.memory_space<vmem>>, %arg7: memref<32x32xbf16, #tpu.memory_space<vmem>>, %arg8: memref<1x4x8x8xbf16, #tpu.memory_space<vmem>>, %arg9: memref<1x4x8x8xbf16, #tpu.memory_space<vmem>>, %arg10: memref<1x4x8x8xbf16, #tpu.memory_space<vmem>>) attributes {dimension_semantics = [#tpu.dimension_semantics<parallel>, #tpu.dimension_semantics<parallel>], iteration_bounds = array<i64: 2, 1>, scalar_prefetch = 0 : i64, scratch_operands = 0 : i64, tpu.core_type = #tpu.core_type<tc>, window_params = [{transform_indices = @transform_0, window_bounds = array<i64: 1, 8, 32>}, {pipeline_mode = #tpu.pipeline_mode<synchronous>, transform_indices = @transform_1, window_bounds = array<i64: 1, 32>}, {pipeline_mode = #tpu.pipeline_mode<synchronous>, transform_indices = @transform_2, window_bounds = array<i64: 1, 32>}, {pipeline_mode = #tpu.pipeline_mode<synchronous>, transform_indices = @transform_3, window_bounds = array<i64: 32, 32>}, {pipeline_mode = #tpu.pipeline_mode<synchronous>, transform_indices = @transform_4, window_bounds = array<i64: 32, 32>}, {pipeline_mode = #tpu.pipeline_mode<synchronous>, transform_indices = @transform_5, window_bounds = array<i64: 32, 32>}, {transform_indices = @transform_6, window_bounds = array<i64: 1, 4, 8, 8>}, {transform_indices = @transform_7, window_bounds = array<i64: 1, 4, 8, 8>}, {transform_indices = @transform_8, window_bounds = array<i64: 1, 4, 8, 8>}]} {
    %c0 = arith.constant 0 : index
    %c0_0 = arith.constant 0 : index
    %c0_1 = arith.constant 0 : index
    %0 = vector.load %arg2[%c0, %c0_0, %c0_1] : memref<1x8x32xf32, #tpu.memory_space<vmem>>, vector<1x8x32xf32>
    %1 = vector.shape_cast %0 : vector<1x8x32xf32> to vector<8x32xf32>
    %c0_2 = arith.constant 0 : index
    %c0_3 = arith.constant 0 : index
    %2 = vector.load %arg3[%c0_2, %c0_3] : memref<1x32xf32, #tpu.memory_space<vmem>>, vector<1x32xf32>
    %3 = vector.shape_cast %2 : vector<1x32xf32> to vector<32xf32>
    %c0_4 = arith.constant 0 : index
    %c0_5 = arith.constant 0 : index
    %4 = vector.load %arg4[%c0_4, %c0_5] : memref<1x32xf32, #tpu.memory_space<vmem>>, vector<1x32xf32>
    %5 = vector.shape_cast %4 : vector<1x32xf32> to vector<32xf32>
    %cst = arith.constant dense<0.000000e+00> : vector<8xf32>
    %6 = vector.multi_reduction <add>, %1, %cst [1] : vector<8x32xf32> to vector<8xf32>
    %7 = vector.shape_cast %6 : vector<8xf32> to vector<8x1xf32>
    %cst_6 = arith.constant 3.200000e+01 : f32
    %8 = vector.broadcast %cst_6 : f32 to vector<8x1xf32>
    %9 = arith.divf %7, %8 : vector<8x1xf32>
    %10 = vector.broadcast %9 : vector<8x1xf32> to vector<8x32xf32>
    %11 = arith.subf %1, %10 : vector<8x32xf32>
    %12 = arith.mulf %11, %11 : vector<8x32xf32>
    %cst_7 = arith.constant dense<0.000000e+00> : vector<8xf32>
    %13 = vector.multi_reduction <add>, %12, %cst_7 [1] : vector<8x32xf32> to vector<8xf32>
    %14 = vector.shape_cast %13 : vector<8xf32> to vector<8x1xf32>
    %cst_8 = arith.constant 3.200000e+01 : f32
    %15 = vector.broadcast %cst_8 : f32 to vector<8x1xf32>
    %16 = arith.divf %14, %15 : vector<8x1xf32>
    %17 = vector.broadcast %9 : vector<8x1xf32> to vector<8x32xf32>
    %18 = arith.subf %1, %17 : vector<8x32xf32>
    %cst_9 = arith.constant 9.99999974E-6 : f32
    %19 = vector.broadcast %cst_9 : f32 to vector<8x1xf32>
    %20 = arith.addf %16, %19 : vector<8x1xf32>
    %21 = math.rsqrt %20 : vector<8x1xf32>
    %22 = vector.broadcast %21 : vector<8x1xf32> to vector<8x32xf32>
    %23 = arith.mulf %18, %22 : vector<8x32xf32>
    %24 = vector.shape_cast %3 : vector<32xf32> to vector<1x32xf32>
    %25 = vector.broadcast %24 : vector<1x32xf32> to vector<8x32xf32>
    %26 = arith.mulf %23, %25 : vector<8x32xf32>
    %27 = vector.shape_cast %5 : vector<32xf32> to vector<1x32xf32>
    %28 = vector.broadcast %27 : vector<1x32xf32> to vector<8x32xf32>
    %29 = arith.addf %26, %28 : vector<8x32xf32>
    %30 = arith.truncf %29 : vector<8x32xf32> to vector<8x32xbf16>
    %c0_10 = arith.constant 0 : index
    %c0_11 = arith.constant 0 : index
    %31 = vector.load %arg5[%c0_10, %c0_11] : memref<32x32xbf16, #tpu.memory_space<vmem>>, vector<32x32xbf16>
    %cst_12 = arith.constant dense<0.000000e+00> : vector<8x32xf32>
    %32 = tpu.matmul %30, %31, %cst_12 {dimension_numbers = #tpu.dot_dimension_numbers<[1], [0], [0], [1], [0, 0, 1, 1], [], []>} : vector<8x32xbf16>, vector<32x32xbf16>, vector<8x32xf32> -> vector<8x32xf32>
    %33 = vector.shape_cast %32 : vector<8x32xf32> to vector<8x4x8xf32>
    %34 = tpu.transpose %33, [1, 0, 2] : vector<8x4x8xf32> -> vector<4x8x8xf32>
    %35 = arith.truncf %34 : vector<4x8x8xf32> to vector<4x8x8xbf16>
    %c0_13 = arith.constant 0 : index
    %c0_14 = arith.constant 0 : index
    %c0_15 = arith.constant 0 : index
    %c0_16 = arith.constant 0 : index
    %36 = vector.load %arg8[%c0_13, %c0_14, %c0_15, %c0_16] : memref<1x4x8x8xbf16, #tpu.memory_space<vmem>>, vector<1x4x8x8xbf16>
    %37 = vector.shape_cast %36 : vector<1x4x8x8xbf16> to vector<4x8x8xbf16>
    %38 = vector.shape_cast %35 : vector<4x8x8xbf16> to vector<1x4x8x8xbf16>
    tpu.vector_store %arg8[%c0_13, %c0_14, %c0_15, %c0_16], %38 {strides = array<i32>} : memref<1x4x8x8xbf16, #tpu.memory_space<vmem>>, vector<1x4x8x8xbf16>,
    %c0_17 = arith.constant 0 : index
    %c0_18 = arith.constant 0 : index
    %39 = vector.load %arg6[%c0_17, %c0_18] : memref<32x32xbf16, #tpu.memory_space<vmem>>, vector<32x32xbf16>
    %cst_19 = arith.constant dense<0.000000e+00> : vector<8x32xf32>
    %40 = tpu.matmul %30, %39, %cst_19 {dimension_numbers = #tpu.dot_dimension_numbers<[1], [0], [0], [1], [0, 0, 1, 1], [], []>} : vector<8x32xbf16>, vector<32x32xbf16>, vector<8x32xf32> -> vector<8x32xf32>
    %41 = vector.shape_cast %40 : vector<8x32xf32> to vector<8x4x8xf32>
    %42 = tpu.transpose %41, [1, 0, 2] : vector<8x4x8xf32> -> vector<4x8x8xf32>
    %43 = arith.truncf %42 : vector<4x8x8xf32> to vector<4x8x8xbf16>
    %c0_20 = arith.constant 0 : index
    %c0_21 = arith.constant 0 : index
    %c0_22 = arith.constant 0 : index
    %c0_23 = arith.constant 0 : index
    %44 = vector.load %arg9[%c0_20, %c0_21, %c0_22, %c0_23] : memref<1x4x8x8xbf16, #tpu.memory_space<vmem>>, vector<1x4x8x8xbf16>
    %45 = vector.shape_cast %44 : vector<1x4x8x8xbf16> to vector<4x8x8xbf16>
    %46 = vector.shape_cast %43 : vector<4x8x8xbf16> to vector<1x4x8x8xbf16>
    tpu.vector_store %arg9[%c0_20, %c0_21, %c0_22, %c0_23], %46 {strides = array<i32>} : memref<1x4x8x8xbf16, #tpu.memory_space<vmem>>, vector<1x4x8x8xbf16>,
    %c0_24 = arith.constant 0 : index
    %c0_25 = arith.constant 0 : index
    %47 = vector.load %arg7[%c0_24, %c0_25] : memref<32x32xbf16, #tpu.memory_space<vmem>>, vector<32x32xbf16>
    %cst_26 = arith.constant dense<0.000000e+00> : vector<8x32xf32>
    %48 = tpu.matmul %30, %47, %cst_26 {dimension_numbers = #tpu.dot_dimension_numbers<[1], [0], [0], [1], [0, 0, 1, 1], [], []>} : vector<8x32xbf16>, vector<32x32xbf16>, vector<8x32xf32> -> vector<8x32xf32>
    %49 = vector.shape_cast %48 : vector<8x32xf32> to vector<8x4x8xf32>
    %50 = tpu.transpose %49, [1, 0, 2] : vector<8x4x8xf32> -> vector<4x8x8xf32>
    %51 = arith.truncf %50 : vector<4x8x8xf32> to vector<4x8x8xbf16>
    %c0_27 = arith.constant 0 : index
    %c0_28 = arith.constant 0 : index
    %c0_29 = arith.constant 0 : index
    %c0_30 = arith.constant 0 : index
    %52 = vector.load %arg10[%c0_27, %c0_28, %c0_29, %c0_30] : memref<1x4x8x8xbf16, #tpu.memory_space<vmem>>, vector<1x4x8x8xbf16>
    %53 = vector.shape_cast %52 : vector<1x4x8x8xbf16> to vector<4x8x8xbf16>
    %54 = vector.shape_cast %51 : vector<4x8x8xbf16> to vector<1x4x8x8xbf16>
    tpu.vector_store %arg10[%c0_27, %c0_28, %c0_29, %c0_30], %54 {strides = array<i32>} : memref<1x4x8x8xbf16, #tpu.memory_space<vmem>>, vector<1x4x8x8xbf16>,
    return
  }
  func.func @transform_0(%arg0: i32, %arg1: i32) -> (i32, i32, i32) {
    %c0_i32 = arith.constant 0 : i32
    %c0_i32_0 = arith.constant 0 : i32
    return %arg0, %arg1, %c0_i32 : i32, i32, i32
  }
  func.func @transform_1(%arg0: i32, %arg1: i32) -> (i32, i32) {
    %c0_i32 = arith.constant 0 : i32
    %c0_i32_0 = arith.constant 0 : i32
    %c0_i32_1 = arith.constant 0 : i32
    return %c0_i32, %c0_i32_0 : i32, i32
  }
  func.func @transform_2(%arg0: i32, %arg1: i32) -> (i32, i32) {
    %c0_i32 = arith.constant 0 : i32
    %c0_i32_0 = arith.constant 0 : i32
    %c0_i32_1 = arith.constant 0 : i32
    return %c0_i32, %c0_i32_0 : i32, i32
  }
  func.func @transform_3(%arg0: i32, %arg1: i32) -> (i32, i32) {
    %c0_i32 = arith.constant 0 : i32
    %c0_i32_0 = arith.constant 0 : i32
    %c0_i32_1 = arith.constant 0 : i32
    return %c0_i32, %c0_i32_0 : i32, i32
  }
  func.func @transform_4(%arg0: i32, %arg1: i32) -> (i32, i32) {
    %c0_i32 = arith.constant 0 : i32
    %c0_i32_0 = arith.constant 0 : i32
    %c0_i32_1 = arith.constant 0 : i32
    return %c0_i32, %c0_i32_0 : i32, i32
  }
  func.func @transform_5(%arg0: i32, %arg1: i32) -> (i32, i32) {
    %c0_i32 = arith.constant 0 : i32
    %c0_i32_0 = arith.constant 0 : i32
    %c0_i32_1 = arith.constant 0 : i32
    return %c0_i32, %c0_i32_0 : i32, i32
  }
  func.func @transform_6(%arg0: i32, %arg1: i32) -> (i32, i32, i32, i32) {
    %c0_i32 = arith.constant 0 : i32
    %c0_i32_0 = arith.constant 0 : i32
    %c0_i32_1 = arith.constant 0 : i32
    return %arg0, %c0_i32, %arg1, %c0_i32_0 : i32, i32, i32, i32
  }
  func.func @transform_7(%arg0: i32, %arg1: i32) -> (i32, i32, i32, i32) {
    %c0_i32 = arith.constant 0 : i32
    %c0_i32_0 = arith.constant 0 : i32
    %c0_i32_1 = arith.constant 0 : i32
    return %arg0, %c0_i32, %arg1, %c0_i32_0 : i32, i32, i32, i32
  }
  func.func @transform_8(%arg0: i32, %arg1: i32) -> (i32, i32, i32, i32) {
    %c0_i32 = arith.constant 0 : i32
    %c0_i32_0 = arith.constant 0 : i32
    %c0_i32_1 = arith.constant 0 : i32
    return %arg0, %c0_i32, %arg1, %c0_i32_0 : i32, i32, i32, i32
  }
}

module attributes {stable_mosaic.version = 11 : i64} {
  func.func @attn_mlp_kernel(%arg0: i32, %arg1: i32, %arg2: i32, %arg3: memref<1x8x32xf32, #tpu.memory_space<vmem>>, %arg4: memref<1x4x8x8xbf16, #tpu.memory_space<vmem>>, %arg5: memref<1x4x8x8xbf16, #tpu.memory_space<vmem>>, %arg6: memref<1x4x8x8xbf16, #tpu.memory_space<vmem>>, %arg7: memref<4x8x32xbf16, #tpu.memory_space<vmem>>, %arg8: memref<1x32xf32, #tpu.memory_space<vmem>>, %arg9: memref<1x32xf32, #tpu.memory_space<vmem>>, %arg10: memref<1x32xf32, #tpu.memory_space<vmem>>, %arg11: memref<32x64xbf16, #tpu.memory_space<vmem>>, %arg12: memref<1x64xf32, #tpu.memory_space<vmem>>, %arg13: memref<64x32xbf16, #tpu.memory_space<vmem>>, %arg14: memref<1x32xf32, #tpu.memory_space<vmem>>, %arg15: memref<1x32xf32, #tpu.memory_space<vmem>>, %arg16: memref<1x32xf32, #tpu.memory_space<vmem>>, %arg17: memref<1x8x32xf32, #tpu.memory_space<vmem>>, %arg18: memref<4x8x1xf32, #tpu.memory_space<vmem>>, %arg19: memref<4x8x1xf32, #tpu.memory_space<vmem>>, %arg20: memref<4x8x8xf32, #tpu.memory_space<vmem>>) attributes {dimension_semantics = [#tpu.dimension_semantics<parallel>, #tpu.dimension_semantics<parallel>, #tpu.dimension_semantics<arbitrary>], iteration_bounds = array<i64: 2, 1, 1>, scalar_prefetch = 0 : i64, scratch_operands = 3 : i64, tpu.core_type = #tpu.core_type<tc>, window_params = [{transform_indices = @transform_0, window_bounds = array<i64: 1, 8, 32>}, {transform_indices = @transform_1, window_bounds = array<i64: 1, 4, 8, 8>}, {transform_indices = @transform_2, window_bounds = array<i64: 1, 4, 8, 8>}, {transform_indices = @transform_3, window_bounds = array<i64: 1, 4, 8, 8>}, {pipeline_mode = #tpu.pipeline_mode<synchronous>, transform_indices = @transform_4, window_bounds = array<i64: 4, 8, 32>}, {pipeline_mode = #tpu.pipeline_mode<synchronous>, transform_indices = @transform_5, window_bounds = array<i64: 1, 32>}, {pipeline_mode = #tpu.pipeline_mode<synchronous>, transform_indices = @transform_6, window_bounds = array<i64: 1, 32>}, {pipeline_mode = #tpu.pipeline_mode<synchronous>, transform_indices = @transform_7, window_bounds = array<i64: 1, 32>}, {pipeline_mode = #tpu.pipeline_mode<synchronous>, transform_indices = @transform_8, window_bounds = array<i64: 32, 64>}, {pipeline_mode = #tpu.pipeline_mode<synchronous>, transform_indices = @transform_9, window_bounds = array<i64: 1, 64>}, {pipeline_mode = #tpu.pipeline_mode<synchronous>, transform_indices = @transform_10, window_bounds = array<i64: 64, 32>}, {pipeline_mode = #tpu.pipeline_mode<synchronous>, transform_indices = @transform_11, window_bounds = array<i64: 1, 32>}, {pipeline_mode = #tpu.pipeline_mode<synchronous>, transform_indices = @transform_12, window_bounds = array<i64: 1, 32>}, {pipeline_mode = #tpu.pipeline_mode<synchronous>, transform_indices = @transform_13, window_bounds = array<i64: 1, 32>}, {transform_indices = @transform_14, window_bounds = array<i64: 1, 8, 32>}]} {
    %c0_i32 = arith.constant 0 : i32
    %0 = arith.cmpi eq, %arg2, %c0_i32 : i32
    %1 = arith.extui %0 : i1 to i32
    %c0_i32_0 = arith.constant 0 : i32
    %2 = arith.cmpi ne, %1, %c0_i32_0 : i32
    scf.if %2 {
      %cst_35 = arith.constant 0xFF800000 : f32
      %36 = vector.broadcast %cst_35 : f32 to vector<4x8x1xf32>
      %c0_36 = arith.constant 0 : index
      %c0_37 = arith.constant 0 : index
      %c0_38 = arith.constant 0 : index
      %37 = vector.load %arg18[%c0_36, %c0_37, %c0_38] : memref<4x8x1xf32, #tpu.memory_space<vmem>>, vector<4x8x1xf32>
      tpu.vector_store %arg18[%c0_36, %c0_37, %c0_38], %36 {strides = array<i32>} : memref<4x8x1xf32, #tpu.memory_space<vmem>>, vector<4x8x1xf32>,
      %cst_39 = arith.constant 0.000000e+00 : f32
      %38 = vector.broadcast %cst_39 : f32 to vector<4x8x1xf32>
      %c0_40 = arith.constant 0 : index
      %c0_41 = arith.constant 0 : index
      %c0_42 = arith.constant 0 : index
      %39 = vector.load %arg19[%c0_40, %c0_41, %c0_42] : memref<4x8x1xf32, #tpu.memory_space<vmem>>, vector<4x8x1xf32>
      tpu.vector_store %arg19[%c0_40, %c0_41, %c0_42], %38 {strides = array<i32>} : memref<4x8x1xf32, #tpu.memory_space<vmem>>, vector<4x8x1xf32>,
      %cst_43 = arith.constant 0.000000e+00 : f32
      %40 = vector.broadcast %cst_43 : f32 to vector<4x8x8xf32>
      %c0_44 = arith.constant 0 : index
      %c0_45 = arith.constant 0 : index
      %c0_46 = arith.constant 0 : index
      %41 = vector.load %arg20[%c0_44, %c0_45, %c0_46] : memref<4x8x8xf32, #tpu.memory_space<vmem>>, vector<4x8x8xf32>
      tpu.vector_store %arg20[%c0_44, %c0_45, %c0_46], %40 {strides = array<i32>} : memref<4x8x8xf32, #tpu.memory_space<vmem>>, vector<4x8x8xf32>,
    } else {
    }
    %c0 = arith.constant 0 : index
    %c0_1 = arith.constant 0 : index
    %c0_2 = arith.constant 0 : index
    %c0_3 = arith.constant 0 : index
    %3 = vector.load %arg4[%c0, %c0_1, %c0_2, %c0_3] : memref<1x4x8x8xbf16, #tpu.memory_space<vmem>>, vector<1x4x8x8xbf16>
    %4 = vector.shape_cast %3 : vector<1x4x8x8xbf16> to vector<4x8x8xbf16>
    %c0_4 = arith.constant 0 : index
    %c0_5 = arith.constant 0 : index
    %c0_6 = arith.constant 0 : index
    %c0_7 = arith.constant 0 : index
    %5 = vector.load %arg5[%c0_4, %c0_5, %c0_6, %c0_7] : memref<1x4x8x8xbf16, #tpu.memory_space<vmem>>, vector<1x4x8x8xbf16>
    %6 = vector.shape_cast %5 : vector<1x4x8x8xbf16> to vector<4x8x8xbf16>
    %c0_8 = arith.constant 0 : index
    %c0_9 = arith.constant 0 : index
    %c0_10 = arith.constant 0 : index
    %c0_11 = arith.constant 0 : index
    %7 = vector.load %arg6[%c0_8, %c0_9, %c0_10, %c0_11] : memref<1x4x8x8xbf16, #tpu.memory_space<vmem>>, vector<1x4x8x8xbf16>
    %8 = vector.shape_cast %7 : vector<1x4x8x8xbf16> to vector<4x8x8xbf16>
    "tpu.trace_start"() <{level = 10 : i32, message = "hqd,hkd->hqk"}> : () -> ()
    %cst = arith.constant dense<0.000000e+00> : vector<4x8x8xf32>
    %9 = tpu.matmul %4, %6, %cst {dimension_numbers = #tpu.dot_dimension_numbers<[2], [2], [1], [1], [0, 0, 0, 1, 1, 1], [0], [0]>} : vector<4x8x8xbf16>, vector<4x8x8xbf16>, vector<4x8x8xf32> -> vector<4x8x8xf32>
    "tpu.trace_stop"() : () -> ()
    %c0_12 = arith.constant 0 : index
    %c0_13 = arith.constant 0 : index
    %c0_14 = arith.constant 0 : index
    %10 = vector.load %arg18[%c0_12, %c0_13, %c0_14] : memref<4x8x1xf32, #tpu.memory_space<vmem>>, vector<4x8x1xf32>
    %cst_15 = arith.constant dense<0xFF800000> : vector<4x8xf32>
    %11 = vector.multi_reduction <maximumf>, %9, %cst_15 [2] : vector<4x8x8xf32> to vector<4x8xf32>
    %12 = vector.shape_cast %11 : vector<4x8xf32> to vector<4x8x1xf32>
    %13 = arith.maximumf %10, %12 : vector<4x8x1xf32>
    %14 = arith.subf %10, %13 : vector<4x8x1xf32>
    %15 = math.exp %14 : vector<4x8x1xf32>
    %16 = vector.broadcast %13 : vector<4x8x1xf32> to vector<4x8x8xf32>
    %17 = arith.subf %9, %16 : vector<4x8x8xf32>
    %18 = math.exp %17 : vector<4x8x8xf32>
    %c0_16 = arith.constant 0 : index
    %c0_17 = arith.constant 0 : index
    %c0_18 = arith.constant 0 : index
    %19 = vector.load %arg19[%c0_16, %c0_17, %c0_18] : memref<4x8x1xf32, #tpu.memory_space<vmem>>, vector<4x8x1xf32>
    %20 = arith.mulf %15, %19 : vector<4x8x1xf32>
    %cst_19 = arith.constant dense<0.000000e+00> : vector<4x8xf32>
    %21 = vector.multi_reduction <add>, %18, %cst_19 [2] : vector<4x8x8xf32> to vector<4x8xf32>
    %22 = vector.shape_cast %21 : vector<4x8xf32> to vector<4x8x1xf32>
    %23 = arith.addf %20, %22 : vector<4x8x1xf32>
    %c0_20 = arith.constant 0 : index
    %c0_21 = arith.constant 0 : index
    %c0_22 = arith.constant 0 : index
    %24 = vector.load %arg19[%c0_20, %c0_21, %c0_22] : memref<4x8x1xf32, #tpu.memory_space<vmem>>, vector<4x8x1xf32>
    tpu.vector_store %arg19[%c0_20, %c0_21, %c0_22], %23 {strides = array<i32>} : memref<4x8x1xf32, #tpu.memory_space<vmem>>, vector<4x8x1xf32>,
    %c0_23 = arith.constant 0 : index
    %c0_24 = arith.constant 0 : index
    %c0_25 = arith.constant 0 : index
    %25 = vector.load %arg20[%c0_23, %c0_24, %c0_25] : memref<4x8x8xf32, #tpu.memory_space<vmem>>, vector<4x8x8xf32>
    %26 = vector.broadcast %15 : vector<4x8x1xf32> to vector<4x8x8xf32>
    %27 = arith.mulf %26, %25 : vector<4x8x8xf32>
    %28 = arith.truncf %18 : vector<4x8x8xf32> to vector<4x8x8xbf16>
    "tpu.trace_start"() <{level = 10 : i32, message = "hqk,hkd->hqd"}> : () -> ()
    %cst_26 = arith.constant dense<0.000000e+00> : vector<4x8x8xf32>
    %29 = tpu.matmul %28, %8, %cst_26 {dimension_numbers = #tpu.dot_dimension_numbers<[2], [1], [1], [2], [0, 0, 0, 1, 1, 2], [0], [0]>} : vector<4x8x8xbf16>, vector<4x8x8xbf16>, vector<4x8x8xf32> -> vector<4x8x8xf32>
    "tpu.trace_stop"() : () -> ()
    %30 = arith.addf %27, %29 : vector<4x8x8xf32>
    %c0_27 = arith.constant 0 : index
    %c0_28 = arith.constant 0 : index
    %c0_29 = arith.constant 0 : index
    %31 = vector.load %arg20[%c0_27, %c0_28, %c0_29] : memref<4x8x8xf32, #tpu.memory_space<vmem>>, vector<4x8x8xf32>
    tpu.vector_store %arg20[%c0_27, %c0_28, %c0_29], %30 {strides = array<i32>} : memref<4x8x8xf32, #tpu.memory_space<vmem>>, vector<4x8x8xf32>,
    %c0_30 = arith.constant 0 : index
    %c0_31 = arith.constant 0 : index
    %c0_32 = arith.constant 0 : index
    %32 = vector.load %arg18[%c0_30, %c0_31, %c0_32] : memref<4x8x1xf32, #tpu.memory_space<vmem>>, vector<4x8x1xf32>
    tpu.vector_store %arg18[%c0_30, %c0_31, %c0_32], %13 {strides = array<i32>} : memref<4x8x1xf32, #tpu.memory_space<vmem>>, vector<4x8x1xf32>,
    %c0_i32_33 = arith.constant 0 : i32
    %33 = arith.cmpi eq, %arg2, %c0_i32_33 : i32
    %34 = arith.extui %33 : i1 to i32
    %c0_i32_34 = arith.constant 0 : i32
    %35 = arith.cmpi ne, %34, %c0_i32_34 : i32
    scf.if %35 {
      %c0_35 = arith.constant 0 : index
      %c0_36 = arith.constant 0 : index
      %c0_37 = arith.constant 0 : index
      %36 = vector.load %arg20[%c0_35, %c0_36, %c0_37] : memref<4x8x8xf32, #tpu.memory_space<vmem>>, vector<4x8x8xf32>
      %c0_38 = arith.constant 0 : index
      %c0_39 = arith.constant 0 : index
      %c0_40 = arith.constant 0 : index
      %37 = vector.load %arg19[%c0_38, %c0_39, %c0_40] : memref<4x8x1xf32, #tpu.memory_space<vmem>>, vector<4x8x1xf32>
      %38 = tpu.reciprocal %37 {approx = true} : vector<4x8x1xf32> -> vector<4x8x1xf32>
      %39 = vector.broadcast %38 : vector<4x8x1xf32> to vector<4x8x8xf32>
      %40 = arith.mulf %36, %39 : vector<4x8x8xf32>
      %41 = arith.truncf %40 : vector<4x8x8xf32> to vector<4x8x8xbf16>
      %c0_41 = arith.constant 0 : index
      %c0_42 = arith.constant 0 : index
      %c0_43 = arith.constant 0 : index
      %42 = vector.load %arg7[%c0_41, %c0_42, %c0_43] : memref<4x8x32xbf16, #tpu.memory_space<vmem>>, vector<4x8x32xbf16>
      "tpu.trace_start"() <{level = 10 : i32, message = "hqd,hdD->hqD"}> : () -> ()
      %cst_44 = arith.constant dense<0.000000e+00> : vector<4x8x32xf32>
      %43 = tpu.matmul %41, %42, %cst_44 {dimension_numbers = #tpu.dot_dimension_numbers<[2], [1], [1], [2], [0, 0, 0, 1, 1, 2], [0], [0]>} : vector<4x8x8xbf16>, vector<4x8x32xbf16>, vector<4x8x32xf32> -> vector<4x8x32xf32>
      "tpu.trace_stop"() : () -> ()
      %cst_45 = arith.constant dense<0.000000e+00> : vector<8x32xf32>
      %44 = vector.multi_reduction <add>, %43, %cst_45 [0] : vector<4x8x32xf32> to vector<8x32xf32>
      %c0_46 = arith.constant 0 : index
      %c0_47 = arith.constant 0 : index
      %45 = vector.load %arg8[%c0_46, %c0_47] : memref<1x32xf32, #tpu.memory_space<vmem>>, vector<1x32xf32>
      %46 = vector.shape_cast %45 : vector<1x32xf32> to vector<32xf32>
      %47 = vector.shape_cast %46 : vector<32xf32> to vector<1x32xf32>
      %48 = vector.broadcast %47 : vector<1x32xf32> to vector<8x32xf32>
      %49 = arith.addf %44, %48 : vector<8x32xf32>
      %c0_48 = arith.constant 0 : index
      %c0_49 = arith.constant 0 : index
      %c0_50 = arith.constant 0 : index
      %50 = vector.load %arg3[%c0_48, %c0_49, %c0_50] : memref<1x8x32xf32, #tpu.memory_space<vmem>>, vector<1x8x32xf32>
      %51 = vector.shape_cast %50 : vector<1x8x32xf32> to vector<8x32xf32>
      %52 = arith.addf %49, %51 : vector<8x32xf32>
      %c0_51 = arith.constant 0 : index
      %c0_52 = arith.constant 0 : index
      %53 = vector.load %arg9[%c0_51, %c0_52] : memref<1x32xf32, #tpu.memory_space<vmem>>, vector<1x32xf32>
      %54 = vector.shape_cast %53 : vector<1x32xf32> to vector<32xf32>
      %c0_53 = arith.constant 0 : index
      %c0_54 = arith.constant 0 : index
      %55 = vector.load %arg10[%c0_53, %c0_54] : memref<1x32xf32, #tpu.memory_space<vmem>>, vector<1x32xf32>
      %56 = vector.shape_cast %55 : vector<1x32xf32> to vector<32xf32>
      %cst_55 = arith.constant dense<0.000000e+00> : vector<8xf32>
      %57 = vector.multi_reduction <add>, %52, %cst_55 [1] : vector<8x32xf32> to vector<8xf32>
      %58 = vector.shape_cast %57 : vector<8xf32> to vector<8x1xf32>
      %cst_56 = arith.constant 3.200000e+01 : f32
      %59 = vector.broadcast %cst_56 : f32 to vector<8x1xf32>
      %60 = arith.divf %58, %59 : vector<8x1xf32>
      %61 = vector.broadcast %60 : vector<8x1xf32> to vector<8x32xf32>
      %62 = arith.subf %52, %61 : vector<8x32xf32>
      %63 = arith.mulf %62, %62 : vector<8x32xf32>
      %cst_57 = arith.constant dense<0.000000e+00> : vector<8xf32>
      %64 = vector.multi_reduction <add>, %63, %cst_57 [1] : vector<8x32xf32> to vector<8xf32>
      %65 = vector.shape_cast %64 : vector<8xf32> to vector<8x1xf32>
      %cst_58 = arith.constant 3.200000e+01 : f32
      %66 = vector.broadcast %cst_58 : f32 to vector<8x1xf32>
      %67 = arith.divf %65, %66 : vector<8x1xf32>
      %68 = vector.broadcast %60 : vector<8x1xf32> to vector<8x32xf32>
      %69 = arith.subf %52, %68 : vector<8x32xf32>
      %cst_59 = arith.constant 9.99999974E-6 : f32
      %70 = vector.broadcast %cst_59 : f32 to vector<8x1xf32>
      %71 = arith.addf %67, %70 : vector<8x1xf32>
      %72 = math.rsqrt %71 : vector<8x1xf32>
      %73 = vector.broadcast %72 : vector<8x1xf32> to vector<8x32xf32>
      %74 = arith.mulf %69, %73 : vector<8x32xf32>
      %75 = vector.shape_cast %54 : vector<32xf32> to vector<1x32xf32>
      %76 = vector.broadcast %75 : vector<1x32xf32> to vector<8x32xf32>
      %77 = arith.mulf %74, %76 : vector<8x32xf32>
      %78 = vector.shape_cast %56 : vector<32xf32> to vector<1x32xf32>
      %79 = vector.broadcast %78 : vector<1x32xf32> to vector<8x32xf32>
      %80 = arith.addf %77, %79 : vector<8x32xf32>
      %81 = arith.truncf %80 : vector<8x32xf32> to vector<8x32xbf16>
      %c0_60 = arith.constant 0 : index
      %c0_61 = arith.constant 0 : index
      %82 = vector.load %arg11[%c0_60, %c0_61] : memref<32x64xbf16, #tpu.memory_space<vmem>>, vector<32x64xbf16>
      %cst_62 = arith.constant dense<0.000000e+00> : vector<8x64xf32>
      %83 = tpu.matmul %81, %82, %cst_62 {dimension_numbers = #tpu.dot_dimension_numbers<[1], [0], [0], [1], [0, 0, 1, 1], [], []>} : vector<8x32xbf16>, vector<32x64xbf16>, vector<8x64xf32> -> vector<8x64xf32>
      %c0_63 = arith.constant 0 : index
      %c0_64 = arith.constant 0 : index
      %84 = vector.load %arg12[%c0_63, %c0_64] : memref<1x64xf32, #tpu.memory_space<vmem>>, vector<1x64xf32>
      %85 = vector.shape_cast %84 : vector<1x64xf32> to vector<64xf32>
      %86 = vector.shape_cast %85 : vector<64xf32> to vector<1x64xf32>
      %87 = vector.broadcast %86 : vector<1x64xf32> to vector<8x64xf32>
      %88 = arith.addf %83, %87 : vector<8x64xf32>
      %cst_65 = arith.constant 5.000000e-01 : f32
      %89 = vector.broadcast %cst_65 : f32 to vector<8x64xf32>
      %90 = arith.mulf %89, %88 : vector<8x64xf32>
      %cst_66 = arith.constant 0.707106769 : f32
      %91 = vector.broadcast %cst_66 : f32 to vector<8x64xf32>
      %92 = arith.mulf %88, %91 : vector<8x64xf32>
      %93 = math.erf %92 : vector<8x64xf32>
      %cst_67 = arith.constant 1.000000e+00 : f32
      %94 = vector.broadcast %cst_67 : f32 to vector<8x64xf32>
      %95 = arith.addf %94, %93 : vector<8x64xf32>
      %96 = arith.mulf %90, %95 : vector<8x64xf32>
      %97 = arith.truncf %96 : vector<8x64xf32> to vector<8x64xbf16>
      %c0_68 = arith.constant 0 : index
      %c0_69 = arith.constant 0 : index
      %98 = vector.load %arg13[%c0_68, %c0_69] : memref<64x32xbf16, #tpu.memory_space<vmem>>, vector<64x32xbf16>
      %cst_70 = arith.constant dense<0.000000e+00> : vector<8x32xf32>
      %99 = tpu.matmul %97, %98, %cst_70 {dimension_numbers = #tpu.dot_dimension_numbers<[1], [0], [0], [1], [0, 0, 1, 1], [], []>} : vector<8x64xbf16>, vector<64x32xbf16>, vector<8x32xf32> -> vector<8x32xf32>
      %c0_71 = arith.constant 0 : index
      %c0_72 = arith.constant 0 : index
      %100 = vector.load %arg14[%c0_71, %c0_72] : memref<1x32xf32, #tpu.memory_space<vmem>>, vector<1x32xf32>
      %101 = vector.shape_cast %100 : vector<1x32xf32> to vector<32xf32>
      %102 = vector.shape_cast %101 : vector<32xf32> to vector<1x32xf32>
      %103 = vector.broadcast %102 : vector<1x32xf32> to vector<8x32xf32>
      %104 = arith.addf %99, %103 : vector<8x32xf32>
      %105 = arith.addf %104, %52 : vector<8x32xf32>
      %c0_73 = arith.constant 0 : index
      %c0_74 = arith.constant 0 : index
      %c0_75 = arith.constant 0 : index
      %106 = vector.load %arg17[%c0_73, %c0_74, %c0_75] : memref<1x8x32xf32, #tpu.memory_space<vmem>>, vector<1x8x32xf32>
      %107 = vector.shape_cast %106 : vector<1x8x32xf32> to vector<8x32xf32>
      %108 = vector.shape_cast %105 : vector<8x32xf32> to vector<1x8x32xf32>
      tpu.vector_store %arg17[%c0_73, %c0_74, %c0_75], %108 {strides = array<i32>} : memref<1x8x32xf32, #tpu.memory_space<vmem>>, vector<1x8x32xf32>,
    } else {
    }
    return
  }
  func.func @transform_0(%arg0: i32, %arg1: i32, %arg2: i32) -> (i32, i32, i32) {
    %c0_i32 = arith.constant 0 : i32
    %c0_i32_0 = arith.constant 0 : i32
    return %arg0, %arg1, %c0_i32 : i32, i32, i32
  }
  func.func @transform_1(%arg0: i32, %arg1: i32, %arg2: i32) -> (i32, i32, i32, i32) {
    %c0_i32 = arith.constant 0 : i32
    %c0_i32_0 = arith.constant 0 : i32
    %c0_i32_1 = arith.constant 0 : i32
    return %arg0, %c0_i32, %arg1, %c0_i32_0 : i32, i32, i32, i32
  }
  func.func @transform_2(%arg0: i32, %arg1: i32, %arg2: i32) -> (i32, i32, i32, i32) {
    %c0_i32 = arith.constant 0 : i32
    %c0_i32_0 = arith.constant 0 : i32
    %c0_i32_1 = arith.constant 0 : i32
    return %arg0, %c0_i32, %arg2, %c0_i32_0 : i32, i32, i32, i32
  }
  func.func @transform_3(%arg0: i32, %arg1: i32, %arg2: i32) -> (i32, i32, i32, i32) {
    %c0_i32 = arith.constant 0 : i32
    %c0_i32_0 = arith.constant 0 : i32
    %c0_i32_1 = arith.constant 0 : i32
    return %arg0, %c0_i32, %arg2, %c0_i32_0 : i32, i32, i32, i32
  }
  func.func @transform_4(%arg0: i32, %arg1: i32, %arg2: i32) -> (i32, i32, i32) {
    %c0_i32 = arith.constant 0 : i32
    %c0_i32_0 = arith.constant 0 : i32
    %c0_i32_1 = arith.constant 0 : i32
    %c0_i32_2 = arith.constant 0 : i32
    return %c0_i32, %c0_i32_0, %c0_i32_1 : i32, i32, i32
  }
  func.func @transform_5(%arg0: i32, %arg1: i32, %arg2: i32) -> (i32, i32) {
    %c0_i32 = arith.constant 0 : i32
    %c0_i32_0 = arith.constant 0 : i32
    %c0_i32_1 = arith.constant 0 : i32
    return %c0_i32, %c0_i32_0 : i32, i32
  }
  func.func @transform_6(%arg0: i32, %arg1: i32, %arg2: i32) -> (i32, i32) {
    %c0_i32 = arith.constant 0 : i32
    %c0_i32_0 = arith.constant 0 : i32
    %c0_i32_1 = arith.constant 0 : i32
    return %c0_i32, %c0_i32_0 : i32, i32
  }
  func.func @transform_7(%arg0: i32, %arg1: i32, %arg2: i32) -> (i32, i32) {
    %c0_i32 = arith.constant 0 : i32
    %c0_i32_0 = arith.constant 0 : i32
    %c0_i32_1 = arith.constant 0 : i32
    return %c0_i32, %c0_i32_0 : i32, i32
  }
  func.func @transform_8(%arg0: i32, %arg1: i32, %arg2: i32) -> (i32, i32) {
    %c0_i32 = arith.constant 0 : i32
    %c0_i32_0 = arith.constant 0 : i32
    %c0_i32_1 = arith.constant 0 : i32
    return %c0_i32, %c0_i32_0 : i32, i32
  }
  func.func @transform_9(%arg0: i32, %arg1: i32, %arg2: i32) -> (i32, i32) {
    %c0_i32 = arith.constant 0 : i32
    %c0_i32_0 = arith.constant 0 : i32
    %c0_i32_1 = arith.constant 0 : i32
    return %c0_i32, %c0_i32_0 : i32, i32
  }
  func.func @transform_10(%arg0: i32, %arg1: i32, %arg2: i32) -> (i32, i32) {
    %c0_i32 = arith.constant 0 : i32
    %c0_i32_0 = arith.constant 0 : i32
    %c0_i32_1 = arith.constant 0 : i32
    return %c0_i32, %c0_i32_0 : i32, i32
  }
  func.func @transform_11(%arg0: i32, %arg1: i32, %arg2: i32) -> (i32, i32) {
    %c0_i32 = arith.constant 0 : i32
    %c0_i32_0 = arith.constant 0 : i32
    %c0_i32_1 = arith.constant 0 : i32
    return %c0_i32, %c0_i32_0 : i32, i32
  }
  func.func @transform_12(%arg0: i32, %arg1: i32, %arg2: i32) -> (i32, i32) {
    %c0_i32 = arith.constant 0 : i32
    %c0_i32_0 = arith.constant 0 : i32
    %c0_i32_1 = arith.constant 0 : i32
    return %c0_i32, %c0_i32_0 : i32, i32
  }
  func.func @transform_13(%arg0: i32, %arg1: i32, %arg2: i32) -> (i32, i32) {
    %c0_i32 = arith.constant 0 : i32
    %c0_i32_0 = arith.constant 0 : i32
    %c0_i32_1 = arith.constant 0 : i32
    return %c0_i32, %c0_i32_0 : i32, i32
  }
  func.func @transform_14(%arg0: i32, %arg1: i32, %arg2: i32) -> (i32, i32, i32) {
    %c0_i32 = arith.constant 0 : i32
    %c0_i32_0 = arith.constant 0 : i32
    return %arg0, %arg1, %c0_i32 : i32, i32, i32
  }
}

module attributes {stable_mosaic.version = 11 : i64} {
  func.func @qkv_project_kernel(%arg0: i32, %arg1: i32, %arg2: memref<1x8x32xf32, #tpu.memory_space<vmem>>, %arg3: memref<1x32xf32, #tpu.memory_space<vmem>>, %arg4: memref<1x32xf32, #tpu.memory_space<vmem>>, %arg5: memref<32x32xbf16, #tpu.memory_space<vmem>>, %arg6: memref<32x32xbf16, #tpu.memory_space<vmem>>, %arg7: memref<32x32xbf16, #tpu.memory_space<vmem>>, %arg8: memref<1x4x8x8xbf16, #tpu.memory_space<vmem>>, %arg9: memref<1x4x8x8xbf16, #tpu.memory_space<vmem>>, %arg10: memref<1x4x8x8xbf16, #tpu.memory_space<vmem>>) attributes {dimension_semantics = [#tpu.dimension_semantics<parallel>, #tpu.dimension_semantics<parallel>], iteration_bounds = array<i64: 2, 1>, scalar_prefetch = 0 : i64, scratch_operands = 0 : i64, tpu.core_type = #tpu.core_type<tc>, window_params = [{transform_indices = @transform_0, window_bounds = array<i64: 1, 8, 32>}, {pipeline_mode = #tpu.pipeline_mode<synchronous>, transform_indices = @transform_1, window_bounds = array<i64: 1, 32>}, {pipeline_mode = #tpu.pipeline_mode<synchronous>, transform_indices = @transform_2, window_bounds = array<i64: 1, 32>}, {pipeline_mode = #tpu.pipeline_mode<synchronous>, transform_indices = @transform_3, window_bounds = array<i64: 32, 32>}, {pipeline_mode = #tpu.pipeline_mode<synchronous>, transform_indices = @transform_4, window_bounds = array<i64: 32, 32>}, {pipeline_mode = #tpu.pipeline_mode<synchronous>, transform_indices = @transform_5, window_bounds = array<i64: 32, 32>}, {transform_indices = @transform_6, window_bounds = array<i64: 1, 4, 8, 8>}, {transform_indices = @transform_7, window_bounds = array<i64: 1, 4, 8, 8>}, {transform_indices = @transform_8, window_bounds = array<i64: 1, 4, 8, 8>}]} {
    %c0 = arith.constant 0 : index
    %c0_0 = arith.constant 0 : index
    %c0_1 = arith.constant 0 : index
    %0 = vector.load %arg2[%c0, %c0_0, %c0_1] : memref<1x8x32xf32, #tpu.memory_space<vmem>>, vector<1x8x32xf32>
    %1 = vector.shape_cast %0 : vector<1x8x32xf32> to vector<8x32xf32>
    %c0_2 = arith.constant 0 : index
    %c0_3 = arith.constant 0 : index
    %2 = vector.load %arg3[%c0_2, %c0_3] : memref<1x32xf32, #tpu.memory_space<vmem>>, vector<1x32xf32>
    %3 = vector.shape_cast %2 : vector<1x32xf32> to vector<32xf32>
    %c0_4 = arith.constant 0 : index
    %c0_5 = arith.constant 0 : index
    %4 = vector.load %arg4[%c0_4, %c0_5] : memref<1x32xf32, #tpu.memory_space<vmem>>, vector<1x32xf32>
    %5 = vector.shape_cast %4 : vector<1x32xf32> to vector<32xf32>
    %cst = arith.constant dense<0.000000e+00> : vector<8xf32>
    %6 = vector.multi_reduction <add>, %1, %cst [1] : vector<8x32xf32> to vector<8xf32>
    %7 = vector.shape_cast %6 : vector<8xf32> to vector<8x1xf32>
    %cst_6 = arith.constant 3.200000e+01 : f32
    %8 = vector.broadcast %cst_6 : f32 to vector<8x1xf32>
    %9 = arith.divf %7, %8 : vector<8x1xf32>
    %10 = vector.broadcast %9 : vector<8x1xf32> to vector<8x32xf32>
    %11 = arith.subf %1, %10 : vector<8x32xf32>
    %12 = arith.mulf %11, %11 : vector<8x32xf32>
    %cst_7 = arith.constant dense<0.000000e+00> : vector<8xf32>
    %13 = vector.multi_reduction <add>, %12, %cst_7 [1] : vector<8x32xf32> to vector<8xf32>
    %14 = vector.shape_cast %13 : vector<8xf32> to vector<8x1xf32>
    %cst_8 = arith.constant 3.200000e+01 : f32
    %15 = vector.broadcast %cst_8 : f32 to vector<8x1xf32>
    %16 = arith.divf %14, %15 : vector<8x1xf32>
    %17 = vector.broadcast %9 : vector<8x1xf32> to vector<8x32xf32>
    %18 = arith.subf %1, %17 : vector<8x32xf32>
    %cst_9 = arith.constant 9.99999974E-6 : f32
    %19 = vector.broadcast %cst_9 : f32 to vector<8x1xf32>
    %20 = arith.addf %16, %19 : vector<8x1xf32>
    %21 = math.rsqrt %20 : vector<8x1xf32>
    %22 = vector.broadcast %21 : vector<8x1xf32> to vector<8x32xf32>
    %23 = arith.mulf %18, %22 : vector<8x32xf32>
    %24 = vector.shape_cast %3 : vector<32xf32> to vector<1x32xf32>
    %25 = vector.broadcast %24 : vector<1x32xf32> to vector<8x32xf32>
    %26 = arith.mulf %23, %25 : vector<8x32xf32>
    %27 = vector.shape_cast %5 : vector<32xf32> to vector<1x32xf32>
    %28 = vector.broadcast %27 : vector<1x32xf32> to vector<8x32xf32>
    %29 = arith.addf %26, %28 : vector<8x32xf32>
    %30 = arith.truncf %29 : vector<8x32xf32> to vector<8x32xbf16>
    %c0_10 = arith.constant 0 : index
    %c0_11 = arith.constant 0 : index
    %31 = vector.load %arg5[%c0_10, %c0_11] : memref<32x32xbf16, #tpu.memory_space<vmem>>, vector<32x32xbf16>
    %cst_12 = arith.constant dense<0.000000e+00> : vector<8x32xf32>
    %32 = tpu.matmul %30, %31, %cst_12 {dimension_numbers = #tpu.dot_dimension_numbers<[1], [0], [0], [1], [0, 0, 1, 1], [], []>} : vector<8x32xbf16>, vector<32x32xbf16>, vector<8x32xf32> -> vector<8x32xf32>
    %33 = vector.shape_cast %32 : vector<8x32xf32> to vector<8x4x8xf32>
    %34 = tpu.transpose %33, [1, 0, 2] : vector<8x4x8xf32> -> vector<4x8x8xf32>
    %35 = arith.truncf %34 : vector<4x8x8xf32> to vector<4x8x8xbf16>
    %c0_13 = arith.constant 0 : index
    %c0_14 = arith.constant 0 : index
    %c0_15 = arith.constant 0 : index
    %c0_16 = arith.constant 0 : index
    %36 = vector.load %arg8[%c0_13, %c0_14, %c0_15, %c0_16] : memref<1x4x8x8xbf16, #tpu.memory_space<vmem>>, vector<1x4x8x8xbf16>
    %37 = vector.shape_cast %36 : vector<1x4x8x8xbf16> to vector<4x8x8xbf16>
    %38 = vector.shape_cast %35 : vector<4x8x8xbf16> to vector<1x4x8x8xbf16>
    tpu.vector_store %arg8[%c0_13, %c0_14, %c0_15, %c0_16], %38 {strides = array<i32>} : memref<1x4x8x8xbf16, #tpu.memory_space<vmem>>, vector<1x4x8x8xbf16>,
    %c0_17 = arith.constant 0 : index
    %c0_18 = arith.constant 0 : index
    %39 = vector.load %arg6[%c0_17, %c0_18] : memref<32x32xbf16, #tpu.memory_space<vmem>>, vector<32x32xbf16>
    %cst_19 = arith.constant dense<0.000000e+00> : vector<8x32xf32>
    %40 = tpu.matmul %30, %39, %cst_19 {dimension_numbers = #tpu.dot_dimension_numbers<[1], [0], [0], [1], [0, 0, 1, 1], [], []>} : vector<8x32xbf16>, vector<32x32xbf16>, vector<8x32xf32> -> vector<8x32xf32>
    %41 = vector.shape_cast %40 : vector<8x32xf32> to vector<8x4x8xf32>
    %42 = tpu.transpose %41, [1, 0, 2] : vector<8x4x8xf32> -> vector<4x8x8xf32>
    %43 = arith.truncf %42 : vector<4x8x8xf32> to vector<4x8x8xbf16>
    %c0_20 = arith.constant 0 : index
    %c0_21 = arith.constant 0 : index
    %c0_22 = arith.constant 0 : index
    %c0_23 = arith.constant 0 : index
    %44 = vector.load %arg9[%c0_20, %c0_21, %c0_22, %c0_23] : memref<1x4x8x8xbf16, #tpu.memory_space<vmem>>, vector<1x4x8x8xbf16>
    %45 = vector.shape_cast %44 : vector<1x4x8x8xbf16> to vector<4x8x8xbf16>
    %46 = vector.shape_cast %43 : vector<4x8x8xbf16> to vector<1x4x8x8xbf16>
    tpu.vector_store %arg9[%c0_20, %c0_21, %c0_22, %c0_23], %46 {strides = array<i32>} : memref<1x4x8x8xbf16, #tpu.memory_space<vmem>>, vector<1x4x8x8xbf16>,
    %c0_24 = arith.constant 0 : index
    %c0_25 = arith.constant 0 : index
    %47 = vector.load %arg7[%c0_24, %c0_25] : memref<32x32xbf16, #tpu.memory_space<vmem>>, vector<32x32xbf16>
    %cst_26 = arith.constant dense<0.000000e+00> : vector<8x32xf32>
    %48 = tpu.matmul %30, %47, %cst_26 {dimension_numbers = #tpu.dot_dimension_numbers<[1], [0], [0], [1], [0, 0, 1, 1], [], []>} : vector<8x32xbf16>, vector<32x32xbf16>, vector<8x32xf32> -> vector<8x32xf32>
    %49 = vector.shape_cast %48 : vector<8x32xf32> to vector<8x4x8xf32>
    %50 = tpu.transpose %49, [1, 0, 2] : vector<8x4x8xf32> -> vector<4x8x8xf32>
    %51 = arith.truncf %50 : vector<4x8x8xf32> to vector<4x8x8xbf16>
    %c0_27 = arith.constant 0 : index
    %c0_28 = arith.constant 0 : index
    %c0_29 = arith.constant 0 : index
    %c0_30 = arith.constant 0 : index
    %52 = vector.load %arg10[%c0_27, %c0_28, %c0_29, %c0_30] : memref<1x4x8x8xbf16, #tpu.memory_space<vmem>>, vector<1x4x8x8xbf16>
    %53 = vector.shape_cast %52 : vector<1x4x8x8xbf16> to vector<4x8x8xbf16>
    %54 = vector.shape_cast %51 : vector<4x8x8xbf16> to vector<1x4x8x8xbf16>
    tpu.vector_store %arg10[%c0_27, %c0_28, %c0_29, %c0_30], %54 {strides = array<i32>} : memref<1x4x8x8xbf16, #tpu.memory_space<vmem>>, vector<1x4x8x8xbf16>,
    return
  }
  func.func @transform_0(%arg0: i32, %arg1: i32) -> (i32, i32, i32) {
    %c0_i32 = arith.constant 0 : i32
    %c0_i32_0 = arith.constant 0 : i32
    return %arg0, %arg1, %c0_i32 : i32, i32, i32
  }
  func.func @transform_1(%arg0: i32, %arg1: i32) -> (i32, i32) {
    %c0_i32 = arith.constant 0 : i32
    %c0_i32_0 = arith.constant 0 : i32
    %c0_i32_1 = arith.constant 0 : i32
    return %c0_i32, %c0_i32_0 : i32, i32
  }
  func.func @transform_2(%arg0: i32, %arg1: i32) -> (i32, i32) {
    %c0_i32 = arith.constant 0 : i32
    %c0_i32_0 = arith.constant 0 : i32
    %c0_i32_1 = arith.constant 0 : i32
    return %c0_i32, %c0_i32_0 : i32, i32
  }
  func.func @transform_3(%arg0: i32, %arg1: i32) -> (i32, i32) {
    %c0_i32 = arith.constant 0 : i32
    %c0_i32_0 = arith.constant 0 : i32
    %c0_i32_1 = arith.constant 0 : i32
    return %c0_i32, %c0_i32_0 : i32, i32
  }
  func.func @transform_4(%arg0: i32, %arg1: i32) -> (i32, i32) {
    %c0_i32 = arith.constant 0 : i32
    %c0_i32_0 = arith.constant 0 : i32
    %c0_i32_1 = arith.constant 0 : i32
    return %c0_i32, %c0_i32_0 : i32, i32
  }
  func.func @transform_5(%arg0: i32, %arg1: i32) -> (i32, i32) {
    %c0_i32 = arith.constant 0 : i32
    %c0_i32_0 = arith.constant 0 : i32
    %c0_i32_1 = arith.constant 0 : i32
    return %c0_i32, %c0_i32_0 : i32, i32
  }
  func.func @transform_6(%arg0: i32, %arg1: i32) -> (i32, i32, i32, i32) {
    %c0_i32 = arith.constant 0 : i32
    %c0_i32_0 = arith.constant 0 : i32
    %c0_i32_1 = arith.constant 0 : i32
    return %arg0, %c0_i32, %arg1, %c0_i32_0 : i32, i32, i32, i32
  }
  func.func @transform_7(%arg0: i32, %arg1: i32) -> (i32, i32, i32, i32) {
    %c0_i32 = arith.constant 0 : i32
    %c0_i32_0 = arith.constant 0 : i32
    %c0_i32_1 = arith.constant 0 : i32
    return %arg0, %c0_i32, %arg1, %c0_i32_0 : i32, i32, i32, i32
  }
  func.func @transform_8(%arg0: i32, %arg1: i32) -> (i32, i32, i32, i32) {
    %c0_i32 = arith.constant 0 : i32
    %c0_i32_0 = arith.constant 0 : i32
    %c0_i32_1 = arith.constant 0 : i32
    return %arg0, %c0_i32, %arg1, %c0_i32_0 : i32, i32, i32, i32
  }
}

module attributes {stable_mosaic.version = 11 : i64} {
  func.func @attn_mlp_kernel(%arg0: i32, %arg1: i32, %arg2: i32, %arg3: memref<1x8x32xf32, #tpu.memory_space<vmem>>, %arg4: memref<1x4x8x8xbf16, #tpu.memory_space<vmem>>, %arg5: memref<1x4x8x8xbf16, #tpu.memory_space<vmem>>, %arg6: memref<1x4x8x8xbf16, #tpu.memory_space<vmem>>, %arg7: memref<4x8x32xbf16, #tpu.memory_space<vmem>>, %arg8: memref<1x32xf32, #tpu.memory_space<vmem>>, %arg9: memref<1x32xf32, #tpu.memory_space<vmem>>, %arg10: memref<1x32xf32, #tpu.memory_space<vmem>>, %arg11: memref<32x64xbf16, #tpu.memory_space<vmem>>, %arg12: memref<1x64xf32, #tpu.memory_space<vmem>>, %arg13: memref<64x32xbf16, #tpu.memory_space<vmem>>, %arg14: memref<1x32xf32, #tpu.memory_space<vmem>>, %arg15: memref<1x32xf32, #tpu.memory_space<vmem>>, %arg16: memref<1x32xf32, #tpu.memory_space<vmem>>, %arg17: memref<1x8x32xf32, #tpu.memory_space<vmem>>, %arg18: memref<4x8x1xf32, #tpu.memory_space<vmem>>, %arg19: memref<4x8x1xf32, #tpu.memory_space<vmem>>, %arg20: memref<4x8x8xf32, #tpu.memory_space<vmem>>) attributes {dimension_semantics = [#tpu.dimension_semantics<parallel>, #tpu.dimension_semantics<parallel>, #tpu.dimension_semantics<arbitrary>], iteration_bounds = array<i64: 2, 1, 1>, scalar_prefetch = 0 : i64, scratch_operands = 3 : i64, tpu.core_type = #tpu.core_type<tc>, window_params = [{transform_indices = @transform_0, window_bounds = array<i64: 1, 8, 32>}, {transform_indices = @transform_1, window_bounds = array<i64: 1, 4, 8, 8>}, {transform_indices = @transform_2, window_bounds = array<i64: 1, 4, 8, 8>}, {transform_indices = @transform_3, window_bounds = array<i64: 1, 4, 8, 8>}, {pipeline_mode = #tpu.pipeline_mode<synchronous>, transform_indices = @transform_4, window_bounds = array<i64: 4, 8, 32>}, {pipeline_mode = #tpu.pipeline_mode<synchronous>, transform_indices = @transform_5, window_bounds = array<i64: 1, 32>}, {pipeline_mode = #tpu.pipeline_mode<synchronous>, transform_indices = @transform_6, window_bounds = array<i64: 1, 32>}, {pipeline_mode = #tpu.pipeline_mode<synchronous>, transform_indices = @transform_7, window_bounds = array<i64: 1, 32>}, {pipeline_mode = #tpu.pipeline_mode<synchronous>, transform_indices = @transform_8, window_bounds = array<i64: 32, 64>}, {pipeline_mode = #tpu.pipeline_mode<synchronous>, transform_indices = @transform_9, window_bounds = array<i64: 1, 64>}, {pipeline_mode = #tpu.pipeline_mode<synchronous>, transform_indices = @transform_10, window_bounds = array<i64: 64, 32>}, {pipeline_mode = #tpu.pipeline_mode<synchronous>, transform_indices = @transform_11, window_bounds = array<i64: 1, 32>}, {pipeline_mode = #tpu.pipeline_mode<synchronous>, transform_indices = @transform_12, window_bounds = array<i64: 1, 32>}, {pipeline_mode = #tpu.pipeline_mode<synchronous>, transform_indices = @transform_13, window_bounds = array<i64: 1, 32>}, {transform_indices = @transform_14, window_bounds = array<i64: 1, 8, 32>}]} {
    %c0_i32 = arith.constant 0 : i32
    %0 = arith.cmpi eq, %arg2, %c0_i32 : i32
    %1 = arith.extui %0 : i1 to i32
    %c0_i32_0 = arith.constant 0 : i32
    %2 = arith.cmpi ne, %1, %c0_i32_0 : i32
    scf.if %2 {
      %cst_35 = arith.constant 0xFF800000 : f32
      %36 = vector.broadcast %cst_35 : f32 to vector<4x8x1xf32>
      %c0_36 = arith.constant 0 : index
      %c0_37 = arith.constant 0 : index
      %c0_38 = arith.constant 0 : index
      %37 = vector.load %arg18[%c0_36, %c0_37, %c0_38] : memref<4x8x1xf32, #tpu.memory_space<vmem>>, vector<4x8x1xf32>
      tpu.vector_store %arg18[%c0_36, %c0_37, %c0_38], %36 {strides = array<i32>} : memref<4x8x1xf32, #tpu.memory_space<vmem>>, vector<4x8x1xf32>,
      %cst_39 = arith.constant 0.000000e+00 : f32
      %38 = vector.broadcast %cst_39 : f32 to vector<4x8x1xf32>
      %c0_40 = arith.constant 0 : index
      %c0_41 = arith.constant 0 : index
      %c0_42 = arith.constant 0 : index
      %39 = vector.load %arg19[%c0_40, %c0_41, %c0_42] : memref<4x8x1xf32, #tpu.memory_space<vmem>>, vector<4x8x1xf32>
      tpu.vector_store %arg19[%c0_40, %c0_41, %c0_42], %38 {strides = array<i32>} : memref<4x8x1xf32, #tpu.memory_space<vmem>>, vector<4x8x1xf32>,
      %cst_43 = arith.constant 0.000000e+00 : f32
      %40 = vector.broadcast %cst_43 : f32 to vector<4x8x8xf32>
      %c0_44 = arith.constant 0 : index
      %c0_45 = arith.constant 0 : index
      %c0_46 = arith.constant 0 : index
      %41 = vector.load %arg20[%c0_44, %c0_45, %c0_46] : memref<4x8x8xf32, #tpu.memory_space<vmem>>, vector<4x8x8xf32>
      tpu.vector_store %arg20[%c0_44, %c0_45, %c0_46], %40 {strides = array<i32>} : memref<4x8x8xf32, #tpu.memory_space<vmem>>, vector<4x8x8xf32>,
    } else {
    }
    %c0 = arith.constant 0 : index
    %c0_1 = arith.constant 0 : index
    %c0_2 = arith.constant 0 : index
    %c0_3 = arith.constant 0 : index
    %3 = vector.load %arg4[%c0, %c0_1, %c0_2, %c0_3] : memref<1x4x8x8xbf16, #tpu.memory_space<vmem>>, vector<1x4x8x8xbf16>
    %4 = vector.shape_cast %3 : vector<1x4x8x8xbf16> to vector<4x8x8xbf16>
    %c0_4 = arith.constant 0 : index
    %c0_5 = arith.constant 0 : index
    %c0_6 = arith.constant 0 : index
    %c0_7 = arith.constant 0 : index
    %5 = vector.load %arg5[%c0_4, %c0_5, %c0_6, %c0_7] : memref<1x4x8x8xbf16, #tpu.memory_space<vmem>>, vector<1x4x8x8xbf16>
    %6 = vector.shape_cast %5 : vector<1x4x8x8xbf16> to vector<4x8x8xbf16>
    %c0_8 = arith.constant 0 : index
    %c0_9 = arith.constant 0 : index
    %c0_10 = arith.constant 0 : index
    %c0_11 = arith.constant 0 : index
    %7 = vector.load %arg6[%c0_8, %c0_9, %c0_10, %c0_11] : memref<1x4x8x8xbf16, #tpu.memory_space<vmem>>, vector<1x4x8x8xbf16>
    %8 = vector.shape_cast %7 : vector<1x4x8x8xbf16> to vector<4x8x8xbf16>
    "tpu.trace_start"() <{level = 10 : i32, message = "hqd,hkd->hqk"}> : () -> ()
    %cst = arith.constant dense<0.000000e+00> : vector<4x8x8xf32>
    %9 = tpu.matmul %4, %6, %cst {dimension_numbers = #tpu.dot_dimension_numbers<[2], [2], [1], [1], [0, 0, 0, 1, 1, 1], [0], [0]>} : vector<4x8x8xbf16>, vector<4x8x8xbf16>, vector<4x8x8xf32> -> vector<4x8x8xf32>
    "tpu.trace_stop"() : () -> ()
    %c0_12 = arith.constant 0 : index
    %c0_13 = arith.constant 0 : index
    %c0_14 = arith.constant 0 : index
    %10 = vector.load %arg18[%c0_12, %c0_13, %c0_14] : memref<4x8x1xf32, #tpu.memory_space<vmem>>, vector<4x8x1xf32>
    %cst_15 = arith.constant dense<0xFF800000> : vector<4x8xf32>
    %11 = vector.multi_reduction <maximumf>, %9, %cst_15 [2] : vector<4x8x8xf32> to vector<4x8xf32>
    %12 = vector.shape_cast %11 : vector<4x8xf32> to vector<4x8x1xf32>
    %13 = arith.maximumf %10, %12 : vector<4x8x1xf32>
    %14 = arith.subf %10, %13 : vector<4x8x1xf32>
    %15 = math.exp %14 : vector<4x8x1xf32>
    %16 = vector.broadcast %13 : vector<4x8x1xf32> to vector<4x8x8xf32>
    %17 = arith.subf %9, %16 : vector<4x8x8xf32>
    %18 = math.exp %17 : vector<4x8x8xf32>
    %c0_16 = arith.constant 0 : index
    %c0_17 = arith.constant 0 : index
    %c0_18 = arith.constant 0 : index
    %19 = vector.load %arg19[%c0_16, %c0_17, %c0_18] : memref<4x8x1xf32, #tpu.memory_space<vmem>>, vector<4x8x1xf32>
    %20 = arith.mulf %15, %19 : vector<4x8x1xf32>
    %cst_19 = arith.constant dense<0.000000e+00> : vector<4x8xf32>
    %21 = vector.multi_reduction <add>, %18, %cst_19 [2] : vector<4x8x8xf32> to vector<4x8xf32>
    %22 = vector.shape_cast %21 : vector<4x8xf32> to vector<4x8x1xf32>
    %23 = arith.addf %20, %22 : vector<4x8x1xf32>
    %c0_20 = arith.constant 0 : index
    %c0_21 = arith.constant 0 : index
    %c0_22 = arith.constant 0 : index
    %24 = vector.load %arg19[%c0_20, %c0_21, %c0_22] : memref<4x8x1xf32, #tpu.memory_space<vmem>>, vector<4x8x1xf32>
    tpu.vector_store %arg19[%c0_20, %c0_21, %c0_22], %23 {strides = array<i32>} : memref<4x8x1xf32, #tpu.memory_space<vmem>>, vector<4x8x1xf32>,
    %c0_23 = arith.constant 0 : index
    %c0_24 = arith.constant 0 : index
    %c0_25 = arith.constant 0 : index
    %25 = vector.load %arg20[%c0_23, %c0_24, %c0_25] : memref<4x8x8xf32, #tpu.memory_space<vmem>>, vector<4x8x8xf32>
    %26 = vector.broadcast %15 : vector<4x8x1xf32> to vector<4x8x8xf32>
    %27 = arith.mulf %26, %25 : vector<4x8x8xf32>
    %28 = arith.truncf %18 : vector<4x8x8xf32> to vector<4x8x8xbf16>
    "tpu.trace_start"() <{level = 10 : i32, message = "hqk,hkd->hqd"}> : () -> ()
    %cst_26 = arith.constant dense<0.000000e+00> : vector<4x8x8xf32>
    %29 = tpu.matmul %28, %8, %cst_26 {dimension_numbers = #tpu.dot_dimension_numbers<[2], [1], [1], [2], [0, 0, 0, 1, 1, 2], [0], [0]>} : vector<4x8x8xbf16>, vector<4x8x8xbf16>, vector<4x8x8xf32> -> vector<4x8x8xf32>
    "tpu.trace_stop"() : () -> ()
    %30 = arith.addf %27, %29 : vector<4x8x8xf32>
    %c0_27 = arith.constant 0 : index
    %c0_28 = arith.constant 0 : index
    %c0_29 = arith.constant 0 : index
    %31 = vector.load %arg20[%c0_27, %c0_28, %c0_29] : memref<4x8x8xf32, #tpu.memory_space<vmem>>, vector<4x8x8xf32>
    tpu.vector_store %arg20[%c0_27, %c0_28, %c0_29], %30 {strides = array<i32>} : memref<4x8x8xf32, #tpu.memory_space<vmem>>, vector<4x8x8xf32>,
    %c0_30 = arith.constant 0 : index
    %c0_31 = arith.constant 0 : index
    %c0_32 = arith.constant 0 : index
    %32 = vector.load %arg18[%c0_30, %c0_31, %c0_32] : memref<4x8x1xf32, #tpu.memory_space<vmem>>, vector<4x8x1xf32>
    tpu.vector_store %arg18[%c0_30, %c0_31, %c0_32], %13 {strides = array<i32>} : memref<4x8x1xf32, #tpu.memory_space<vmem>>, vector<4x8x1xf32>,
    %c0_i32_33 = arith.constant 0 : i32
    %33 = arith.cmpi eq, %arg2, %c0_i32_33 : i32
    %34 = arith.extui %33 : i1 to i32
    %c0_i32_34 = arith.constant 0 : i32
    %35 = arith.cmpi ne, %34, %c0_i32_34 : i32
    scf.if %35 {
      %c0_35 = arith.constant 0 : index
      %c0_36 = arith.constant 0 : index
      %c0_37 = arith.constant 0 : index
      %36 = vector.load %arg20[%c0_35, %c0_36, %c0_37] : memref<4x8x8xf32, #tpu.memory_space<vmem>>, vector<4x8x8xf32>
      %c0_38 = arith.constant 0 : index
      %c0_39 = arith.constant 0 : index
      %c0_40 = arith.constant 0 : index
      %37 = vector.load %arg19[%c0_38, %c0_39, %c0_40] : memref<4x8x1xf32, #tpu.memory_space<vmem>>, vector<4x8x1xf32>
      %38 = tpu.reciprocal %37 {approx = true} : vector<4x8x1xf32> -> vector<4x8x1xf32>
      %39 = vector.broadcast %38 : vector<4x8x1xf32> to vector<4x8x8xf32>
      %40 = arith.mulf %36, %39 : vector<4x8x8xf32>
      %41 = arith.truncf %40 : vector<4x8x8xf32> to vector<4x8x8xbf16>
      %c0_41 = arith.constant 0 : index
      %c0_42 = arith.constant 0 : index
      %c0_43 = arith.constant 0 : index
      %42 = vector.load %arg7[%c0_41, %c0_42, %c0_43] : memref<4x8x32xbf16, #tpu.memory_space<vmem>>, vector<4x8x32xbf16>
      "tpu.trace_start"() <{level = 10 : i32, message = "hqd,hdD->hqD"}> : () -> ()
      %cst_44 = arith.constant dense<0.000000e+00> : vector<4x8x32xf32>
      %43 = tpu.matmul %41, %42, %cst_44 {dimension_numbers = #tpu.dot_dimension_numbers<[2], [1], [1], [2], [0, 0, 0, 1, 1, 2], [0], [0]>} : vector<4x8x8xbf16>, vector<4x8x32xbf16>, vector<4x8x32xf32> -> vector<4x8x32xf32>
      "tpu.trace_stop"() : () -> ()
      %cst_45 = arith.constant dense<0.000000e+00> : vector<8x32xf32>
      %44 = vector.multi_reduction <add>, %43, %cst_45 [0] : vector<4x8x32xf32> to vector<8x32xf32>
      %c0_46 = arith.constant 0 : index
      %c0_47 = arith.constant 0 : index
      %45 = vector.load %arg8[%c0_46, %c0_47] : memref<1x32xf32, #tpu.memory_space<vmem>>, vector<1x32xf32>
      %46 = vector.shape_cast %45 : vector<1x32xf32> to vector<32xf32>
      %47 = vector.shape_cast %46 : vector<32xf32> to vector<1x32xf32>
      %48 = vector.broadcast %47 : vector<1x32xf32> to vector<8x32xf32>
      %49 = arith.addf %44, %48 : vector<8x32xf32>
      %c0_48 = arith.constant 0 : index
      %c0_49 = arith.constant 0 : index
      %c0_50 = arith.constant 0 : index
      %50 = vector.load %arg3[%c0_48, %c0_49, %c0_50] : memref<1x8x32xf32, #tpu.memory_space<vmem>>, vector<1x8x32xf32>
      %51 = vector.shape_cast %50 : vector<1x8x32xf32> to vector<8x32xf32>
      %52 = arith.addf %49, %51 : vector<8x32xf32>
      %c0_51 = arith.constant 0 : index
      %c0_52 = arith.constant 0 : index
      %53 = vector.load %arg9[%c0_51, %c0_52] : memref<1x32xf32, #tpu.memory_space<vmem>>, vector<1x32xf32>
      %54 = vector.shape_cast %53 : vector<1x32xf32> to vector<32xf32>
      %c0_53 = arith.constant 0 : index
      %c0_54 = arith.constant 0 : index
      %55 = vector.load %arg10[%c0_53, %c0_54] : memref<1x32xf32, #tpu.memory_space<vmem>>, vector<1x32xf32>
      %56 = vector.shape_cast %55 : vector<1x32xf32> to vector<32xf32>
      %cst_55 = arith.constant dense<0.000000e+00> : vector<8xf32>
      %57 = vector.multi_reduction <add>, %52, %cst_55 [1] : vector<8x32xf32> to vector<8xf32>
      %58 = vector.shape_cast %57 : vector<8xf32> to vector<8x1xf32>
      %cst_56 = arith.constant 3.200000e+01 : f32
      %59 = vector.broadcast %cst_56 : f32 to vector<8x1xf32>
      %60 = arith.divf %58, %59 : vector<8x1xf32>
      %61 = vector.broadcast %60 : vector<8x1xf32> to vector<8x32xf32>
      %62 = arith.subf %52, %61 : vector<8x32xf32>
      %63 = arith.mulf %62, %62 : vector<8x32xf32>
      %cst_57 = arith.constant dense<0.000000e+00> : vector<8xf32>
      %64 = vector.multi_reduction <add>, %63, %cst_57 [1] : vector<8x32xf32> to vector<8xf32>
      %65 = vector.shape_cast %64 : vector<8xf32> to vector<8x1xf32>
      %cst_58 = arith.constant 3.200000e+01 : f32
      %66 = vector.broadcast %cst_58 : f32 to vector<8x1xf32>
      %67 = arith.divf %65, %66 : vector<8x1xf32>
      %68 = vector.broadcast %60 : vector<8x1xf32> to vector<8x32xf32>
      %69 = arith.subf %52, %68 : vector<8x32xf32>
      %cst_59 = arith.constant 9.99999974E-6 : f32
      %70 = vector.broadcast %cst_59 : f32 to vector<8x1xf32>
      %71 = arith.addf %67, %70 : vector<8x1xf32>
      %72 = math.rsqrt %71 : vector<8x1xf32>
      %73 = vector.broadcast %72 : vector<8x1xf32> to vector<8x32xf32>
      %74 = arith.mulf %69, %73 : vector<8x32xf32>
      %75 = vector.shape_cast %54 : vector<32xf32> to vector<1x32xf32>
      %76 = vector.broadcast %75 : vector<1x32xf32> to vector<8x32xf32>
      %77 = arith.mulf %74, %76 : vector<8x32xf32>
      %78 = vector.shape_cast %56 : vector<32xf32> to vector<1x32xf32>
      %79 = vector.broadcast %78 : vector<1x32xf32> to vector<8x32xf32>
      %80 = arith.addf %77, %79 : vector<8x32xf32>
      %81 = arith.truncf %80 : vector<8x32xf32> to vector<8x32xbf16>
      %c0_60 = arith.constant 0 : index
      %c0_61 = arith.constant 0 : index
      %82 = vector.load %arg11[%c0_60, %c0_61] : memref<32x64xbf16, #tpu.memory_space<vmem>>, vector<32x64xbf16>
      %cst_62 = arith.constant dense<0.000000e+00> : vector<8x64xf32>
      %83 = tpu.matmul %81, %82, %cst_62 {dimension_numbers = #tpu.dot_dimension_numbers<[1], [0], [0], [1], [0, 0, 1, 1], [], []>} : vector<8x32xbf16>, vector<32x64xbf16>, vector<8x64xf32> -> vector<8x64xf32>
      %c0_63 = arith.constant 0 : index
      %c0_64 = arith.constant 0 : index
      %84 = vector.load %arg12[%c0_63, %c0_64] : memref<1x64xf32, #tpu.memory_space<vmem>>, vector<1x64xf32>
      %85 = vector.shape_cast %84 : vector<1x64xf32> to vector<64xf32>
      %86 = vector.shape_cast %85 : vector<64xf32> to vector<1x64xf32>
      %87 = vector.broadcast %86 : vector<1x64xf32> to vector<8x64xf32>
      %88 = arith.addf %83, %87 : vector<8x64xf32>
      %cst_65 = arith.constant 5.000000e-01 : f32
      %89 = vector.broadcast %cst_65 : f32 to vector<8x64xf32>
      %90 = arith.mulf %89, %88 : vector<8x64xf32>
      %cst_66 = arith.constant 0.707106769 : f32
      %91 = vector.broadcast %cst_66 : f32 to vector<8x64xf32>
      %92 = arith.mulf %88, %91 : vector<8x64xf32>
      %93 = math.erf %92 : vector<8x64xf32>
      %cst_67 = arith.constant 1.000000e+00 : f32
      %94 = vector.broadcast %cst_67 : f32 to vector<8x64xf32>
      %95 = arith.addf %94, %93 : vector<8x64xf32>
      %96 = arith.mulf %90, %95 : vector<8x64xf32>
      %97 = arith.truncf %96 : vector<8x64xf32> to vector<8x64xbf16>
      %c0_68 = arith.constant 0 : index
      %c0_69 = arith.constant 0 : index
      %98 = vector.load %arg13[%c0_68, %c0_69] : memref<64x32xbf16, #tpu.memory_space<vmem>>, vector<64x32xbf16>
      %cst_70 = arith.constant dense<0.000000e+00> : vector<8x32xf32>
      %99 = tpu.matmul %97, %98, %cst_70 {dimension_numbers = #tpu.dot_dimension_numbers<[1], [0], [0], [1], [0, 0, 1, 1], [], []>} : vector<8x64xbf16>, vector<64x32xbf16>, vector<8x32xf32> -> vector<8x32xf32>
      %c0_71 = arith.constant 0 : index
      %c0_72 = arith.constant 0 : index
      %100 = vector.load %arg14[%c0_71, %c0_72] : memref<1x32xf32, #tpu.memory_space<vmem>>, vector<1x32xf32>
      %101 = vector.shape_cast %100 : vector<1x32xf32> to vector<32xf32>
      %102 = vector.shape_cast %101 : vector<32xf32> to vector<1x32xf32>
      %103 = vector.broadcast %102 : vector<1x32xf32> to vector<8x32xf32>
      %104 = arith.addf %99, %103 : vector<8x32xf32>
      %105 = arith.addf %104, %52 : vector<8x32xf32>
      %c0_73 = arith.constant 0 : index
      %c0_74 = arith.constant 0 : index
      %106 = vector.load %arg15[%c0_73, %c0_74] : memref<1x32xf32, #tpu.memory_space<vmem>>, vector<1x32xf32>
      %107 = vector.shape_cast %106 : vector<1x32xf32> to vector<32xf32>
      %c0_75 = arith.constant 0 : index
      %c0_76 = arith.constant 0 : index
      %108 = vector.load %arg16[%c0_75, %c0_76] : memref<1x32xf32, #tpu.memory_space<vmem>>, vector<1x32xf32>
      %109 = vector.shape_cast %108 : vector<1x32xf32> to vector<32xf32>
      %cst_77 = arith.constant dense<0.000000e+00> : vector<8xf32>
      %110 = vector.multi_reduction <add>, %105, %cst_77 [1] : vector<8x32xf32> to vector<8xf32>
      %111 = vector.shape_cast %110 : vector<8xf32> to vector<8x1xf32>
      %cst_78 = arith.constant 3.200000e+01 : f32
      %112 = vector.broadcast %cst_78 : f32 to vector<8x1xf32>
      %113 = arith.divf %111, %112 : vector<8x1xf32>
      %114 = vector.broadcast %113 : vector<8x1xf32> to vector<8x32xf32>
      %115 = arith.subf %105, %114 : vector<8x32xf32>
      %116 = arith.mulf %115, %115 : vector<8x32xf32>
      %cst_79 = arith.constant dense<0.000000e+00> : vector<8xf32>
      %117 = vector.multi_reduction <add>, %116, %cst_79 [1] : vector<8x32xf32> to vector<8xf32>
      %118 = vector.shape_cast %117 : vector<8xf32> to vector<8x1xf32>
      %cst_80 = arith.constant 3.200000e+01 : f32
      %119 = vector.broadcast %cst_80 : f32 to vector<8x1xf32>
      %120 = arith.divf %118, %119 : vector<8x1xf32>
      %121 = vector.broadcast %113 : vector<8x1xf32> to vector<8x32xf32>
      %122 = arith.subf %105, %121 : vector<8x32xf32>
      %cst_81 = arith.constant 9.99999974E-6 : f32
      %123 = vector.broadcast %cst_81 : f32 to vector<8x1xf32>
      %124 = arith.addf %120, %123 : vector<8x1xf32>
      %125 = math.rsqrt %124 : vector<8x1xf32>
      %126 = vector.broadcast %125 : vector<8x1xf32> to vector<8x32xf32>
      %127 = arith.mulf %122, %126 : vector<8x32xf32>
      %128 = vector.shape_cast %107 : vector<32xf32> to vector<1x32xf32>
      %129 = vector.broadcast %128 : vector<1x32xf32> to vector<8x32xf32>
      %130 = arith.mulf %127, %129 : vector<8x32xf32>
      %131 = vector.shape_cast %109 : vector<32xf32> to vector<1x32xf32>
      %132 = vector.broadcast %131 : vector<1x32xf32> to vector<8x32xf32>
      %133 = arith.addf %130, %132 : vector<8x32xf32>
      %c0_82 = arith.constant 0 : index
      %c0_83 = arith.constant 0 : index
      %c0_84 = arith.constant 0 : index
      %134 = vector.load %arg17[%c0_82, %c0_83, %c0_84] : memref<1x8x32xf32, #tpu.memory_space<vmem>>, vector<1x8x32xf32>
      %135 = vector.shape_cast %134 : vector<1x8x32xf32> to vector<8x32xf32>
      %136 = vector.shape_cast %133 : vector<8x32xf32> to vector<1x8x32xf32>
      tpu.vector_store %arg17[%c0_82, %c0_83, %c0_84], %136 {strides = array<i32>} : memref<1x8x32xf32, #tpu.memory_space<vmem>>, vector<1x8x32xf32>,
    } else {
    }
    return
  }
  func.func @transform_0(%arg0: i32, %arg1: i32, %arg2: i32) -> (i32, i32, i32) {
    %c0_i32 = arith.constant 0 : i32
    %c0_i32_0 = arith.constant 0 : i32
    return %arg0, %arg1, %c0_i32 : i32, i32, i32
  }
  func.func @transform_1(%arg0: i32, %arg1: i32, %arg2: i32) -> (i32, i32, i32, i32) {
    %c0_i32 = arith.constant 0 : i32
    %c0_i32_0 = arith.constant 0 : i32
    %c0_i32_1 = arith.constant 0 : i32
    return %arg0, %c0_i32, %arg1, %c0_i32_0 : i32, i32, i32, i32
  }
  func.func @transform_2(%arg0: i32, %arg1: i32, %arg2: i32) -> (i32, i32, i32, i32) {
    %c0_i32 = arith.constant 0 : i32
    %c0_i32_0 = arith.constant 0 : i32
    %c0_i32_1 = arith.constant 0 : i32
    return %arg0, %c0_i32, %arg2, %c0_i32_0 : i32, i32, i32, i32
  }
  func.func @transform_3(%arg0: i32, %arg1: i32, %arg2: i32) -> (i32, i32, i32, i32) {
    %c0_i32 = arith.constant 0 : i32
    %c0_i32_0 = arith.constant 0 : i32
    %c0_i32_1 = arith.constant 0 : i32
    return %arg0, %c0_i32, %arg2, %c0_i32_0 : i32, i32, i32, i32
  }
  func.func @transform_4(%arg0: i32, %arg1: i32, %arg2: i32) -> (i32, i32, i32) {
    %c0_i32 = arith.constant 0 : i32
    %c0_i32_0 = arith.constant 0 : i32
    %c0_i32_1 = arith.constant 0 : i32
    %c0_i32_2 = arith.constant 0 : i32
    return %c0_i32, %c0_i32_0, %c0_i32_1 : i32, i32, i32
  }
  func.func @transform_5(%arg0: i32, %arg1: i32, %arg2: i32) -> (i32, i32) {
    %c0_i32 = arith.constant 0 : i32
    %c0_i32_0 = arith.constant 0 : i32
    %c0_i32_1 = arith.constant 0 : i32
    return %c0_i32, %c0_i32_0 : i32, i32
  }
  func.func @transform_6(%arg0: i32, %arg1: i32, %arg2: i32) -> (i32, i32) {
    %c0_i32 = arith.constant 0 : i32
    %c0_i32_0 = arith.constant 0 : i32
    %c0_i32_1 = arith.constant 0 : i32
    return %c0_i32, %c0_i32_0 : i32, i32
  }
  func.func @transform_7(%arg0: i32, %arg1: i32, %arg2: i32) -> (i32, i32) {
    %c0_i32 = arith.constant 0 : i32
    %c0_i32_0 = arith.constant 0 : i32
    %c0_i32_1 = arith.constant 0 : i32
    return %c0_i32, %c0_i32_0 : i32, i32
  }
  func.func @transform_8(%arg0: i32, %arg1: i32, %arg2: i32) -> (i32, i32) {
    %c0_i32 = arith.constant 0 : i32
    %c0_i32_0 = arith.constant 0 : i32
    %c0_i32_1 = arith.constant 0 : i32
    return %c0_i32, %c0_i32_0 : i32, i32
  }
  func.func @transform_9(%arg0: i32, %arg1: i32, %arg2: i32) -> (i32, i32) {
    %c0_i32 = arith.constant 0 : i32
    %c0_i32_0 = arith.constant 0 : i32
    %c0_i32_1 = arith.constant 0 : i32
    return %c0_i32, %c0_i32_0 : i32, i32
  }
  func.func @transform_10(%arg0: i32, %arg1: i32, %arg2: i32) -> (i32, i32) {
    %c0_i32 = arith.constant 0 : i32
    %c0_i32_0 = arith.constant 0 : i32
    %c0_i32_1 = arith.constant 0 : i32
    return %c0_i32, %c0_i32_0 : i32, i32
  }
  func.func @transform_11(%arg0: i32, %arg1: i32, %arg2: i32) -> (i32, i32) {
    %c0_i32 = arith.constant 0 : i32
    %c0_i32_0 = arith.constant 0 : i32
    %c0_i32_1 = arith.constant 0 : i32
    return %c0_i32, %c0_i32_0 : i32, i32
  }
  func.func @transform_12(%arg0: i32, %arg1: i32, %arg2: i32) -> (i32, i32) {
    %c0_i32 = arith.constant 0 : i32
    %c0_i32_0 = arith.constant 0 : i32
    %c0_i32_1 = arith.constant 0 : i32
    return %c0_i32, %c0_i32_0 : i32, i32
  }
  func.func @transform_13(%arg0: i32, %arg1: i32, %arg2: i32) -> (i32, i32) {
    %c0_i32 = arith.constant 0 : i32
    %c0_i32_0 = arith.constant 0 : i32
    %c0_i32_1 = arith.constant 0 : i32
    return %c0_i32, %c0_i32_0 : i32, i32
  }
  func.func @transform_14(%arg0: i32, %arg1: i32, %arg2: i32) -> (i32, i32, i32) {
    %c0_i32 = arith.constant 0 : i32
    %c0_i32_0 = arith.constant 0 : i32
    return %arg0, %arg1, %c0_i32 : i32, i32, i32
  }
}

</mosaic_0001>

<bundles_post_ra>
// kernel: transformer_forward.6
= control target key start
LH: loop header
LB: loop body
LE: loop exit
PB: predicated region body
PF: predicated region fallthrough
CT: control target
= control target key end

     0   :  { %14 = vsyncpa [#allocation3], 0  ;;  %s1808_s0 = inlined_call_operand.vmem [shape: f32[2,8,32], index: 0, kind: input, shape index: {}]   ;;  %s1809_s1 = inlined_call_operand.vmem [shape: f32[1,32], index: 1, kind: input, shape index: {}]   ;;  %s1810_s2 = inlined_call_operand.hbm [shape: f32[1,32], index: 2, kind: input, shape index: {}]   ;;  %s1811_s3 = inlined_call_operand.hbm [shape: bf16[32,32], index: 3, kind: input, shape index: {}]   ;;  %s1812_s4 = inlined_call_operand.hbm [shape: bf16[32,32], index: 4, kind: input, shape index: {}]   ;;  %s1813_s5 = inlined_call_operand.hbm [shape: bf16[32,32], index: 5, kind: input, shape index: {}]   ;;  %s1814_s6 = inlined_call_operand.vmem [shape: bf16[2,4,8,8], index: 6, kind: output, shape index: {0}]   ;;  %s1815_s7 = inlined_call_operand.vmem [shape: bf16[2,4,8,8], index: 7, kind: output, shape index: {1}]   ;;  %s1816_s8 = inlined_call_operand.vmem [shape: bf16[2,4,8,8], index: 8, kind: output, shape index: {2}]  }
   0x1   :  { %15 = vsyncpa [#allocation5], 0 }
   0x2   :  { %16 = vsyncpa [#allocation8], 0  ;;  %s1540_s27 = smov 0   ;;  %s1542_s28 = smov 0  }
   0x3   :  { %s1544_s29 = smov 0  }
   0x4 LB: > { %s282_s10 = sshll.u32 %s1811_s3, 4  ;;  %s1175_s11 = sadd.s32 4294967295, %s1481_s29   ;;  %s1481_s29 = sphi %s1544_s29, %s22_s29   ;;  %s1477_s28 = sphi %s1542_s28, %s1821_s28   ;;  %s1473_s27 = sphi %s1540_s27, %s1820_s27   ;;  %s283_s10 = int_to_ptr.hbm [resolvable:$true] %s282_s10 }
   0x5   : > { %p1177_p0 = scmp.ge.s32.totalorder %s1481_s29, 1  ;;  %p256_p1 = scmp.lt.s32.totalorder %s1481_s29, 3 }
   0x6   : > { %p1561_p2 = scmp.eq.s32.totalorder %s1175_s11, 0  ;;  %s1483_s14 = smov [#allocation4]  }
   0x7   : > { %p1565_p3 = pnand %p1177_p0, %p256_p1  ;;  %s284_s15 = sshll.u32 %s1483_s14, 4  ;;  %s285_s15 = int_to_ptr.vmem [resolvable:$true] %s284_s15 }
   0x8   : > { %s34_s17 = sadd.s32 1, %s1477_s28  ;;  %s1484_s18 = smov 64  }
   0x9   : > { %p1249_p4 = pneg %p1565_p3  ;;  %p36_p6 = scmp.ge.s32.totalorder %s34_s17, 2 }
   0xa   : > { %s1485_s19 = smov 4   ;;  %s271_s22 = sshll.u32 %s1810_s2, 4  ;;  %s272_s22 = int_to_ptr.hbm [resolvable:$true] %s271_s22 }
   0xb   : > { %p1573_p5 = pnand %p1561_p2, %p1249_p4  ;;  %s1823_s17 = smov (%p36_p6, %s34_s17), 0 }
   0xc   : > { %s1486_s23 = smov [#allocation2]   ;;  %s296_s30 = sshll.u32 %s1812_s4, 4  ;;  %s297_s30 = int_to_ptr.hbm [resolvable:$true] %s296_s30 }
   0xd   : > { %1255 = dma.hbm_to_vmem [thread:$0]  (!%p1573_p5), %s283_s10, 256, %s285_s15, [#allocation5], %s1484_s18, %s1484_s18, %s1485_s19  }
   0xe   : > { %s273_s24 = sshll.u32 %s1486_s23, 4  ;;  %s1487_s9 = smov [#allocation6]   ;;  %s274_s24 = int_to_ptr.vmem [resolvable:$true] %s273_s24 }
   0xf   : > { %1252 = dma.hbm_to_vmem [thread:$0]  (!%p1573_p5), %s272_s22, 16, %s274_s24, [#allocation3]  }
  0x10   : > { %s298_s10 = sshll.u32 %s1487_s9, 4  ;;  %s310_s15 = sshll.u32 %s1813_s5, 4  ;;  %s299_s10 = int_to_ptr.vmem [resolvable:$true] %s298_s10  ;;  %s311_s15 = int_to_ptr.hbm [resolvable:$true] %s310_s15 }
  0x11   : > { %1258 = dma.hbm_to_vmem [thread:$0]  (!%p1573_p5), %s297_s30, 256, %s299_s10, [#allocation5], %s1484_s18, %s1484_s18, %s1485_s19  }
  0x12   : > { %s1488_s20 = smov [#allocation7]   ;;  %338 = sbr.rel (%p1565_p3) target bundleno = 606 (0x25e), region = 44 }
  0x13   : > { %s312_s21 = sshll.u32 %s1488_s20, 4  ;;  %s313_s21 = int_to_ptr.vmem [resolvable:$true] %s312_s21 }
  0x14   : > { %1261 = dma.hbm_to_vmem [thread:$0]  (!%p1573_p5), %s311_s15, 256, %s313_s21, [#allocation8], %s1484_s18, %s1484_s18, %s1485_s19  }
  0x17   : > { %1460 = dma.done.wait (%p1561_p2), [#allocation3], 16  }
  0x18   : > { %1462 = vsyncadd (%p1561_p2), [#allocation3], 4294967280 }
  0x19   : > { %1464 = dma.done.wait (%p1561_p2), [#allocation5], 512  }
  0x1a   : > { %1466 = vsyncadd (%p1561_p2), [#allocation5], 4294966784 }
  0x1b   : > { %1468 = dma.done.wait (%p1561_p2), [#allocation8], 256  }
  0x1c   : > { %1470 = vsyncadd (%p1561_p2), [#allocation8], 4294967040  ;;  %p409_p7 = scmp.lt.s32.totalorder %s1473_s27, 1  ;;  %vm444_vm0 = vcmask 261120   ;;  %v1489_v2 = vmov 32.0   ;;  %v1228_v14 = vld [vmem:[#allocation4 + $0x8] sm:$0xff] }
  0x1d   : > { %1323 = vrcp.f32 %v1489_v2  ;;  %v1230_v15 = vld [vmem:[#allocation6 + $0x8] sm:$0xff]  ;;  %v1232_v16 = vld [vmem:[#allocation7 + $0x8] sm:$0xff]  ;;  %508 = vmatpush.bf16.msra.mxu0 %v1228_v14  ;;  %v1227_v17 = vld [vmem:[#allocation4] sm:$0xff]  ;;  %s1490_s23 = smov 120   ;;  %s1491_s24 = smov 112   ;;  %vm526_vm5 = vcmask 1047556  }
  0x1e   : > { %s1825_s27 = smov (!%p409_p7, %s1473_s27), 1  ;;  %667 = vmatpush.bf16.msra.mxu1 %v1230_v15  ;;  %v1229_v18 = vld [vmem:[#allocation6] sm:$0xff]  ;;  %824 = vmatpush.bf16.msra.mxu2 %v1232_v16  ;;  %v1231_v19 = vld [vmem:[#allocation7] sm:$0xff]  ;;  %v1321_v29 = vld [vmem:[%s1809_s1] ss:$0 sm:$0xff]  ;;  %s1492_s25 = smov 104  }
  0x1f   : > { %s1188_s13 = sshll.u32 %s1825_s27, 3  ;;  %v1322_v32 = vld [vmem:[#allocation2] ss:$0 sm:$0xff]  ;;  %v1493_v49 = vmov 1983009808   ;;  %vm640_vm6 = vcmask 60416  }
  0x20   : > { %s415_s19 = scalar_lea.vmem %s1808_s0, %s1188_s13  ;;  %v531_v50 = vunpack.c.l.s4 %v1493_v49  ;;  %v1494_v60 = vmov 1934713408   ;;  %s1695_s26 = sshll.u32 %s1825_s27, 4 }
  0x21   : > { %v441_v0 = vld [vmem:[%s415_s19] sm:$0xff]  ;;  %509 = vmatpush.bf16.msra.mxu0 %v1227_v17  ;;  %v555_v61 = vunpack.c.l.s4 %v1494_v60  ;;  %s1710_s9 = scalar_lea.vmem %s1815_s7, %s1695_s26  ;;  %s423_s14 = scalar_lea.vmem %s1814_s6, %s1695_s26 }
  0x22   : > { %v445_v1 = vsel %vm444_vm0, %v441_v0, 0.0  ;;  %668 = vmatpush.bf16.msra.mxu1 %v1229_v18  ;;  %825 = vmatpush.bf16.msra.mxu2 %v1231_v19  ;;  %v1632_v55 = vunpack.c.0.s8 %v531_v50  ;;  %s439_s21 = scalar_lea.vmem %s1816_s8, %s1695_s26 }
  0x23   : > { %446 = vadd.xlane.f32.xlu0 %v445_v1  ;;  %v1324_v3 = vpop.eup %1323 }
  0x24   : > { %v449_v4 = vmul.f32 32.0, %v1324_v3  ;;  %vm453_vm1 = vweird.f32 %v1324_v3 }
  0x26   : > { %v450_v5 = vsub.f32 1.0, %v449_v4 }
  0x28   : > { %v451_v6 = vmul.f32 %v1324_v3, %v450_v5 }
  0x2a   : > { %v452_v7 = vadd.f32 %v1324_v3, %v451_v6 }
  0x2c   : > { %v454_v8 = vsel %vm453_vm1, %v1324_v3, %v452_v7  ;;  %v1642_v7 = vunpack.c.0.s8 %v555_v61 }
  0x96   : > { %v447_v9 = vpop.xlane.xlu0 %446 }
  0x97   : > { %v455_v10 = vmul.f32 %v454_v8, %v447_v9 }
  0x99   : > { %v456_v11 = vsub.f32 %v441_v0, %v455_v10 }
  0x9b   : > { %v457_v12 = vmul.f32 %v456_v11, %v456_v11 }
  0x9d   : > { %v458_v13 = vsel %vm444_vm0, %v457_v12, 0.0 }
  0x9e   : > { %459 = vadd.xlane.f32.xlu0 %v458_v13 }
 0x111   : > { %v460_v20 = vpop.xlane.xlu0 %459 }
 0x112   : > { %v461_v21 = vmul.f32 %v460_v20, %v454_v8 }
 0x114   : > { %v462_v22 = vadd.f32 1e-05, %v461_v21 }
 0x116   : > { %1325 = vrsqrt.f32 %v462_v22  ;;  %vm469_vm3 = vweird.f32 %v462_v22 }
 0x11c   : > { %v1326_v23 = vpop.eup %1325 }
 0x11d   : > { %v464_v24 = vmul.f32 %v1326_v23, %v462_v22  ;;  %vm470_vm2 = vweird.f32 %v1326_v23 }
 0x11e   : > { %vm471_vm4 = vmor %vm469_vm3, %vm470_vm2 }
 0x11f   : > { %v465_v25 = vmul.f32 %v1326_v23, %v464_v24 }
 0x121   : > { %v466_v26 = vmul.f32 0.5, %v465_v25 }
 0x123   : > { %v467_v27 = vsub.f32 1.5, %v466_v26 }
 0x125   : > { %v468_v28 = vmul.f32 %v1326_v23, %v467_v27 }
 0x127   : > { %v472_v30 = vsel %vm471_vm4, %v1326_v23, %v468_v28 }
 0x128   : > { %v473_v31 = vmul.f32 %v472_v30, %v456_v11 }
 0x12a   : > { %v477_v33 = vmul.f32 %v1321_v29, %v473_v31 }
 0x12c   : > { %v481_v34 = vadd.f32 %v1322_v32, %v477_v33 }
 0x12e   : > { %v482_v35 = vpack.c.bf16 %v481_v34, %v481_v34 }
 0x130   : > { %1203 = vmatmul.msk.bf16.vlgmr.msra.gmra.mxu0 %vm444_vm0, %v482_v35  ;;  %1212 = vmatmul.msk.bf16.vlgmr.msra.gmra.mxu1 %vm444_vm0, %v482_v35 }
 0x131   : > { %1221 = vmatmul.msk.bf16.vlgmr.msra.gmra.mxu2 %vm444_vm0, %v482_v35 }
 0x1ad   : > { %v511_v36 = vpop.f32.mrf.mxu0  ;;  %v670_v37 = vpop.f32.mrf.mxu1 }
 0x1ae   : > { %v1311_v38 = vpack.i.bf16 %v670_v37, %v511_v36  ;;  %v528_v62 = vrot.slane %v511_v36, 4  ;;  %v686_v63 = vrot.slane %v670_v37, 4 }
 0x1b0   : > { %1312 = vrot.lane.b32.xlu2 %v1311_v38, %s1490_s23  ;;  %1307 = vrot.lane.b32.xlu1 %v1311_v38, %s1491_s24 }
 0x1b4   : > { %v1627_v39 = vpop.f32.mrf.mxu2 }
 0x1b5   : > { %832 = vrot.lane.b32.xlu0 %v1627_v39, %s1490_s23  ;;  %v513_v40 = vpop.f32.mrf.mxu0  ;;  %v672_v41 = vpop.f32.mrf.mxu1  ;;  %v843_v8 = vrot.slane %v1627_v39, 4 }
 0x1b8   : > { %1317 = vrot.lane.b32.xlu2 %v1311_v38, %s1492_s25  ;;  %835 = vrot.lane.b32.xlu1 %v1627_v39, %s1491_s24 }
 0x1bc   : > { %v829_v42 = vpop.f32.mrf.mxu2 }
 0x1c0   : > { %838 = vrot.lane.b32.xlu1 %v1627_v39, %s1492_s25 }
 0x20a   : > { %v1313_v43 = vpop.permute.xlu2 %1312 }
 0x20b   : > { %v1315_v47 = vunpack.i.h.bf16 %v1313_v43  ;;  %v1314_v48 = vunpack.i.l.bf16 %v1313_v43 }
 0x20d   : > { %v698_v53 = vrot.slane %v1315_v47, 4  ;;  %v540_v54 = vrot.slane %v1314_v48, 4 }
 0x212   : > { %v1318_v44 = vpop.permute.xlu2 %1317 }
 0x213   : > { %v1320_v45 = vunpack.i.h.bf16 %v1318_v44  ;;  %v1319_v46 = vunpack.i.l.bf16 %v1318_v44 }
 0x215   : > { %v696_v51 = vrot.slane %v1320_v45, 4  ;;  %v538_v52 = vrot.slane %v1319_v46, 4  ;;  %v541_v56 = vsel %vm526_vm5, %v1319_v46, %v540_v54  ;;  %v699_v57 = vsel %vm526_vm5, %v1320_v45, %v698_v53 }
 0x216   : > { %v549_v0 = vperm.slane %v541_v56, %v1632_v55  ;;  %v707_v1 = vperm.slane %v699_v57, %v1632_v55 }
 0x217   : > { %v539_v58 = vsel %vm526_vm5, %v538_v52, %v1314_v48  ;;  %v697_v59 = vsel %vm526_vm5, %v696_v51, %v1315_v47 }
 0x218   : > { %v545_v3 = vperm.slane %v539_v58, %v1632_v55  ;;  %v703_v4 = vperm.slane %v697_v59, %v1632_v55  ;;  %v562_v13 = vrot.slane %v549_v0, 4  ;;  %v720_v14 = vrot.slane %v707_v1, 4 }
 0x21a   : > { %v550_v17 = vrot.slane %v545_v3, 4  ;;  %v708_v18 = vrot.slane %v703_v4, 4 }
 0x222   : > { %v1308_v2 = vpop.permute.xlu1 %1307 }
 0x223   : > { %v1310_v5 = vunpack.i.h.bf16 %v1308_v2  ;;  %v1309_v6 = vunpack.i.l.bf16 %v1308_v2 }
 0x225   : > { %v684_v9 = vrot.slane %v1310_v5, 4  ;;  %v687_v10 = vsel %vm526_vm5, %v1310_v5, %v686_v63  ;;  %v525_v11 = vrot.slane %v1309_v6, 4  ;;  %v529_v12 = vsel %vm526_vm5, %v1309_v6, %v528_v62 }
 0x226   : > { %v695_v15 = vperm.slane %v687_v10, %v1632_v55  ;;  %v537_v16 = vperm.slane %v529_v12, %v1632_v55 }
 0x227   : > { %v685_v19 = vsel %vm526_vm5, %v684_v9, %v670_v37  ;;  %v527_v20 = vsel %vm526_vm5, %v525_v11, %v511_v36  ;;  %v1651_v21 = vpop.permute.xlu0 %832 }
 0x228   : > { %v691_v22 = vperm.slane %v685_v19, %v1632_v55  ;;  %v721_v23 = vsel %vm526_vm5, %v720_v14, %v695_v15  ;;  %v722_v24 = vrot.slane %v695_v15, 4  ;;  %v533_v25 = vperm.slane %v527_v20, %v1632_v55 }
 0x229   : > { %v727_v26 = vperm.slane %v721_v23, %v1642_v7  ;;  %v563_v27 = vsel %vm526_vm5, %v562_v13, %v537_v16  ;;  %v564_v28 = vrot.slane %v537_v16, 4  ;;  %v855_v29 = vrot.slane %v1651_v21, 4 }
 0x22a   : > { %v709_v30 = vsel %vm526_vm5, %v708_v18, %v691_v22  ;;  %v710_v31 = vrot.slane %v691_v22, 4  ;;  %v723_v32 = vsel %vm526_vm5, %v707_v1, %v722_v24  ;;  %v551_v33 = vsel %vm526_vm5, %v550_v17, %v533_v25  ;;  %v836_v14 = vpop.permute.xlu1 %835 }
 0x22b   : > { %v715_v34 = vperm.slane %v709_v30, %v1642_v7  ;;  %v731_v35 = vperm.slane %v723_v32, %v1642_v7  ;;  %v736_v36 = vrot.slane %v727_v26, 4  ;;  %v552_v37 = vrot.slane %v533_v25, 4 }
 0x22c   : > { %v711_v38 = vsel %vm526_vm5, %v703_v4, %v710_v31  ;;  %v557_v40 = vperm.slane %v551_v33, %v1642_v7  ;;  %v565_v41 = vsel %vm526_vm5, %v549_v0, %v564_v28  ;;  %v569_v42 = vperm.slane %v563_v27, %v1642_v7 }
 0x22d   : > { %v719_v43 = vperm.slane %v711_v38, %v1642_v7  ;;  %v732_v44 = vrot.slane %v715_v34, 4  ;;  %v737_v45 = vsel %vm526_vm5, 0.0, %v736_v36  ;;  %v738_v46 = vrot.slane %v731_v35, 4 }
 0x22e   : > { %v553_v47 = vsel %vm526_vm5, %v545_v3, %v552_v37  ;;  %v573_v48 = vperm.slane %v565_v41, %v1642_v7  ;;  %v574_v49 = vrot.slane %v557_v40, 4  ;;  %v578_v50 = vrot.slane %v569_v42, 4 }
 0x22f   : > { %v733_v51 = vsel %vm526_vm5, 0.0, %v732_v44  ;;  %v734_v52 = vrot.slane %v719_v43, 4  ;;  %v739_v53 = vsel %vm526_vm5, 0.0, %v738_v46  ;;  %v751_v54 = vsel %vm526_vm5, %v738_v46, %v727_v26 }
 0x230   : > { %v755_v56 = vperm.slane %v751_v54, %v1632_v55  ;;  %v756_v57 = vrot.slane %v739_v53, 4  ;;  %v561_v58 = vperm.slane %v553_v47, %v1642_v7  ;;  %v575_v59 = vsel %vm526_vm5, 0.0, %v574_v49 }
 0x231   : > { %v735_v60 = vsel %vm526_vm5, 0.0, %v734_v52  ;;  %v740_v61 = vsel %vm526_vm5, %v734_v52, %v715_v34  ;;  %v579_v62 = vsel %vm526_vm5, 0.0, %v578_v50  ;;  %v580_v63 = vrot.slane %v573_v48, 4 }
 0x232   : > { %v744_v0 = vperm.slane %v740_v61, %v1632_v55  ;;  %v745_v1 = vrot.slane %v735_v60, 4  ;;  %v757_v2 = vsel %vm526_vm5, %v756_v57, %v737_v45  ;;  %v776_v3 = vrot.slane %v755_v56, 4 }
 0x233   : > { %v761_v4 = vperm.slane %v757_v2, %v1632_v55  ;;  %v576_v5 = vrot.slane %v561_v58, 4  ;;  %v581_v6 = vsel %vm526_vm5, 0.0, %v580_v63  ;;  %v593_v9 = vsel %vm526_vm5, %v580_v63, %v569_v42 }
 0x234   : > { %v746_v10 = vsel %vm526_vm5, %v745_v1, %v733_v51  ;;  %v764_v11 = vrot.slane %v744_v0, 4  ;;  %v597_v12 = vperm.slane %v593_v9, %v1632_v55  ;;  %v598_v13 = vrot.slane %v581_v6, 4 }
 0x235   : > { %v750_v15 = vperm.slane %v746_v10, %v1632_v55  ;;  %v774_v16 = vrot.slane %v761_v4, 4  ;;  %v777_v17 = vsel %vm526_vm5, %v761_v4, %v776_v3  ;;  %v577_v18 = vsel %vm526_vm5, 0.0, %v576_v5 }
 0x236   : > { %v785_v19 = vperm.slane %v777_v17, %v1642_v7  ;;  %v582_v20 = vsel %vm526_vm5, %v576_v5, %v557_v40  ;;  %v587_v22 = vrot.slane %v577_v18, 4  ;;  %v599_v23 = vsel %vm526_vm5, %v598_v13, %v579_v62 }
 0x237   : > { %v762_v24 = vrot.slane %v750_v15, 4  ;;  %v765_v25 = vsel %vm526_vm5, %v750_v15, %v764_v11  ;;  %v775_v26 = vsel %vm526_vm5, %v774_v16, %v755_v56  ;;  %v586_v27 = vperm.slane %v582_v20, %v1632_v55 }
 0x238   : > { %v773_v28 = vperm.slane %v765_v25, %v1642_v7  ;;  %v781_v30 = vperm.slane %v775_v26, %v1642_v7  ;;  %v790_v31 = vrot.slane %v785_v19, 4  ;;  %v588_v32 = vsel %vm526_vm5, %v587_v22, %v575_v59  ;;  %v839_v59 = vpop.permute.xlu1 %838 }
 0x239   : > { %v763_v33 = vsel %vm526_vm5, %v762_v24, %v744_v0  ;;  %v592_v34 = vperm.slane %v588_v32, %v1632_v55  ;;  %v603_v35 = vperm.slane %v599_v23, %v1632_v55  ;;  %v606_v36 = vrot.slane %v586_v27, 4 }
 0x23a   : > { %v769_v37 = vperm.slane %v763_v33, %v1642_v7  ;;  %v786_v38 = vrot.slane %v781_v30, 4  ;;  %v791_v40 = vsel %vm526_vm5, %v790_v31, %v773_v28  ;;  %v792_v41 = vrot.slane %v773_v28, 4 }
 0x23b   : > { %v796_v42 = vpack.c.bf16 %v791_v40, %v791_v40  ;;  %v604_v43 = vrot.slane %v592_v34, 4  ;;  %v607_v44 = vsel %vm526_vm5, %v592_v34, %v606_v36  ;;  %v616_v45 = vrot.slane %v603_v35, 4 }
 0x23c   : > { %v787_v46 = vsel %vm526_vm5, %v786_v38, %v769_v37  ;;  %v788_v47 = vrot.slane %v769_v37, 4  ;;  %v793_v48 = vsel %vm526_vm5, %v785_v19, %v792_v41  ;;  %v615_v49 = vperm.slane %v607_v44, %v1642_v7 }
 0x23d   : > { %v794_v50 = vpack.c.bf16 %v787_v46, %v787_v46  ;;  %v797_v51 = vpack.c.bf16 %v793_v48, %v793_v48  ;;  %800 = vst.msk [vmem:[%s1710_s9 + $0x8] sm:$0xf] %vm640_vm6, %v796_v42  ;;  %v605_v52 = vsel %vm526_vm5, %v604_v43, %v586_v27  ;;  %v617_v53 = vsel %vm526_vm5, %v616_v45, %v597_v12 }
 0x23e   : > { %v789_v54 = vsel %vm526_vm5, %v781_v30, %v788_v47  ;;  %v611_v56 = vperm.slane %v605_v52, %v1642_v7  ;;  %v618_v57 = vrot.slane %v597_v12, 4  ;;  %v623_v58 = vperm.slane %v617_v53, %v1642_v7 }
 0x23f   : > { %v795_v60 = vpack.c.bf16 %v789_v54, %v789_v54  ;;  %798 = vst.msk [vmem:[%s1710_s9] sm:$0xf] %vm640_vm6, %v794_v50  ;;  %v634_v61 = vrot.slane %v615_v49, 4  ;;  %v841_v62 = vrot.slane %v836_v14, 4  ;;  %v844_v63 = vsel %vm526_vm5, %v836_v14, %v843_v8 }
 0x240   : > { %801 = vst.msk [vmem:[%s1710_s9 + $0xc] sm:$0xf] %vm640_vm6, %v797_v51  ;;  %v619_v0 = vsel %vm526_vm5, %v603_v35, %v618_v57  ;;  %v628_v1 = vrot.slane %v623_v58, 4  ;;  %v630_v2 = vrot.slane %v611_v56, 4  ;;  %v852_v3 = vperm.slane %v844_v63, %v1632_v55 }
 0x241   : > { %799 = vst.msk [vmem:[%s1710_s9 + $0x4] sm:$0xf] %vm640_vm6, %v795_v60  ;;  %v627_v4 = vperm.slane %v619_v0, %v1642_v7  ;;  %v842_v5 = vsel %vm526_vm5, %v841_v62, %v1627_v39  ;;  %v853_v6 = vrot.slane %v839_v59, 4  ;;  %v856_v8 = vsel %vm526_vm5, %v839_v59, %v855_v29 }
 0x242   : > { %v629_v9 = vsel %vm526_vm5, %v628_v1, %v611_v56  ;;  %v631_v10 = vsel %vm526_vm5, %v623_v58, %v630_v2  ;;  %v848_v11 = vperm.slane %v842_v5, %v1632_v55  ;;  %v879_v16 = vrot.slane %v852_v3, 4 }
 0x243   : > { %v632_v12 = vrot.slane %v627_v4, 4  ;;  %v635_v13 = vsel %vm526_vm5, %v627_v4, %v634_v61  ;;  %v636_v14 = vpack.c.bf16 %v629_v9, %v629_v9  ;;  %v637_v15 = vpack.c.bf16 %v631_v10, %v631_v10 }
 0x244   : > { %v639_v39 = vpack.c.bf16 %v635_v13, %v635_v13  ;;  %v854_v29 = vsel %vm526_vm5, %v853_v6, %v1651_v21  ;;  %v864_v17 = vperm.slane %v856_v8, %v1632_v55  ;;  %v867_v19 = vrot.slane %v848_v11, 4 }
 0x245   : > { %v633_v18 = vsel %vm526_vm5, %v632_v12, %v615_v49  ;;  %641 = vst.msk [vmem:[%s423_s14] sm:$0xf] %vm640_vm6, %v636_v14  ;;  %v860_v20 = vperm.slane %v854_v29, %v1632_v55 }
 0x246   : > { %v638_v22 = vpack.c.bf16 %v633_v18, %v633_v18  ;;  %642 = vst.msk [vmem:[%s423_s14 + $0x4] sm:$0xf] %vm640_vm6, %v637_v15  ;;  %v877_v23 = vrot.slane %v864_v17, 4  ;;  %v880_v24 = vsel %vm526_vm5, %v864_v17, %v879_v16 }
 0x247   : > { %644 = vst.msk [vmem:[%s423_s14 + $0xc] sm:$0xf] %vm640_vm6, %v639_v39  ;;  %v865_v25 = vrot.slane %v860_v20, 4  ;;  %v868_v21 = vsel %vm526_vm5, %v860_v20, %v867_v19  ;;  %v888_v26 = vperm.slane %v880_v24, %v1642_v7 }
 0x248   : > { %643 = vst.msk [vmem:[%s423_s14 + $0x8] sm:$0xf] %vm640_vm6, %v638_v22  ;;  %v876_v27 = vperm.slane %v868_v21, %v1642_v7  ;;  %v878_v28 = vsel %vm526_vm5, %v877_v23, %v852_v3 }
 0x249   : > { %v866_v30 = vsel %vm526_vm5, %v865_v25, %v848_v11  ;;  %v884_v31 = vperm.slane %v878_v28, %v1642_v7  ;;  %v895_v32 = vrot.slane %v888_v26, 4 }
 0x24a   : > { %v872_v33 = vperm.slane %v866_v30, %v1642_v7  ;;  %v891_v34 = vrot.slane %v876_v27, 4 }
 0x24b   : > { %v893_v35 = vrot.slane %v884_v31, 4  ;;  %v896_v36 = vsel %vm526_vm5, 0.0, %v895_v32  ;;  %v908_v37 = vsel %vm526_vm5, %v895_v32, %v884_v31 }
 0x24c   : > { %v889_v38 = vrot.slane %v872_v33, 4  ;;  %v892_v40 = vsel %vm526_vm5, 0.0, %v891_v34  ;;  %v897_v41 = vsel %vm526_vm5, %v891_v34, %v872_v33  ;;  %v912_v42 = vperm.slane %v908_v37, %v1632_v55 }
 0x24d   : > { %v894_v43 = vsel %vm526_vm5, 0.0, %v893_v35  ;;  %v901_v44 = vperm.slane %v897_v41, %v1632_v55  ;;  %v902_v45 = vrot.slane %v892_v40, 4  ;;  %v913_v46 = vrot.slane %v896_v36, 4 }
 0x24e   : > { %v890_v47 = vsel %vm526_vm5, 0.0, %v889_v38  ;;  %v933_v48 = vrot.slane %v912_v42, 4 }
 0x24f   : > { %v903_v49 = vsel %vm526_vm5, %v902_v45, %v890_v47  ;;  %v914_v50 = vsel %vm526_vm5, %v913_v46, %v894_v43  ;;  %v921_v51 = vrot.slane %v901_v44, 4 }
 0x250   : > { %v907_v52 = vperm.slane %v903_v49, %v1632_v55  ;;  %v918_v53 = vperm.slane %v914_v50, %v1632_v55 }
 0x252   : > { %v919_v54 = vrot.slane %v907_v52, 4  ;;  %v922_v56 = vsel %vm526_vm5, %v907_v52, %v921_v51  ;;  %v931_v57 = vrot.slane %v918_v53, 4  ;;  %v934_v58 = vsel %vm526_vm5, %v918_v53, %v933_v48 }
 0x253   : > { %v930_v59 = vperm.slane %v922_v56, %v1642_v7  ;;  %v942_v60 = vperm.slane %v934_v58, %v1642_v7 }
 0x254   : > { %v920_v61 = vsel %vm526_vm5, %v919_v54, %v901_v44  ;;  %v932_v62 = vsel %vm526_vm5, %v931_v57, %v912_v42 }
 0x255   : > { %v926_v63 = vperm.slane %v920_v61, %v1642_v7  ;;  %v938_v0 = vperm.slane %v932_v62, %v1642_v7  ;;  %v947_v1 = vrot.slane %v942_v60, 4  ;;  %v949_v55 = vrot.slane %v930_v59, 4 }
 0x257   : > { %v943_v2 = vrot.slane %v938_v0, 4  ;;  %v945_v3 = vrot.slane %v926_v63, 4  ;;  %v948_v4 = vsel %vm526_vm5, %v947_v1, %v930_v59  ;;  %v950_v5 = vsel %vm526_vm5, %v942_v60, %v949_v55 }
 0x258   : > { %v953_v6 = vpack.c.bf16 %v948_v4, %v948_v4  ;;  %v954_v8 = vpack.c.bf16 %v950_v5, %v950_v5 }
 0x259   : > { %v944_v9 = vsel %vm526_vm5, %v943_v2, %v926_v63  ;;  %v946_v10 = vsel %vm526_vm5, %v938_v0, %v945_v3 }
 0x25a   : > { %v951_v11 = vpack.c.bf16 %v944_v9, %v944_v9  ;;  %v952_v7 = vpack.c.bf16 %v946_v10, %v946_v10  ;;  %957 = vst.msk [vmem:[%s439_s21 + $0x8] sm:$0xf] %vm640_vm6, %v953_v6 }
 0x25b   : > { %958 = vst.msk [vmem:[%s439_s21 + $0xc] sm:$0xf] %vm640_vm6, %v954_v8 }
 0x25c   : > { %955 = vst.msk [vmem:[%s439_s21] sm:$0xf] %vm640_vm6, %v951_v11 }
 0x25d   : > { %956 = vst.msk [vmem:[%s439_s21 + $0x4] sm:$0xf] %vm640_vm6, %v952_v7 }
 0x25e PF: > { %s22_s29 = sadd.s32 1, %s1481_s29   ;;  %s1820_s27 = smov %s1477_s28 }
 0x25f   : > { %p19_p8 = scmp.ge.s32.totalorder %s22_s29, 4   ;;  %s1821_s28 = smov %s1823_s17 }
 0x261   :  { %21 = sbr.rel (!%p19_p8) target bundleno = 4 (0x4), region = 115 }
 0x266   :  { %1030 = vsyncpa [#allocation3], 1 }
 0x267   :  { %1032 = vsyncpa [#allocation3 + $0x1], 1 }
 0x268   :  { %1033 = vsyncpa [#allocation5], 1 }
 0x269   :  { %1034 = vsyncpa [#allocation8], 1 }

// kernel: transformer_forward.4
= control target key start
LH: loop header
LB: loop body
LE: loop exit
PB: predicated region body
PF: predicated region fallthrough
CT: control target
= control target key end

     0   :  { %s1895_s0 = inlined_call_operand.hbm [shape: f32[2,8,32], index: 0, kind: input, shape index: {}]   ;;  %s1896_s1 = inlined_call_operand.vmem [shape: f32[1,32], index: 1, kind: input, shape index: {}]   ;;  %s1897_s2 = inlined_call_operand.vmem [shape: f32[1,32], index: 2, kind: input, shape index: {}]   ;;  %s1898_s3 = inlined_call_operand.hbm [shape: bf16[32,32], index: 3, kind: input, shape index: {}]   ;;  %s1899_s4 = inlined_call_operand.hbm [shape: bf16[32,32], index: 4, kind: input, shape index: {}]   ;;  %s1900_s5 = inlined_call_operand.hbm [shape: bf16[32,32], index: 5, kind: input, shape index: {}]   ;;  %s1901_s6 = inlined_call_operand.vmem [shape: bf16[2,4,8,8], index: 6, kind: output, shape index: {0}]   ;;  %s1902_s7 = inlined_call_operand.vmem [shape: bf16[2,4,8,8], index: 7, kind: output, shape index: {1}]   ;;  %s1903_s8 = inlined_call_operand.vmem [shape: bf16[2,4,8,8], index: 8, kind: output, shape index: {2}]  }
   0x1   :  { %1904 = sst [smem:[#allocation12_spill]] %s1898_s3 }
   0x2   :  { %1905 = sst [smem:[#allocation13_spill]] %s1899_s4 }
   0x3   :  { %1906 = sst [smem:[#allocation14_spill]] %s1900_s5 }
   0x4   :  { %14 = vsyncpa [#allocation3], 0 }
   0x5   :  { %16 = vsyncpa [#allocation3 + $0x1], 0 }
   0x6   :  { %17 = vsyncpa [#allocation5], 0 }
   0x7   :  { %18 = vsyncpa [#allocation8], 0  ;;  %s1580_s27 = smov 0   ;;  %s1582_s28 = smov 0  }
   0x8   :  { %s1584_s29 = smov 0   ;;  %s1586_s30 = smov 0  }
   0x9   :  { %s1588_s9 = smov 0   ;;  %s1590_s10 = smov 0  }
   0xa LB: > { %s1171_s11 = sadd.s32 4294967295, %s1522_s10   ;;  %p1173_p0 = scmp.ge.s32.totalorder %s1522_s10, 1  ;;  %s1522_s10 = sphi %s1590_s10, %s24_s10   ;;  %s1518_s9 = sphi %s1588_s9, %s1919_s9   ;;  %s1514_s30 = sphi %s1586_s30, %s1918_s30   ;;  %s1510_s29 = sphi %s1584_s29, %s1917_s29   ;;  %s1506_s28 = sphi %s1582_s28, %s1916_s28   ;;  %s1502_s27 = sphi %s1580_s27, %s1915_s27  }
   0xb   : > { %p1612_p1 = scmp.eq.s32.totalorder %s1171_s11, 0  ;;  %p258_p2 = scmp.lt.s32.totalorder %s1522_s10, 3 }
   0xc   : > { %s1908_s3 = sld [smem:[#allocation12_spill]]  ;;  %s1524_s17 = smov [#allocation4]  }
   0xd   : > { %p1620_p3 = pnand %p1173_p0, %p258_p2  ;;  %s277_s18 = sshll.u32 %s1524_s17, 4  ;;  %s278_s18 = int_to_ptr.vmem [resolvable:$true] %s277_s18 }
   0xe   : > { %s1911_s4 = sld [smem:[#allocation13_spill]]  ;;  %s1525_s23 = smov 64  }
   0xf   : > { %p1243_p4 = pneg %p1620_p3  ;;  %s1526_s24 = smov 4  }
  0x10   : > { %s1527_s25 = smov [#allocation6]   ;;  %s1912_s5 = sld [smem:[#allocation14_spill]] }
  0x11   : > { %p1628_p5 = pnand %p1243_p4, %p1612_p1  ;;  %s291_s26 = sshll.u32 %s1527_s25, 4  ;;  %s292_s26 = int_to_ptr.vmem [resolvable:$true] %s291_s26 }
  0x12   : > { %s275_s15 = sshll.u32 %s1908_s3, 4  ;;  %s1528_s17 = smov [#allocation7]   ;;  %s276_s15 = int_to_ptr.hbm [resolvable:$true] %s275_s15 }
  0x13   : > { %1246 = dma.hbm_to_vmem [thread:$0]  (!%p1628_p5), %s276_s15, 256, %s278_s18, [#allocation5], %s1525_s23, %s1525_s23, %s1526_s24  }
  0x14   : > { %s289_s22 = sshll.u32 %s1911_s4, 4  ;;  %s305_s20 = sshll.u32 %s1528_s17, 4  ;;  %s290_s22 = int_to_ptr.hbm [resolvable:$true] %s289_s22  ;;  %s306_s20 = int_to_ptr.vmem [resolvable:$true] %s305_s20 }
  0x15   : > { %1249 = dma.hbm_to_vmem [thread:$0]  (!%p1628_p5), %s290_s22, 256, %s292_s26, [#allocation5], %s1525_s23, %s1525_s23, %s1526_s24  }
  0x16   : > { %s303_s14 = sshll.u32 %s1912_s5, 4  ;;  %s36_s15 = sadd.s32 1, %s1518_s9  ;;  %s304_s14 = int_to_ptr.hbm [resolvable:$true] %s303_s14 }
  0x17   : > { %1252 = dma.hbm_to_vmem [thread:$0]  (!%p1628_p5), %s304_s14, 256, %s306_s20, [#allocation8], %s1525_s23, %s1525_s23, %s1526_s24  }
  0x18   : > { %p38_p6 = scmp.ge.s32.totalorder %s36_s15, 2  ;;  %p52_p7 = scmp.ne.s32.totalorder %s1510_s29, %s1506_s28 }
  0x19   : > { %p53_p8 = scmp.eq.s32.totalorder %s1522_s10, 0  ;;  %s45_s18 = sadd.s32 1, %s1510_s29 }
  0x1a   : > { %s1921_s15 = smov (%p38_p6, %s36_s15), 0  ;;  %p58_p9 = scmp.ne.s32.totalorder %s1506_s28, %s1502_s27 }
  0x1b   : > { %s40_s21 = ssub.s32 %s1518_s9, %s1921_s15  ;;  %p1655_p10 = por %p53_p8, %p52_p7 }
  0x1c   : > { %p43_p11 = scmp.eq.s32.totalorder %s40_s21, 0  ;;  %p1661_p12 = por %p1612_p1, %p58_p9 }
  0x1d   : > { %s319_s23 = sand.u32 1, %s1510_s29   ;;  %s1179_s24 = sshll.u32 %s1518_s9, 3 }
  0x1e   : > { %s1668_s25 = scalar_select %p43_p11, %s1510_s29, %s45_s18  }
  0x1f   : > { %p1260_p13 = scmp.lt.s32.totalorder %s1522_s10, 2  ;;  %s1178_s26 = sshll.u32 %s319_s23, 3 }
  0x20   : > { %s328_s13 = scalar_lea.hbm %s1895_s0, %s1179_s24  ;;  %s323_s17 = scalar_lea.vmem [#allocation2], %s1178_s26 }
  0x21   : > { %s330_s14 = sshll.u32 %s328_s13, 4  ;;  %s332_s20 = sshll.u32 %s323_s17, 4  ;;  %s331_s14 = int_to_ptr.hbm [resolvable:$true] %s330_s14  ;;  %s333_s20 = int_to_ptr.vmem [resolvable:$true] %s332_s20 }
  0x22   : > { %p1254_p0 = pnand %p1260_p13, %p1655_p10  ;;  %s320_s21 = scalar_lea.sflag [#allocation3], %s319_s23 }
  0x23   : > { %341 = sbr.rel (%p1620_p3) target bundleno = 618 (0x26a), region = 44  ;;  %s343_s18 = sand.u32 (!%p1620_p3), 1, %s1506_s28  }
  0x24   : > { %1256 = dma.hbm_to_vmem [thread:$0]  (!%p1254_p0), %s331_s14, 128, %s333_s20, %s320_s21  }
  0x25   : > { %s1181_s3 = sshll.u32 (!%p1620_p3), %s343_s18, 3  ;;  %s344_s4 = scalar_lea.sflag (!%p1620_p3), [#allocation3], %s343_s18 }
  0x26   : > { %s347_s5 = scalar_lea.vmem (!%p1620_p3), [#allocation2], %s1181_s3 }
  0x28   : > { %1489 = dma.done.wait (%p1661_p12), %s344_s4, 128  }
  0x29   : > { %1491 = vsyncadd (%p1661_p12), %s344_s4, 4294967168 }
  0x2a   : > { %1493 = dma.done.wait (%p1612_p1), [#allocation5], 512  }
  0x2b   : > { %1495 = vsyncadd (%p1612_p1), [#allocation5], 4294966784 }
  0x2c   : > { %1497 = dma.done.wait (%p1612_p1), [#allocation8], 256  }
  0x2d   : > { %1499 = vsyncadd (%p1612_p1), [#allocation8], 4294967040  ;;  %vm443_vm0 = vcmask 261120   ;;  %v440_v0 = vld [vmem:[%s347_s5] sm:$0xff]  ;;  %v1529_v2 = vmov 32.0   ;;  %v1224_v14 = vld [vmem:[#allocation4 + $0x8] sm:$0xff] }
  0x2e   : > { %v444_v1 = vsel %vm443_vm0, %v440_v0, 0.0  ;;  %1340 = vrcp.f32 %v1529_v2  ;;  %v1226_v15 = vld [vmem:[#allocation6 + $0x8] sm:$0xff]  ;;  %v1228_v16 = vld [vmem:[#allocation7 + $0x8] sm:$0xff]  ;;  %507 = vmatpush.bf16.msra.mxu0 %v1224_v14  ;;  %v1223_v17 = vld [vmem:[#allocation4] sm:$0xff]  ;;  %s1530_s16 = smov 120   ;;  %s1531_s22 = smov 112  }
  0x2f   : > { %445 = vadd.xlane.f32.xlu0 %v444_v1  ;;  %666 = vmatpush.bf16.msra.mxu1 %v1226_v15  ;;  %v1225_v18 = vld [vmem:[#allocation6] sm:$0xff]  ;;  %v1227_v19 = vld [vmem:[#allocation7] sm:$0xff]  ;;  %s1532_s19 = smov 104   ;;  %v1533_v49 = vmov 1983009808   ;;  %vm525_vm5 = vcmask 1047556  }
  0x30   : > { %823 = vmatpush.bf16.msra.mxu2 %v1228_v16  ;;  %v1338_v29 = vld [vmem:[%s1896_s1] ss:$0 sm:$0xff]  ;;  %v530_v50 = vunpack.c.l.s4 %v1533_v49  ;;  %v1534_v60 = vmov 1934713408   ;;  %p415_p1 = scmp.lt.s32.totalorder %s1514_s30, 1  ;;  %vm639_vm6 = vcmask 60416  }
  0x31   : > { %v1339_v32 = vld [vmem:[%s1897_s2] ss:$0 sm:$0xff]  ;;  %v554_v61 = vunpack.c.l.s4 %v1534_v60 }
  0x32   : > { %508 = vmatpush.bf16.msra.mxu0 %v1223_v17  ;;  %v1707_v55 = vunpack.c.0.s8 %v530_v50  ;;  %s1923_s30 = smov (!%p415_p1, %s1514_s30), 1 }
  0x33   : > { %667 = vmatpush.bf16.msra.mxu1 %v1225_v18  ;;  %s1773_s23 = sshll.u32 %s1923_s30, 4 }
  0x34   : > { %v1341_v3 = vpop.eup %1340  ;;  %824 = vmatpush.bf16.msra.mxu2 %v1227_v19  ;;  %s1788_s26 = scalar_lea.vmem %s1902_s7, %s1773_s23  ;;  %s422_s13 = scalar_lea.vmem %s1901_s6, %s1773_s23 }
  0x35   : > { %v448_v4 = vmul.f32 32.0, %v1341_v3  ;;  %vm452_vm1 = vweird.f32 %v1341_v3  ;;  %s438_s20 = scalar_lea.vmem %s1903_s8, %s1773_s23 }
  0x37   : > { %v449_v5 = vsub.f32 1.0, %v448_v4 }
  0x39   : > { %v450_v6 = vmul.f32 %v1341_v3, %v449_v5 }
  0x3b   : > { %v451_v7 = vadd.f32 %v1341_v3, %v450_v6 }
  0x3d   : > { %v453_v8 = vsel %vm452_vm1, %v1341_v3, %v451_v7  ;;  %v1717_v7 = vunpack.c.0.s8 %v554_v61 }
  0xa2   : > { %v446_v9 = vpop.xlane.xlu0 %445 }
  0xa3   : > { %v454_v10 = vmul.f32 %v453_v8, %v446_v9 }
  0xa5   : > { %v455_v11 = vsub.f32 %v440_v0, %v454_v10 }
  0xa7   : > { %v456_v12 = vmul.f32 %v455_v11, %v455_v11 }
  0xa9   : > { %v457_v13 = vsel %vm443_vm0, %v456_v12, 0.0 }
  0xaa   : > { %458 = vadd.xlane.f32.xlu0 %v457_v13 }
 0x11d   : > { %v459_v20 = vpop.xlane.xlu0 %458 }
 0x11e   : > { %v460_v21 = vmul.f32 %v459_v20, %v453_v8 }
 0x120   : > { %v461_v22 = vadd.f32 1e-05, %v460_v21 }
 0x122   : > { %1342 = vrsqrt.f32 %v461_v22  ;;  %vm468_vm3 = vweird.f32 %v461_v22 }
 0x128   : > { %v1343_v23 = vpop.eup %1342 }
 0x129   : > { %v463_v24 = vmul.f32 %v1343_v23, %v461_v22  ;;  %vm469_vm2 = vweird.f32 %v1343_v23 }
 0x12a   : > { %vm470_vm4 = vmor %vm468_vm3, %vm469_vm2 }
 0x12b   : > { %v464_v25 = vmul.f32 %v1343_v23, %v463_v24 }
 0x12d   : > { %v465_v26 = vmul.f32 0.5, %v464_v25 }
 0x12f   : > { %v466_v27 = vsub.f32 1.5, %v465_v26 }
 0x131   : > { %v467_v28 = vmul.f32 %v1343_v23, %v466_v27 }
 0x133   : > { %v471_v30 = vsel %vm470_vm4, %v1343_v23, %v467_v28 }
 0x134   : > { %v472_v31 = vmul.f32 %v471_v30, %v455_v11 }
 0x136   : > { %v476_v33 = vmul.f32 %v1338_v29, %v472_v31 }
 0x138   : > { %v480_v34 = vadd.f32 %v1339_v32, %v476_v33 }
 0x13a   : > { %v481_v35 = vpack.c.bf16 %v480_v34, %v480_v34 }
 0x13c   : > { %1199 = vmatmul.msk.bf16.vlgmr.msra.gmra.mxu0 %vm443_vm0, %v481_v35  ;;  %1208 = vmatmul.msk.bf16.vlgmr.msra.gmra.mxu1 %vm443_vm0, %v481_v35 }
 0x13d   : > { %1217 = vmatmul.msk.bf16.vlgmr.msra.gmra.mxu2 %vm443_vm0, %v481_v35 }
 0x1b9   : > { %v510_v36 = vpop.f32.mrf.mxu0  ;;  %v669_v37 = vpop.f32.mrf.mxu1 }
 0x1ba   : > { %v1328_v38 = vpack.i.bf16 %v669_v37, %v510_v36  ;;  %v527_v62 = vrot.slane %v510_v36, 4  ;;  %v685_v63 = vrot.slane %v669_v37, 4 }
 0x1bc   : > { %1329 = vrot.lane.b32.xlu2 %v1328_v38, %s1530_s16  ;;  %1324 = vrot.lane.b32.xlu1 %v1328_v38, %s1531_s22 }
 0x1c0   : > { %v1702_v39 = vpop.f32.mrf.mxu2 }
 0x1c1   : > { %831 = vrot.lane.b32.xlu0 %v1702_v39, %s1530_s16  ;;  %v512_v40 = vpop.f32.mrf.mxu0  ;;  %v671_v41 = vpop.f32.mrf.mxu1  ;;  %v842_v8 = vrot.slane %v1702_v39, 4 }
 0x1c4   : > { %1334 = vrot.lane.b32.xlu2 %v1328_v38, %s1532_s19  ;;  %834 = vrot.lane.b32.xlu1 %v1702_v39, %s1531_s22 }
 0x1c8   : > { %v828_v42 = vpop.f32.mrf.mxu2 }
 0x1cc   : > { %837 = vrot.lane.b32.xlu1 %v1702_v39, %s1532_s19 }
 0x216   : > { %v1330_v43 = vpop.permute.xlu2 %1329 }
 0x217   : > { %v1332_v47 = vunpack.i.h.bf16 %v1330_v43  ;;  %v1331_v48 = vunpack.i.l.bf16 %v1330_v43 }
 0x219   : > { %v697_v53 = vrot.slane %v1332_v47, 4  ;;  %v539_v54 = vrot.slane %v1331_v48, 4 }
 0x21e   : > { %v1335_v44 = vpop.permute.xlu2 %1334 }
 0x21f   : > { %v1337_v45 = vunpack.i.h.bf16 %v1335_v44  ;;  %v1336_v46 = vunpack.i.l.bf16 %v1335_v44 }
 0x221   : > { %v695_v51 = vrot.slane %v1337_v45, 4  ;;  %v537_v52 = vrot.slane %v1336_v46, 4  ;;  %v540_v56 = vsel %vm525_vm5, %v1336_v46, %v539_v54  ;;  %v698_v57 = vsel %vm525_vm5, %v1337_v45, %v697_v53 }
 0x222   : > { %v548_v0 = vperm.slane %v540_v56, %v1707_v55  ;;  %v706_v1 = vperm.slane %v698_v57, %v1707_v55 }
 0x223   : > { %v538_v58 = vsel %vm525_vm5, %v537_v52, %v1331_v48  ;;  %v696_v59 = vsel %vm525_vm5, %v695_v51, %v1332_v47 }
 0x224   : > { %v544_v3 = vperm.slane %v538_v58, %v1707_v55  ;;  %v702_v4 = vperm.slane %v696_v59, %v1707_v55  ;;  %v561_v13 = vrot.slane %v548_v0, 4  ;;  %v719_v14 = vrot.slane %v706_v1, 4 }
 0x226   : > { %v549_v17 = vrot.slane %v544_v3, 4  ;;  %v707_v18 = vrot.slane %v702_v4, 4 }
 0x22e   : > { %v1325_v2 = vpop.permute.xlu1 %1324 }
 0x22f   : > { %v1327_v5 = vunpack.i.h.bf16 %v1325_v2  ;;  %v1326_v6 = vunpack.i.l.bf16 %v1325_v2 }
 0x231   : > { %v683_v9 = vrot.slane %v1327_v5, 4  ;;  %v686_v10 = vsel %vm525_vm5, %v1327_v5, %v685_v63  ;;  %v524_v11 = vrot.slane %v1326_v6, 4  ;;  %v528_v12 = vsel %vm525_vm5, %v1326_v6, %v527_v62 }
 0x232   : > { %v694_v15 = vperm.slane %v686_v10, %v1707_v55  ;;  %v536_v16 = vperm.slane %v528_v12, %v1707_v55 }
 0x233   : > { %v684_v19 = vsel %vm525_vm5, %v683_v9, %v669_v37  ;;  %v526_v20 = vsel %vm525_vm5, %v524_v11, %v510_v36  ;;  %v1726_v21 = vpop.permute.xlu0 %831 }
 0x234   : > { %v690_v22 = vperm.slane %v684_v19, %v1707_v55  ;;  %v720_v23 = vsel %vm525_vm5, %v719_v14, %v694_v15  ;;  %v721_v24 = vrot.slane %v694_v15, 4  ;;  %v532_v25 = vperm.slane %v526_v20, %v1707_v55 }
 0x235   : > { %v726_v26 = vperm.slane %v720_v23, %v1717_v7  ;;  %v562_v27 = vsel %vm525_vm5, %v561_v13, %v536_v16  ;;  %v563_v28 = vrot.slane %v536_v16, 4  ;;  %v854_v29 = vrot.slane %v1726_v21, 4 }
 0x236   : > { %v708_v30 = vsel %vm525_vm5, %v707_v18, %v690_v22  ;;  %v709_v31 = vrot.slane %v690_v22, 4  ;;  %v722_v32 = vsel %vm525_vm5, %v706_v1, %v721_v24  ;;  %v550_v33 = vsel %vm525_vm5, %v549_v17, %v532_v25  ;;  %v835_v14 = vpop.permute.xlu1 %834 }
 0x237   : > { %v714_v34 = vperm.slane %v708_v30, %v1717_v7  ;;  %v730_v35 = vperm.slane %v722_v32, %v1717_v7  ;;  %v735_v36 = vrot.slane %v726_v26, 4  ;;  %v551_v37 = vrot.slane %v532_v25, 4 }
 0x238   : > { %v710_v38 = vsel %vm525_vm5, %v702_v4, %v709_v31  ;;  %v556_v40 = vperm.slane %v550_v33, %v1717_v7  ;;  %v564_v41 = vsel %vm525_vm5, %v548_v0, %v563_v28  ;;  %v568_v42 = vperm.slane %v562_v27, %v1717_v7 }
 0x239   : > { %v718_v43 = vperm.slane %v710_v38, %v1717_v7  ;;  %v731_v44 = vrot.slane %v714_v34, 4  ;;  %v736_v45 = vsel %vm525_vm5, 0.0, %v735_v36  ;;  %v737_v46 = vrot.slane %v730_v35, 4 }
 0x23a   : > { %v552_v47 = vsel %vm525_vm5, %v544_v3, %v551_v37  ;;  %v572_v48 = vperm.slane %v564_v41, %v1717_v7  ;;  %v573_v49 = vrot.slane %v556_v40, 4  ;;  %v577_v50 = vrot.slane %v568_v42, 4 }
 0x23b   : > { %v732_v51 = vsel %vm525_vm5, 0.0, %v731_v44  ;;  %v733_v52 = vrot.slane %v718_v43, 4  ;;  %v738_v53 = vsel %vm525_vm5, 0.0, %v737_v46  ;;  %v750_v54 = vsel %vm525_vm5, %v737_v46, %v726_v26 }
 0x23c   : > { %v754_v56 = vperm.slane %v750_v54, %v1707_v55  ;;  %v755_v57 = vrot.slane %v738_v53, 4  ;;  %v560_v58 = vperm.slane %v552_v47, %v1717_v7  ;;  %v574_v59 = vsel %vm525_vm5, 0.0, %v573_v49 }
 0x23d   : > { %v734_v60 = vsel %vm525_vm5, 0.0, %v733_v52  ;;  %v739_v61 = vsel %vm525_vm5, %v733_v52, %v714_v34  ;;  %v578_v62 = vsel %vm525_vm5, 0.0, %v577_v50  ;;  %v579_v63 = vrot.slane %v572_v48, 4 }
 0x23e   : > { %v743_v0 = vperm.slane %v739_v61, %v1707_v55  ;;  %v744_v1 = vrot.slane %v734_v60, 4  ;;  %v756_v2 = vsel %vm525_vm5, %v755_v57, %v736_v45  ;;  %v775_v3 = vrot.slane %v754_v56, 4 }
 0x23f   : > { %v760_v4 = vperm.slane %v756_v2, %v1707_v55  ;;  %v575_v5 = vrot.slane %v560_v58, 4  ;;  %v580_v6 = vsel %vm525_vm5, 0.0, %v579_v63  ;;  %v592_v9 = vsel %vm525_vm5, %v579_v63, %v568_v42 }
 0x240   : > { %v745_v10 = vsel %vm525_vm5, %v744_v1, %v732_v51  ;;  %v763_v11 = vrot.slane %v743_v0, 4  ;;  %v596_v12 = vperm.slane %v592_v9, %v1707_v55  ;;  %v597_v13 = vrot.slane %v580_v6, 4 }
 0x241   : > { %v749_v15 = vperm.slane %v745_v10, %v1707_v55  ;;  %v773_v16 = vrot.slane %v760_v4, 4  ;;  %v776_v17 = vsel %vm525_vm5, %v760_v4, %v775_v3  ;;  %v576_v18 = vsel %vm525_vm5, 0.0, %v575_v5 }
 0x242   : > { %v784_v19 = vperm.slane %v776_v17, %v1717_v7  ;;  %v581_v20 = vsel %vm525_vm5, %v575_v5, %v556_v40  ;;  %v586_v22 = vrot.slane %v576_v18, 4  ;;  %v598_v23 = vsel %vm525_vm5, %v597_v13, %v578_v62 }
 0x243   : > { %v761_v24 = vrot.slane %v749_v15, 4  ;;  %v764_v25 = vsel %vm525_vm5, %v749_v15, %v763_v11  ;;  %v774_v26 = vsel %vm525_vm5, %v773_v16, %v754_v56  ;;  %v585_v27 = vperm.slane %v581_v20, %v1707_v55 }
 0x244   : > { %v772_v28 = vperm.slane %v764_v25, %v1717_v7  ;;  %v780_v30 = vperm.slane %v774_v26, %v1717_v7  ;;  %v789_v31 = vrot.slane %v784_v19, 4  ;;  %v587_v32 = vsel %vm525_vm5, %v586_v22, %v574_v59  ;;  %v838_v59 = vpop.permute.xlu1 %837 }
 0x245   : > { %v762_v33 = vsel %vm525_vm5, %v761_v24, %v743_v0  ;;  %v591_v34 = vperm.slane %v587_v32, %v1707_v55  ;;  %v602_v35 = vperm.slane %v598_v23, %v1707_v55  ;;  %v605_v36 = vrot.slane %v585_v27, 4 }
 0x246   : > { %v768_v37 = vperm.slane %v762_v33, %v1717_v7  ;;  %v785_v38 = vrot.slane %v780_v30, 4  ;;  %v790_v40 = vsel %vm525_vm5, %v789_v31, %v772_v28  ;;  %v791_v41 = vrot.slane %v772_v28, 4 }
 0x247   : > { %v795_v42 = vpack.c.bf16 %v790_v40, %v790_v40  ;;  %v603_v43 = vrot.slane %v591_v34, 4  ;;  %v606_v44 = vsel %vm525_vm5, %v591_v34, %v605_v36  ;;  %v615_v45 = vrot.slane %v602_v35, 4 }
 0x248   : > { %v786_v46 = vsel %vm525_vm5, %v785_v38, %v768_v37  ;;  %v787_v47 = vrot.slane %v768_v37, 4  ;;  %v792_v48 = vsel %vm525_vm5, %v784_v19, %v791_v41  ;;  %v614_v49 = vperm.slane %v606_v44, %v1717_v7 }
 0x249   : > { %v793_v50 = vpack.c.bf16 %v786_v46, %v786_v46  ;;  %v796_v51 = vpack.c.bf16 %v792_v48, %v792_v48  ;;  %799 = vst.msk [vmem:[%s1788_s26 + $0x8] sm:$0xf] %vm639_vm6, %v795_v42  ;;  %v604_v52 = vsel %vm525_vm5, %v603_v43, %v585_v27  ;;  %v616_v53 = vsel %vm525_vm5, %v615_v45, %v596_v12 }
 0x24a   : > { %v788_v54 = vsel %vm525_vm5, %v780_v30, %v787_v47  ;;  %v610_v56 = vperm.slane %v604_v52, %v1717_v7  ;;  %v617_v57 = vrot.slane %v596_v12, 4  ;;  %v622_v58 = vperm.slane %v616_v53, %v1717_v7 }
 0x24b   : > { %v794_v60 = vpack.c.bf16 %v788_v54, %v788_v54  ;;  %797 = vst.msk [vmem:[%s1788_s26] sm:$0xf] %vm639_vm6, %v793_v50  ;;  %v633_v61 = vrot.slane %v614_v49, 4  ;;  %v840_v62 = vrot.slane %v835_v14, 4  ;;  %v843_v63 = vsel %vm525_vm5, %v835_v14, %v842_v8 }
 0x24c   : > { %800 = vst.msk [vmem:[%s1788_s26 + $0xc] sm:$0xf] %vm639_vm6, %v796_v51  ;;  %v618_v0 = vsel %vm525_vm5, %v602_v35, %v617_v57  ;;  %v627_v1 = vrot.slane %v622_v58, 4  ;;  %v629_v2 = vrot.slane %v610_v56, 4  ;;  %v851_v3 = vperm.slane %v843_v63, %v1707_v55 }
 0x24d   : > { %798 = vst.msk [vmem:[%s1788_s26 + $0x4] sm:$0xf] %vm639_vm6, %v794_v60  ;;  %v626_v4 = vperm.slane %v618_v0, %v1717_v7  ;;  %v841_v5 = vsel %vm525_vm5, %v840_v62, %v1702_v39  ;;  %v852_v6 = vrot.slane %v838_v59, 4  ;;  %v855_v8 = vsel %vm525_vm5, %v838_v59, %v854_v29 }
 0x24e   : > { %v628_v9 = vsel %vm525_vm5, %v627_v1, %v610_v56  ;;  %v630_v10 = vsel %vm525_vm5, %v622_v58, %v629_v2  ;;  %v847_v11 = vperm.slane %v841_v5, %v1707_v55  ;;  %v878_v16 = vrot.slane %v851_v3, 4 }
 0x24f   : > { %v631_v12 = vrot.slane %v626_v4, 4  ;;  %v634_v13 = vsel %vm525_vm5, %v626_v4, %v633_v61  ;;  %v635_v14 = vpack.c.bf16 %v628_v9, %v628_v9  ;;  %v636_v15 = vpack.c.bf16 %v630_v10, %v630_v10 }
 0x250   : > { %v638_v39 = vpack.c.bf16 %v634_v13, %v634_v13  ;;  %v853_v29 = vsel %vm525_vm5, %v852_v6, %v1726_v21  ;;  %v863_v17 = vperm.slane %v855_v8, %v1707_v55  ;;  %v866_v19 = vrot.slane %v847_v11, 4 }
 0x251   : > { %v632_v18 = vsel %vm525_vm5, %v631_v12, %v614_v49  ;;  %640 = vst.msk [vmem:[%s422_s13] sm:$0xf] %vm639_vm6, %v635_v14  ;;  %v859_v20 = vperm.slane %v853_v29, %v1707_v55 }
 0x252   : > { %v637_v22 = vpack.c.bf16 %v632_v18, %v632_v18  ;;  %641 = vst.msk [vmem:[%s422_s13 + $0x4] sm:$0xf] %vm639_vm6, %v636_v15  ;;  %v876_v23 = vrot.slane %v863_v17, 4  ;;  %v879_v24 = vsel %vm525_vm5, %v863_v17, %v878_v16 }
 0x253   : > { %643 = vst.msk [vmem:[%s422_s13 + $0xc] sm:$0xf] %vm639_vm6, %v638_v39  ;;  %v864_v25 = vrot.slane %v859_v20, 4  ;;  %v867_v21 = vsel %vm525_vm5, %v859_v20, %v866_v19  ;;  %v887_v26 = vperm.slane %v879_v24, %v1717_v7 }
 0x254   : > { %642 = vst.msk [vmem:[%s422_s13 + $0x8] sm:$0xf] %vm639_vm6, %v637_v22  ;;  %v875_v27 = vperm.slane %v867_v21, %v1717_v7  ;;  %v877_v28 = vsel %vm525_vm5, %v876_v23, %v851_v3 }
 0x255   : > { %v865_v30 = vsel %vm525_vm5, %v864_v25, %v847_v11  ;;  %v883_v31 = vperm.slane %v877_v28, %v1717_v7  ;;  %v894_v32 = vrot.slane %v887_v26, 4 }
 0x256   : > { %v871_v33 = vperm.slane %v865_v30, %v1717_v7  ;;  %v890_v34 = vrot.slane %v875_v27, 4 }
 0x257   : > { %v892_v35 = vrot.slane %v883_v31, 4  ;;  %v895_v36 = vsel %vm525_vm5, 0.0, %v894_v32  ;;  %v907_v37 = vsel %vm525_vm5, %v894_v32, %v883_v31 }
 0x258   : > { %v888_v38 = vrot.slane %v871_v33, 4  ;;  %v891_v40 = vsel %vm525_vm5, 0.0, %v890_v34  ;;  %v896_v41 = vsel %vm525_vm5, %v890_v34, %v871_v33  ;;  %v911_v42 = vperm.slane %v907_v37, %v1707_v55 }
 0x259   : > { %v893_v43 = vsel %vm525_vm5, 0.0, %v892_v35  ;;  %v900_v44 = vperm.slane %v896_v41, %v1707_v55  ;;  %v901_v45 = vrot.slane %v891_v40, 4  ;;  %v912_v46 = vrot.slane %v895_v36, 4 }
 0x25a   : > { %v889_v47 = vsel %vm525_vm5, 0.0, %v888_v38  ;;  %v932_v48 = vrot.slane %v911_v42, 4 }
 0x25b   : > { %v902_v49 = vsel %vm525_vm5, %v901_v45, %v889_v47  ;;  %v913_v50 = vsel %vm525_vm5, %v912_v46, %v893_v43  ;;  %v920_v51 = vrot.slane %v900_v44, 4 }
 0x25c   : > { %v906_v52 = vperm.slane %v902_v49, %v1707_v55  ;;  %v917_v53 = vperm.slane %v913_v50, %v1707_v55 }
 0x25e   : > { %v918_v54 = vrot.slane %v906_v52, 4  ;;  %v921_v56 = vsel %vm525_vm5, %v906_v52, %v920_v51  ;;  %v930_v57 = vrot.slane %v917_v53, 4  ;;  %v933_v58 = vsel %vm525_vm5, %v917_v53, %v932_v48 }
 0x25f   : > { %v929_v59 = vperm.slane %v921_v56, %v1717_v7  ;;  %v941_v60 = vperm.slane %v933_v58, %v1717_v7 }
 0x260   : > { %v919_v61 = vsel %vm525_vm5, %v918_v54, %v900_v44  ;;  %v931_v62 = vsel %vm525_vm5, %v930_v57, %v911_v42 }
 0x261   : > { %v925_v63 = vperm.slane %v919_v61, %v1717_v7  ;;  %v937_v0 = vperm.slane %v931_v62, %v1717_v7  ;;  %v946_v1 = vrot.slane %v941_v60, 4  ;;  %v948_v55 = vrot.slane %v929_v59, 4 }
 0x263   : > { %v942_v2 = vrot.slane %v937_v0, 4  ;;  %v944_v3 = vrot.slane %v925_v63, 4  ;;  %v947_v4 = vsel %vm525_vm5, %v946_v1, %v929_v59  ;;  %v949_v5 = vsel %vm525_vm5, %v941_v60, %v948_v55 }
 0x264   : > { %v952_v6 = vpack.c.bf16 %v947_v4, %v947_v4  ;;  %v953_v8 = vpack.c.bf16 %v949_v5, %v949_v5 }
 0x265   : > { %v943_v9 = vsel %vm525_vm5, %v942_v2, %v925_v63  ;;  %v945_v10 = vsel %vm525_vm5, %v937_v0, %v944_v3 }
 0x266   : > { %v950_v11 = vpack.c.bf16 %v943_v9, %v943_v9  ;;  %v951_v7 = vpack.c.bf16 %v945_v10, %v945_v10  ;;  %956 = vst.msk [vmem:[%s438_s20 + $0x8] sm:$0xf] %vm639_vm6, %v952_v6 }
 0x267   : > { %957 = vst.msk [vmem:[%s438_s20 + $0xc] sm:$0xf] %vm639_vm6, %v953_v8 }
 0x268   : > { %954 = vst.msk [vmem:[%s438_s20] sm:$0xf] %vm639_vm6, %v950_v11 }
 0x269   : > { %955 = vst.msk [vmem:[%s438_s20 + $0x4] sm:$0xf] %vm639_vm6, %v951_v7 }
 0x26a PF: > { %s24_s10 = sadd.s32 1, %s1522_s10   ;;  %s1915_s27 = smov %s1506_s28 }
 0x26b   : > { %p21_p2 = scmp.ge.s32.totalorder %s24_s10, 4   ;;  %s1916_s28 = smov %s1510_s29 }
 0x26c   : > { %s1917_s29 = smov %s1668_s25  ;;  %s1918_s30 = smov %s1518_s9 }
 0x26d   : > { %s1919_s9 = smov %s1921_s15  ;;  %23 = sbr.rel (!%p21_p2) target bundleno = 10 (0xa), region = 120 }
 0x272   :  { %1029 = vsyncpa [#allocation3], 1 }
 0x273   :  { %1031 = vsyncpa [#allocation3 + $0x1], 1 }
 0x274   :  { %1032 = vsyncpa [#allocation5], 1 }
 0x275   :  { %1033 = vsyncpa [#allocation8], 1 }

// kernel: transformer_forward.5
= control target key start
LH: loop header
LB: loop body
LE: loop exit
PB: predicated region body
PF: predicated region fallthrough
CT: control target
= control target key end

     0   :  { %19 = vsyncpa [#allocation6], 0  ;;  %s1675_s29 = smov 0   ;;  %s1677_s30 = smov 0   ;;  %s1894_s0 = inlined_call_operand.vmem [shape: f32[2,8,32], index: 0, kind: input, shape index: {}]   ;;  %s1895_s1 = inlined_call_operand.vmem [shape: bf16[2,4,8,8], index: 1, kind: input, shape index: {}]   ;;  %s1896_s2 = inlined_call_operand.vmem [shape: bf16[2,4,8,8], index: 2, kind: input, shape index: {}]   ;;  %s1897_s3 = inlined_call_operand.vmem [shape: bf16[2,4,8,8], index: 3, kind: input, shape index: {}]   ;;  %s1898_s4 = inlined_call_operand.vmem [shape: bf16[4,8,32], index: 4, kind: input, shape index: {}]   ;;  %s1899_s5 = inlined_call_operand.vmem [shape: f32[1,32], index: 5, kind: input, shape index: {}]   ;;  %s1900_s6 = inlined_call_operand.vmem [shape: f32[1,32], index: 6, kind: input, shape index: {}, may-alias: {6,12}]   ;;  %s1901_s7 = inlined_call_operand.vmem [shape: f32[1,32], index: 7, kind: input, shape index: {}, may-alias: {7,13}]   ;;  %s1902_s8 = inlined_call_operand.hbm [shape: bf16[32,64], index: 8, kind: input, shape index: {}]   ;;  %s1903_s9 = inlined_call_operand.vmem [shape: f32[1,64], index: 9, kind: input, shape index: {}]   ;;  %s1904_s10 = inlined_call_operand.vmem [shape: bf16[64,32], index: 10, kind: input, shape index: {}]   ;;  %s1905_s11 = inlined_call_operand.vmem [shape: f32[1,32], index: 11, kind: input, shape index: {}]   ;;  %s1906_s12 = inlined_call_operand.vmem [shape: f32[1,32], index: 12, kind: input, shape index: {}, may-alias: {6,12}]   ;;  %s1907_s13 = inlined_call_operand.vmem [shape: f32[1,32], index: 13, kind: input, shape index: {}, may-alias: {7,13}]   ;;  %s1908_s14 = inlined_call_operand.vmem [shape: f32[2,8,32], index: 14, kind: output, shape index: {}]  }
   0x1   :  { %s1679_s15 = smov 0  }
   0x2 LB: > { %s1391_s12 = sadd.s32 4294967295, %s1591_s15   ;;  %s44_s13 = sadd.s32 1, %s1587_s30  ;;  %s1591_s15 = sphi %s1679_s15, %s25_s15   ;;  %s1587_s30 = sphi %s1677_s30, %s1910_s30   ;;  %s1583_s29 = sphi %s1675_s29, %s1909_s29  }
   0x3   : > { %p46_p0 = scmp.ge.s32.totalorder %s44_s13, 2  ;;  %p1393_p1 = scmp.ge.s32.totalorder %s1591_s15, 1 }
   0x4   : > { %p399_p2 = scmp.lt.s32.totalorder %s1591_s15, 3  ;;  %p1464_p4 = scmp.eq.s32.totalorder %s1391_s12, 0 }
   0x5   : > { %s1912_s13 = smov (%p46_p0, %s44_s13), 0  ;;  %s422_s18 = sshll.u32 %s1902_s8, 4  ;;  %s423_s18 = int_to_ptr.hbm [resolvable:$true] %s422_s18 }
   0x6   : > { %p400_p3 = pnand %p1393_p1, %p399_p2  ;;  %s1593_s19 = smov [#allocation5]  }
   0x7   : > { %s424_s20 = sshll.u32 %s1593_s19, 4  ;;  %s1594_s21 = smov 64   ;;  %s425_s20 = int_to_ptr.vmem [resolvable:$true] %s424_s20 }
   0x8   : > { %p1460_p5 = pneg %p400_p3  ;;  %s1595_s22 = smov 4  }
   0x9   : > { %498 = sbr.rel (%p400_p3) target bundleno = 1375 (0x55f), region = 76 }
   0xa   : > { %p1461_p6 = pnand %p1464_p4, %p1460_p5 }
   0xc   : > { %1463 = dma.hbm_to_vmem [thread:$0]  (!%p1461_p6), %s423_s18, 256, %s425_s20, [#allocation6], %s1594_s21, %s1594_s21, %s1595_s22  }
   0xe   : > { %1578 = dma.done.wait (%p1464_p4), [#allocation6], 256  }
   0xf   : > { %1580 = vsyncadd (%p1464_p4), [#allocation6], 4294967040  ;;  %p573_p7 = scmp.lt.s32.totalorder %s1583_s29, 1  ;;  %vm625_vm0 = vcmask 64512   ;;  %vm616_vm1 = vcmask 7168   ;;  %v1596_v12 = vmov -inf  }
  0x10   : > { %617 = vst.msk [vmem:[#allocation2] sm:$0xff] %vm616_vm1, %v1596_v12  ;;  %v1597_v25 = vmov 0   ;;  %v1598_v26 = vmov 0.0   ;;  %vm847_vm2 = vcmask 1043456   ;;  %vm1056_vm3 = vcmask 261120  }
  0x11   : > { %s1914_s29 = smov (!%p573_p7, %s1583_s29), 1  ;;  %618 = vst.msk [vmem:[#allocation2 + $0x8] sm:$0xff] %vm616_vm1, %v1596_v12  ;;  %1498 = vset.pattern.permute.xlu0 %v1597_v25  ;;  %1497 = vset.pattern.permute.xlu2 %v1597_v25  ;;  %vm1228_vm12 = vcmask 523264  }
  0x12   : > { %s1700_s23 = sshll.u32 %s1914_s29, 4  ;;  %619 = vst.msk [vmem:[#allocation2 + $0x10] sm:$0xff] %vm616_vm1, %v1596_v12  ;;  %1499 = vset.pattern.permute.xlu1 %v1597_v25  ;;  %s1398_s27 = sshll.u32 %s1914_s29, 3 }
  0x13   : > { %s595_s26 = scalar_lea.vmem %s1896_s2, %s1700_s23  ;;  %s587_s12 = scalar_lea.vmem %s1895_s1, %s1700_s23  ;;  %620 = vst.msk [vmem:[#allocation2 + $0x18] sm:$0xff] %vm616_vm1, %v1596_v12 }
  0x14   : > { %v634_v0 = vld [vmem:[%s595_s26] sm:$0xf]  ;;  %v636_v1 = vld [vmem:[%s595_s26 + $0x8] sm:$0xf]  ;;  %v635_v4 = vld [vmem:[%s595_s26 + $0x4] sm:$0xf]  ;;  %s603_s18 = scalar_lea.vmem %s1897_s3, %s1700_s23  ;;  %s579_s16 = scalar_lea.vmem %s1894_s0, %s1398_s27 }
  0x15   : > { %v647_v2 = vsel %vm625_vm0, %v634_v0, 0  ;;  %v685_v3 = vsel %vm625_vm0, %v636_v1, 0  ;;  %v666_v5 = vsel %vm625_vm0, %v635_v4, 0  ;;  %v637_v6 = vld [vmem:[%s595_s26 + $0xc] sm:$0xf]  ;;  %623 = vst.msk [vmem:[#allocation3 + $0x10] sm:$0xff] %vm616_vm1, %v1598_v26  ;;  %s610_s24 = scalar_lea.vmem %s1908_s14, %s1398_s27 }
  0x16   : > { %656 = vmatpush.bf16.xpose.msra.mxu0 %v647_v2  ;;  %694 = vmatpush.bf16.xpose.msra.mxu2 %v685_v3  ;;  %v704_v7 = vsel %vm625_vm0, %v637_v6, 0  ;;  %v630_v8 = vld [vmem:[%s587_s12] sm:$0xf]  ;;  %v632_v9 = vld [vmem:[%s587_s12 + $0x8] sm:$0xf]  ;;  %621 = vst.msk [vmem:[#allocation3] sm:$0xff] %vm616_vm1, %v1598_v26 }
  0x17   : > { %675 = vmatpush.bf16.xpose.msra.mxu1 %v666_v5  ;;  %713 = vmatpush.bf16.xpose.msra.mxu3 %v704_v7  ;;  %v631_v10 = vld [vmem:[%s587_s12 + $0x4] sm:$0xf]  ;;  %v633_v11 = vld [vmem:[%s587_s12 + $0xc] sm:$0xf]  ;;  %622 = vst.msk [vmem:[#allocation3 + $0x8] sm:$0xff] %vm616_vm1, %v1598_v26 }
  0x18   : > { %624 = vst.msk [vmem:[#allocation3 + $0x18] sm:$0xff] %vm616_vm1, %v1598_v26  ;;  %v1746_v27 = vld [vmem:[#allocation2] sm:$0xff]  ;;  %v1758_v33 = vld [vmem:[#allocation2 + $0x8] sm:$0xff] }
  0x19   : > { %626 = vst.msk [vmem:[#allocation4] sm:$0xff] %vm625_vm0, %v1598_v26  ;;  %v1756_v31 = vld [vmem:[#allocation2 + $0x10] sm:$0xff]  ;;  %v640_v43 = vld [vmem:[%s603_s18 + $0x8] sm:$0xf]  ;;  %v641_v45 = vld [vmem:[%s603_s18 + $0xc] sm:$0xf] }
  0x1a   : > { %627 = vst.msk [vmem:[#allocation4 + $0x8] sm:$0xff] %vm625_vm0, %v1598_v26  ;;  %v722_v39 = vld [vmem:[#allocation2 + $0x18] sm:$0xff]  ;;  %v887_v44 = vsel %vm847_vm2, %v640_v43, 0  ;;  %v906_v46 = vsel %vm847_vm2, %v641_v45, 0  ;;  %v638_v47 = vld [vmem:[%s603_s18] sm:$0xf] }
  0x1b   : > { %628 = vst.msk [vmem:[#allocation4 + $0x10] sm:$0xff] %vm625_vm0, %v1598_v26  ;;  %v849_v48 = vsel %vm847_vm2, %v638_v47, 0  ;;  %v639_v50 = vld [vmem:[%s603_s18 + $0x4] sm:$0xf] }
  0x1c   : > { %629 = vst.msk [vmem:[#allocation4 + $0x18] sm:$0xff] %vm625_vm0, %v1598_v26  ;;  %v868_v52 = vsel %vm847_vm2, %v639_v50, 0 }
  0x1d   : > { %1406 = vmatmul.msk.bf16.vlgmr.msra.gmra.mxu0 %vm625_vm0, %v630_v8  ;;  %1408 = vmatmul.msk.bf16.vlgmr.msra.gmra.mxu2 %vm625_vm0, %v632_v9 }
  0x1e   : > { %1407 = vmatmul.msk.bf16.vlgmr.msra.gmra.mxu1 %vm625_vm0, %v631_v10  ;;  %1409 = vmatmul.msk.bf16.vlgmr.msra.gmra.mxu3 %vm625_vm0, %v633_v11 }
  0x1f   : > { %896 = vmatpush.bf16.msrb.mxu2 %v887_v44  ;;  %915 = vmatpush.bf16.msrb.mxu3 %v906_v46 }
  0x20   : > { %858 = vmatpush.bf16.msrb.mxu0 %v849_v48  ;;  %877 = vmatpush.bf16.msrb.mxu1 %v868_v52 }
  0x22   : > { %v814_v46 = vld [vmem:[#allocation4 + $0x10] sm:$0xff] }
  0x23   : > { %v815_v44 = vld [vmem:[#allocation4 + $0x18] sm:$0xff] }
  0x9a   : > { %v1722_v13 = vpop.f32.mrf.mxu0 }
  0x9b   : > { %v723_v14 = vsel %vm625_vm0, %v1722_v13, -inf  ;;  %v1726_v15 = vpop.f32.mrf.mxu1 }
  0x9c   : > { %724 = vmax.xlane.f32.xlu1 %v723_v14  ;;  %v726_v18 = vsel %vm625_vm0, %v1726_v15, -inf }
  0xa0   : > { %v1728_v16 = vpop.f32.mrf.mxu2 }
  0xa1   : > { %v729_v17 = vsel %vm625_vm0, %v1728_v16, -inf  ;;  %v1734_v20 = vpop.f32.mrf.mxu3 }
  0xa2   : > { %730 = vmax.xlane.f32.xlu0 %v729_v17  ;;  %v660_v19 = vpop.f32.mrf.mxu0  ;;  %v732_v22 = vsel %vm625_vm0, %v1734_v20, -inf }
  0xa3   : > { %v679_v21 = vpop.f32.mrf.mxu1  ;;  %v785_v19 = vld [vmem:[#allocation3 + $0x10] sm:$0xff] }
  0xa4   : > { %727 = vmax.xlane.f32.xlu1 %v726_v18 }
  0xa8   : > { %v698_v23 = vpop.f32.mrf.mxu2 }
  0xa9   : > { %v717_v24 = vpop.f32.mrf.mxu3  ;;  %v786_v23 = vld [vmem:[#allocation3 + $0x18] sm:$0xff] }
  0xaa   : > { %733 = vmax.xlane.f32.xlu0 %v732_v22 }
 0x10f   : > { %v725_v28 = vpop.xlane.xlu1 %724 }
 0x110   : > { %v1749_v29 = vmax.f32 %v1746_v27, %v725_v28  ;;  %v783_v28 = vld [vmem:[#allocation3] sm:$0xff] }
 0x112   : > { %v739_v30 = vsub.f32 %v1746_v27, %v1749_v29  ;;  %929 = vst.msk [vmem:[#allocation2] sm:$0xff] %vm616_vm1, %v1749_v29  ;;  %753 = vperm.xlu0 %1498, %v1749_v29  }
 0x114   : > { %v743_v14 = vmul.f32 1.442695, %v739_v30 }
 0x115   : > { %v731_v32 = vpop.xlane.xlu0 %730 }
 0x116   : > { %v1761_v34 = vmax.f32 %v1756_v31, %v731_v32 }
 0x117   : > { %v728_v35 = vpop.xlane.xlu1 %727 }
 0x118   : > { %v741_v36 = vsub.f32 %v1756_v31, %v1761_v34  ;;  %931 = vst.msk [vmem:[#allocation2 + $0x10] sm:$0xff] %vm616_vm1, %v1761_v34  ;;  %v1768_v37 = vmax.f32 %v1758_v33, %v728_v35  ;;  %763 = vperm.xlu2 %1497, %v1761_v34   ;;  %v784_v35 = vld [vmem:[#allocation3 + $0x8] sm:$0xff] }
 0x11a   : > { %v740_v38 = vsub.f32 %v1758_v33, %v1768_v37  ;;  %930 = vst.msk [vmem:[#allocation2 + $0x8] sm:$0xff] %vm616_vm1, %v1768_v37  ;;  %758 = vperm.xlu1 %1499, %v1768_v37  }
 0x11d   : > { %v734_v40 = vpop.xlane.xlu0 %733 }
 0x11e   : > { %v738_v41 = vmax.f32 %v722_v39, %v734_v40 }
 0x120   : > { %v742_v42 = vsub.f32 %v722_v39, %v738_v41  ;;  %932 = vst.msk [vmem:[#allocation2 + $0x18] sm:$0xff] %vm616_vm1, %v738_v41  ;;  %768 = vperm.xlu2 %1497, %v738_v41  }
 0x122   : > { %v749_v8 = vmul.f32 1.442695, %v742_v42 }
 0x172   : > { %v764_v49 = vpop.permute.xlu2 %763 }
 0x173   : > { %v773_v51 = vsub.f32 %v1728_v16, %v764_v49  ;;  %v745_v16 = vmul.f32 1.442695, %v740_v38 }
 0x175   : > { %v779_v53 = vmul.f32 1.442695, %v773_v51 }
 0x177   : > { %1505 = vpow2.f32 %v779_v53 }
 0x17a   : > { %v769_v54 = vpop.permute.xlu2 %768 }
 0x17b   : > { %v774_v55 = vsub.f32 %v1734_v20, %v769_v54 }
 0x17d   : > { %v1506_v56 = vpop.eup %1505  ;;  %v781_v57 = vmul.f32 1.442695, %v774_v55 }
 0x17e   : > { %v797_v58 = vsel %vm625_vm0, %v1506_v56, 0.0  ;;  %v842_v59 = vpack.c.bf16 %v1506_v56, %v1506_v56 }
 0x17f   : > { %1507 = vpow2.f32 %v781_v57  ;;  %798 = vadd.xlane.f32.xlu2 %v797_v58  ;;  %v812_v57 = vld [vmem:[#allocation4] sm:$0xff] }
 0x180   : > { %1412 = vmatmul.msk.bf16.vlgmr.msrb.gmra.mxu2 %vm625_vm0, %v842_v59 }
 0x184   : > { %v754_v60 = vpop.permute.xlu0 %753 }
 0x185   : > { %v1508_v61 = vpop.eup %1507  ;;  %v771_v62 = vsub.f32 %v1722_v13, %v754_v60  ;;  %v747_v13 = vmul.f32 1.442695, %v741_v36 }
 0x186   : > { %v800_v63 = vsel %vm625_vm0, %v1508_v61, 0.0  ;;  %v843_v0 = vpack.c.bf16 %v1508_v61, %v1508_v61 }
 0x187   : > { %v775_v1 = vmul.f32 1.442695, %v771_v62  ;;  %801 = vadd.xlane.f32.xlu1 %v800_v63  ;;  %v813_v63 = vld [vmem:[#allocation4 + $0x8] sm:$0xff] }
 0x188   : > { %1413 = vmatmul.msk.bf16.vlgmr.msrb.gmra.mxu3 %vm625_vm0, %v843_v0 }
 0x189   : > { %1509 = vpow2.f32 %v775_v1 }
 0x18c   : > { %v759_v2 = vpop.permute.xlu1 %758 }
 0x18d   : > { %v772_v3 = vsub.f32 %v1726_v15, %v759_v2 }
 0x18f   : > { %v1510_v4 = vpop.eup %1509  ;;  %v777_v5 = vmul.f32 1.442695, %v772_v3  ;;  %v979_v3 = vld [vmem:[%s1898_s4 + $0xc] sm:$0xf] }
 0x190   : > { %v791_v6 = vsel %vm625_vm0, %v1510_v4, 0.0  ;;  %v840_v7 = vpack.c.bf16 %v1510_v4, %v1510_v4  ;;  %v1041_v4 = vsel %vm847_vm2, %v979_v3, 0 }
 0x191   : > { %1511 = vpow2.f32 %v777_v5  ;;  %792 = vadd.xlane.f32.xlu0 %v791_v6  ;;  %1050 = vmatpush.bf16.msra.mxu3 %v1041_v4  ;;  %v978_v5 = vld [vmem:[%s1898_s4 + $0x8] sm:$0xf] }
 0x192   : > { %1410 = vmatmul.msk.bf16.vlgmr.msrb.gmra.mxu0 %vm625_vm0, %v840_v7  ;;  %1513 = vpow2.f32 %v749_v8  ;;  %v1022_v6 = vsel %vm847_vm2, %v978_v5, 0  ;;  %v977_v7 = vld [vmem:[%s1898_s4 + $0x4] sm:$0xf] }
 0x193   : > { %1515 = vpow2.f32 %v747_v13  ;;  %1031 = vmatpush.bf16.msra.mxu2 %v1022_v6  ;;  %v1003_v8 = vsel %vm847_vm2, %v977_v7, 0  ;;  %v1501_v6 = vld [vmem:[%s1900_s6] ss:$0 sm:$0xff] }
 0x194   : > { %1517 = vpow2.f32 %v743_v14  ;;  %1012 = vmatpush.bf16.msra.mxu1 %v1003_v8 }
 0x195   : > { %1519 = vpow2.f32 %v745_v16 }
 0x197   : > { %v1512_v9 = vpop.eup %1511 }
 0x198   : > { %v794_v10 = vsel %vm625_vm0, %v1512_v9, 0.0  ;;  %v841_v11 = vpack.c.bf16 %v1512_v9, %v1512_v9  ;;  %v1514_v12 = vpop.eup %1513  ;;  %v976_v9 = vld [vmem:[%s1898_s4] sm:$0xf] }
 0x199   : > { %795 = vadd.xlane.f32.xlu2 %v794_v10  ;;  %v1516_v15 = vpop.eup %1515  ;;  %v790_v24 = vmul.f32 %v1514_v12, %v786_v23  ;;  %v984_v10 = vsel %vm847_vm2, %v976_v9, 0  ;;  %v1502_v9 = vld [vmem:[%s1901_s7] ss:$0 sm:$0xff] }
 0x19a   : > { %1411 = vmatmul.msk.bf16.vlgmr.msrb.gmra.mxu1 %vm625_vm0, %v841_v11  ;;  %v1518_v17 = vpop.eup %1517  ;;  %v789_v20 = vmul.f32 %v1516_v15, %v785_v19  ;;  %993 = vmatpush.bf16.msra.mxu0 %v984_v10 }
 0x19b   : > { %v1520_v18 = vpop.eup %1519  ;;  %v787_v31 = vmul.f32 %v1518_v17, %v783_v28 }
 0x19c   : > { %v788_v39 = vmul.f32 %v1520_v18, %v784_v35 }
 0x1a0   : > { %833 = vperm.xlu1 %1499, %v1514_v12  }
 0x1b1   : > { %828 = vperm.xlu2 %1497, %v1516_v15  }
 0x1b9   : > { %818 = vperm.xlu2 %1497, %v1518_v17  }
 0x1c1   : > { %823 = vperm.xlu2 %1497, %v1520_v18  }
 0x1f2   : > { %v799_v21 = vpop.xlane.xlu2 %798 }
 0x1f3   : > { %v805_v22 = vadd.f32 %v799_v21, %v789_v20 }
 0x1f5   : > { %810 = vst.msk [vmem:[#allocation3 + $0x10] sm:$0xff] %vm616_vm1, %v805_v22 }
 0x1fa   : > { %v802_v25 = vpop.xlane.xlu1 %801 }
 0x1fb   : > { %v806_v26 = vadd.f32 %v802_v25, %v790_v24 }
 0x1fc   : > { %v942_v27 = vld [vmem:[#allocation3 + $0x10] sm:$0xff] }
 0x1fd   : > { %811 = vst.msk [vmem:[#allocation3 + $0x18] sm:$0xff] %vm616_vm1, %v806_v26  ;;  %1521 = vrcp.f32 %v942_v27 }
 0x203   : > { %v1522_v29 = vpop.eup %1521  ;;  %v898_v30 = vpop.f32.mrf.mxu2 }
 0x204   : > { %960 = vperm.xlu0 %1498, %v1522_v29   ;;  %v793_v32 = vpop.xlane.xlu0 %792  ;;  %v943_v33 = vld [vmem:[#allocation3 + $0x18] sm:$0xff] }
 0x205   : > { %v803_v34 = vadd.f32 %v793_v32, %v787_v31  ;;  %1523 = vrcp.f32 %v943_v33 }
 0x207   : > { %808 = vst.msk [vmem:[#allocation3] sm:$0xff] %vm616_vm1, %v803_v34 }
 0x20b   : > { %v1524_v36 = vpop.eup %1523  ;;  %v900_v37 = vpop.f32.mrf.mxu2 }
 0x20c   : > { %v917_v38 = vpop.f32.mrf.mxu3  ;;  %v796_v40 = vpop.xlane.xlu2 %795  ;;  %965 = vperm.xlu2 %1497, %v1524_v36  }
 0x20d   : > { %v804_v41 = vadd.f32 %v796_v40, %v788_v39  ;;  %v1500_v39 = vld [vmem:[%s1899_s5] ss:$0 sm:$0xff] }
 0x20e   : > { %v940_v42 = vld [vmem:[#allocation3] sm:$0xff] }
 0x20f   : > { %809 = vst.msk [vmem:[#allocation3 + $0x8] sm:$0xff] %vm616_vm1, %v804_v41  ;;  %v860_v43 = vpop.f32.mrf.mxu0  ;;  %1525 = vrcp.f32 %v940_v42  ;;  %v1069_v42 = vld [vmem:[%s579_s16] sm:$0xff] }
 0x212   : > { %v834_v45 = vpop.permute.xlu1 %833 }
 0x213   : > { %v839_v47 = vmul.f32 %v834_v45, %v815_v44 }
 0x214   : > { %v919_v48 = vpop.f32.mrf.mxu3  ;;  %v829_v49 = vpop.permute.xlu2 %828 }
 0x215   : > { %v1526_v50 = vpop.eup %1525  ;;  %v924_v51 = vadd.f32 %v917_v38, %v839_v47  ;;  %v838_v52 = vmul.f32 %v829_v49, %v814_v46  ;;  %v1599_v47 = vmov 32.0  }
 0x216   : > { %950 = vperm.xlu1 %1499, %v1526_v50   ;;  %v941_v53 = vld [vmem:[#allocation3 + $0x8] sm:$0xff] }
 0x217   : > { %928 = vst.msk [vmem:[#allocation4 + $0x18] sm:$0xff] %vm625_vm0, %v924_v51  ;;  %v923_v54 = vadd.f32 %v898_v30, %v838_v52  ;;  %v862_v55 = vpop.f32.mrf.mxu0  ;;  %v879_v56 = vpop.f32.mrf.mxu1  ;;  %1527 = vrcp.f32 %v941_v53 }
 0x218   : > { %1529 = vrcp.f32 %v1599_v47 }
 0x219   : > { %927 = vst.msk [vmem:[#allocation4 + $0x10] sm:$0xff] %vm625_vm0, %v923_v54 }
 0x21c   : > { %v819_v58 = vpop.permute.xlu2 %818 }
 0x21d   : > { %v1528_v59 = vpop.eup %1527  ;;  %v836_v60 = vmul.f32 %v819_v58, %v812_v57 }
 0x21e   : > { %955 = vperm.xlu2 %1497, %v1528_v59   ;;  %v939_v11 = vld [vmem:[#allocation4 + $0x18] sm:$0xff]  ;;  %v1530_v48 = vpop.eup %1529  ;;  %v1451_v59 = vld [vmem:[#allocation5 + $0x8] sm:$0xff] }
 0x21f   : > { %v921_v61 = vadd.f32 %v860_v43, %v836_v60  ;;  %v881_v62 = vpop.f32.mrf.mxu1  ;;  %v1077_v49 = vmul.f32 32.0, %v1530_v48  ;;  %vm1081_vm4 = vweird.f32 %v1530_v48  ;;  %1140 = vmatpush.bf16.msrb.mxu0 %v1451_v59  ;;  %v1450_v60 = vld [vmem:[#allocation5] sm:$0xff] }
 0x220   : > { %v938_v15 = vld [vmem:[#allocation4 + $0x10] sm:$0xff] }
 0x221   : > { %925 = vst.msk [vmem:[#allocation4] sm:$0xff] %vm625_vm0, %v921_v61  ;;  %v1078_v50 = vsub.f32 1.0, %v1077_v49 }
 0x223   : > { %v1079_v51 = vmul.f32 %v1530_v48, %v1078_v50  ;;  %1141 = vmatpush.bf16.msrb.mxu0 %v1450_v60 }
 0x224   : > { %v824_v0 = vpop.permute.xlu2 %823 }
 0x225   : > { %v837_v1 = vmul.f32 %v824_v0, %v813_v63  ;;  %v1080_v52 = vadd.f32 %v1530_v48, %v1079_v51 }
 0x227   : > { %v922_v2 = vadd.f32 %v879_v56, %v837_v1  ;;  %v1082_v53 = vsel %vm1081_vm4, %v1530_v48, %v1080_v52 }
 0x228   : > { %v936_v23 = vld [vmem:[#allocation4] sm:$0xff] }
 0x229   : > { %926 = vst.msk [vmem:[#allocation4 + $0x8] sm:$0xff] %vm625_vm0, %v922_v2 }
 0x230   : > { %v937_v18 = vld [vmem:[#allocation4 + $0x8] sm:$0xff] }
 0x266   : > { %v966_v12 = vpop.permute.xlu2 %965 }
 0x267   : > { %v971_v13 = vmul.f32 %v966_v12, %v939_v11 }
 0x269   : > { %v975_v14 = vpack.c.bf16 %v971_v13, %v971_v13  ;;  %v1503_v13 = vld [vmem:[%s1903_s9] ss:$0 sm:$0xff] }
 0x26b   : > { %1417 = vmatmul.msk.bf16.vlgmr.msra.gmra.mxu3 %vm625_vm0, %v975_v14 }
 0x276   : > { %v961_v16 = vpop.permute.xlu0 %960 }
 0x277   : > { %v970_v17 = vmul.f32 %v961_v16, %v938_v15 }
 0x278   : > { %v956_v19 = vpop.permute.xlu2 %955 }
 0x279   : > { %v974_v20 = vpack.c.bf16 %v970_v17, %v970_v17  ;;  %v969_v21 = vmul.f32 %v956_v19, %v937_v18 }
 0x27b   : > { %v973_v22 = vpack.c.bf16 %v969_v21, %v969_v21  ;;  %1416 = vmatmul.msk.bf16.vlgmr.msra.gmra.mxu2 %vm625_vm0, %v974_v20  ;;  %v1455_v20 = vld [vmem:[%s1904_s10 + $0x18] sm:$0xff] }
 0x27c   : > { %1236 = vmatpush.bf16.msrb.mxu1 %v1455_v20 }
 0x27d   : > { %1415 = vmatmul.msk.bf16.vlgmr.msra.gmra.mxu1 %vm625_vm0, %v973_v22 }
 0x288   : > { %v951_v24 = vpop.permute.xlu1 %950 }
 0x289   : > { %v968_v25 = vmul.f32 %v951_v24, %v936_v23 }
 0x28b   : > { %v972_v26 = vpack.c.bf16 %v968_v25, %v968_v25  ;;  %v1454_v25 = vld [vmem:[%s1904_s10 + $0x10] sm:$0xff] }
 0x28c   : > { %1237 = vmatpush.bf16.msrb.mxu1 %v1454_v25 }
 0x28d   : > { %1414 = vmatmul.msk.bf16.vlgmr.msra.gmra.mxu0 %vm625_vm0, %v972_v26 }
 0x2ee   : > { %v1052_v27 = vpop.f32.mrf.mxu3 }
 0x2ef   : > { %v1062_v40 = vsel %vm1056_vm3, %v1052_v27, 0.0 }
 0x2f6   : > { %v1054_v28 = vpop.f32.mrf.mxu3 }
 0x2fa   : > { %v1014_v29 = vpop.f32.mrf.mxu1 }
 0x2fb   : > { %v1058_v34 = vsel %vm1056_vm3, %v1014_v29, 0.0 }
 0x2fe   : > { %v1033_v30 = vpop.f32.mrf.mxu2 }
 0x2ff   : > { %v1060_v37 = vsel %vm1056_vm3, %v1033_v30, 0.0  ;;  %v1453_v30 = vld [vmem:[%s1904_s10 + $0x8] sm:$0xff] }
 0x300   : > { %1238 = vmatpush.bf16.msrb.mxu1 %v1453_v30 }
 0x302   : > { %v1016_v31 = vpop.f32.mrf.mxu1 }
 0x306   : > { %v1035_v32 = vpop.f32.mrf.mxu2 }
 0x30a   : > { %v995_v33 = vpop.f32.mrf.mxu0 }
 0x30b   : > { %v1057_v35 = vsel %vm1056_vm3, %v995_v33, 0.0 }
 0x30c   : > { %v1059_v36 = vadd.f32 %v1058_v34, %v1057_v35  ;;  %v1452_v34 = vld [vmem:[%s1904_s10] sm:$0xff] }
 0x30d   : > { %1239 = vmatpush.bf16.msrb.mxu1 %v1452_v34 }
 0x30e   : > { %v1061_v38 = vadd.f32 %v1060_v37, %v1059_v36 }
 0x310   : > { %v1063_v41 = vadd.f32 %v1062_v40, %v1061_v38 }
 0x312   : > { %v997_v43 = vpop.f32.mrf.mxu0  ;;  %v1068_v44 = vadd.f32 %v1500_v39, %v1063_v41 }
 0x314   : > { %v1847_v45 = vadd.f32 %v1069_v42, %v1068_v44 }
 0x316   : > { %v1073_v46 = vsel %vm1056_vm3, %v1847_v45, 0.0 }
 0x317   : > { %1074 = vadd.xlane.f32.xlu1 %v1073_v46 }
 0x38a   : > { %v1075_v54 = vpop.xlane.xlu1 %1074 }
 0x38b   : > { %v1083_v55 = vmul.f32 %v1082_v53, %v1075_v54 }
 0x38d   : > { %v1084_v56 = vsub.f32 %v1847_v45, %v1083_v55 }
 0x38f   : > { %v1085_v57 = vmul.f32 %v1084_v56, %v1084_v56 }
 0x391   : > { %v1086_v58 = vsel %vm1056_vm3, %v1085_v57, 0.0 }
 0x392   : > { %1087 = vadd.xlane.f32.xlu0 %v1086_v58 }
 0x405   : > { %v1088_v61 = vpop.xlane.xlu0 %1087 }
 0x406   : > { %v1089_v62 = vmul.f32 %v1088_v61, %v1082_v53 }
 0x408   : > { %v1090_v63 = vadd.f32 1e-05, %v1089_v62  ;;  %v1504_v62 = vld [vmem:[%s1905_s11] ss:$0 sm:$0xff] }
 0x40a   : > { %1531 = vrsqrt.f32 %v1090_v63  ;;  %vm1097_vm6 = vweird.f32 %v1090_v63 }
 0x410   : > { %v1532_v0 = vpop.eup %1531 }
 0x411   : > { %v1092_v1 = vmul.f32 %v1532_v0, %v1090_v63  ;;  %vm1098_vm5 = vweird.f32 %v1532_v0 }
 0x412   : > { %vm1099_vm7 = vmor %vm1097_vm6, %vm1098_vm5 }
 0x413   : > { %v1093_v2 = vmul.f32 %v1532_v0, %v1092_v1 }
 0x415   : > { %v1094_v3 = vmul.f32 0.5, %v1093_v2 }
 0x417   : > { %v1095_v4 = vsub.f32 1.5, %v1094_v3 }
 0x419   : > { %v1096_v5 = vmul.f32 %v1532_v0, %v1095_v4 }
 0x41b   : > { %v1100_v7 = vsel %vm1099_vm7, %v1532_v0, %v1096_v5 }
 0x41c   : > { %v1101_v8 = vmul.f32 %v1100_v7, %v1084_v56 }
 0x41e   : > { %v1105_v10 = vmul.f32 %v1501_v6, %v1101_v8 }
 0x420   : > { %v1109_v11 = vadd.f32 %v1502_v9, %v1105_v10 }
 0x422   : > { %v1110_v12 = vpack.c.bf16 %v1109_v11, %v1109_v11 }
 0x424   : > { %1426 = vmatmul.msk.bf16.vlgmr.msrb.gmra.mxu0 %vm1056_vm3, %v1110_v12 }
 0x4a1   : > { %v1143_v14 = vpop.f32.mrf.mxu0 }
 0x4a2   : > { %v1144_v15 = vadd.f32 %v1503_v13, %v1143_v14 }
 0x4a4   : > { %v1148_v16 = vmul.f32 0.70710677, %v1144_v15  ;;  %v1147_v58 = vmul.f32 0.5, %v1144_v15 }
 0x4a6   : > { %v1149_v17 = vmul.f32 %v1148_v16, %v1148_v16 }
 0x4a8   : > { %v1150_v18 = vmin.f32 %v1149_v17, 16.0 }
 0x4a9   : > { %v1145_v19 = vpop.f32.mrf.mxu0 }
 0x4aa   : > { %v1151_v21 = vmul.f32 2.1237322e-06, %v1150_v18  ;;  %v1162_v22 = vmul.f32 3.8918573e-05, %v1150_v18 }
 0x4ac   : > { %v1152_v23 = vadd.f32 0.00028619796, %v1151_v21  ;;  %v1163_v24 = vadd.f32 0.001143296, %v1162_v22 }
 0x4ae   : > { %v1153_v26 = vmul.f32 %v1152_v23, %v1150_v18  ;;  %v1164_v27 = vmul.f32 %v1163_v24, %v1150_v18 }
 0x4b0   : > { %v1165_v28 = vadd.f32 0.014752088, %v1164_v27  ;;  %v1154_v29 = vadd.f32 0.0036580483, %v1153_v26 }
 0x4b2   : > { %v1166_v31 = vmul.f32 %v1165_v28, %v1150_v18  ;;  %v1155_v33 = vmul.f32 %v1154_v29, %v1150_v18 }
 0x4b4   : > { %v1167_v32 = vadd.f32 0.112945676, %v1166_v31  ;;  %v1156_v37 = vadd.f32 0.05243302, %v1155_v33 }
 0x4b6   : > { %v1168_v35 = vmul.f32 %v1167_v32, %v1150_v18  ;;  %v1157_v40 = vmul.f32 %v1156_v37, %v1150_v18 }
 0x4b8   : > { %v1169_v36 = vadd.f32 0.4994258, %v1168_v35  ;;  %v1158_v41 = vadd.f32 0.18741608, %v1157_v40 }
 0x4ba   : > { %v1170_v38 = vmul.f32 %v1169_v36, %v1150_v18  ;;  %v1159_v43 = vmul.f32 %v1158_v41, %v1150_v18 }
 0x4bc   : > { %v1171_v39 = vadd.f32 1.0, %v1170_v38  ;;  %v1160_v48 = vadd.f32 1.1283791, %v1159_v43 }
 0x4be   : > { %1533 = vrcp.f32 %v1171_v39  ;;  %v1183_v47 = vand.u32 2147483648, %v1171_v39  ;;  %v1181_v50 = vand.u32 2147483647, %v1171_v39  ;;  %vm1177_vm9 = vweird.f32 %v1171_v39 }
 0x4bf   : > { %v1161_v53 = vmul.f32 %v1160_v48, %v1148_v16 }
 0x4c0   : > { %v1184_v52 = vor.u32 1.1754944e-38, %v1183_v47  ;;  %vm1182_vm11 = vcmp.eq.f32.partialorder %v1181_v50, 8.507059e+37 }
 0x4c4   : > { %v1534_v42 = vpop.eup %1533 }
 0x4c5   : > { %v1173_v44 = vmul.f32 %v1534_v42, %v1171_v39  ;;  %vm1178_vm8 = vweird.f32 %v1534_v42 }
 0x4c6   : > { %vm1179_vm10 = vmor %vm1177_vm9, %vm1178_vm8 }
 0x4c7   : > { %v1174_v46 = vsub.f32 1.0, %v1173_v44 }
 0x4c9   : > { %v1175_v49 = vmul.f32 %v1534_v42, %v1174_v46 }
 0x4cb   : > { %v1176_v51 = vadd.f32 %v1534_v42, %v1175_v49 }
 0x4cd   : > { %v1180_v54 = vsel %vm1179_vm10, %v1534_v42, %v1176_v51 }
 0x4ce   : > { %v1185_v55 = vsel %vm1182_vm11, %v1184_v52, %v1180_v54 }
 0x4cf   : > { %v1186_v56 = vmul.f32 %v1185_v55, %v1161_v53 }
 0x4d1   : > { %v1427_v57 = vclamps-f32 %v1186_v56, 1.0 }
 0x4d3   : > { %v1189_v59 = vadd.f32 1.0, %v1427_v57 }
 0x4d5   : > { %v1190_v60 = vmul.f32 %v1189_v59, %v1147_v58 }
 0x4d7   : > { %v1191_v61 = vpack.c.bf16 %v1190_v60, %v1190_v60 }
 0x4d9   : > { %1444 = vmatmul.msk.bf16.vlgmr.msrb.gmra.mxu1 %vm1228_vm12, %v1191_v61 }
 0x556   : > { %v1241_v63 = vpop.f32.mrf.mxu1 }
 0x557   : > { %v1242_v0 = vadd.f32 %v1504_v62, %v1241_v63 }
 0x559   : > { %v1245_v1 = vadd.f32 %v1242_v0, %v1847_v45 }
 0x55b   : > { %1246 = vst.msk [vmem:[%s610_s24] sm:$0xff] %vm1056_vm3, %v1245_v1 }
 0x55e   : > { %v1243_v2 = vpop.f32.mrf.mxu1 }
 0x55f PF: > { %s25_s15 = sadd.s32 1, %s1591_s15   ;;  %s1909_s29 = smov %s1587_s30 }
 0x560   : > { %p22_p8 = scmp.ge.s32.totalorder %s25_s15, 4   ;;  %s1910_s30 = smov %s1912_s13 }
 0x562   :  { %24 = sbr.rel (!%p22_p8) target bundleno = 2 (0x2), region = 128 }
 0x567   :  { %1272 = vsyncpa [#allocation6], 1 }
 0x568   :  { %1274 = vsyncpa [#allocation6 + $0x1], 1 }

// kernel: transformer_forward.7
= control target key start
LH: loop header
LB: loop body
LE: loop exit
PB: predicated region body
PF: predicated region fallthrough
CT: control target
= control target key end

     0   :  { %s2021_s0 = inlined_call_operand.vmem [shape: f32[2,8,32], index: 0, kind: input, shape index: {}]   ;;  %s2022_s1 = inlined_call_operand.vmem [shape: bf16[2,4,8,8], index: 1, kind: input, shape index: {}]   ;;  %s2023_s2 = inlined_call_operand.vmem [shape: bf16[2,4,8,8], index: 2, kind: input, shape index: {}]   ;;  %s2024_s3 = inlined_call_operand.vmem [shape: bf16[2,4,8,8], index: 3, kind: input, shape index: {}]   ;;  %s2025_s4 = inlined_call_operand.vmem [shape: bf16[4,8,32], index: 4, kind: input, shape index: {}]   ;;  %s2026_s5 = inlined_call_operand.vmem [shape: f32[1,32], index: 5, kind: input, shape index: {}]   ;;  %s2027_s6 = inlined_call_operand.vmem [shape: f32[1,32], index: 6, kind: input, shape index: {}]   ;;  %s2028_s7 = inlined_call_operand.vmem [shape: f32[1,32], index: 7, kind: input, shape index: {}]   ;;  %s2029_s8 = inlined_call_operand.vmem [shape: bf16[32,64], index: 8, kind: input, shape index: {}]   ;;  %s2030_s9 = inlined_call_operand.vmem [shape: f32[1,64], index: 9, kind: input, shape index: {}]   ;;  %s2031_s10 = inlined_call_operand.vmem [shape: bf16[64,32], index: 10, kind: input, shape index: {}]   ;;  %s2032_s11 = inlined_call_operand.vmem [shape: f32[1,32], index: 11, kind: input, shape index: {}]   ;;  %s2033_s12 = inlined_call_operand.vmem [shape: f32[1,32], index: 12, kind: input, shape index: {}]   ;;  %s2034_s13 = inlined_call_operand.vmem [shape: f32[1,32], index: 13, kind: input, shape index: {}]   ;;  %s2035_s14 = inlined_call_operand.hbm [shape: f32[2,8,32], index: 14, kind: output, shape index: {}]  }
   0x1   :  { %2038 = sst [smem:[#allocation10_spill]] %s2021_s0 }
   0x2   :  { %2039 = sst [smem:[#allocation11_spill]] %s2022_s1 }
   0x3   :  { %2040 = sst [smem:[#allocation12_spill]] %s2023_s2 }
   0x4   :  { %2041 = sst [smem:[#allocation13_spill]] %s2024_s3 }
   0x5   :  { %19 = vsyncpa [#allocation6], 0 }
   0x6   :  { %21 = vsyncpa [#allocation6 + $0x1], 0  ;;  %s1726_s29 = smov 0   ;;  %s1728_s30 = smov 0  }
   0x7   :  { %s1730_s15 = smov 0   ;;  %s1732_s16 = smov 0  }
   0x8   :  { %s1734_s17 = smov 0   ;;  %s1736_s18 = smov 0  }
   0x9 LB: > { %2042 = sst [smem:[#allocation8_spill]] %s1641_s17  ;;  %s1401_s19 = sadd.s32 4294967295, %s1645_s18   ;;  %s1645_s18 = sphi %s1736_s18, %s27_s18   ;;  %s1641_s17 = sphi %s1734_s17, %s2051_s17   ;;  %s1637_s16 = sphi %s1732_s16, %s2050_s16   ;;  %s1633_s15 = sphi %s1730_s15, %s2054_s15   ;;  %s1629_s30 = sphi %s1728_s30, %s2053_s30   ;;  %s1625_s29 = sphi %s1726_s29, %s2052_s29  }
   0xa   : > { %s1402_s20 = sadd.s32 4294967294, %s1645_s18   ;;  %s46_s21 = sadd.s32 1, %s1641_s17 }
   0xb   : > { %s377_s22 = sadd.s32 1, %s1633_s15  ;;  %p48_p0 = scmp.ge.s32.totalorder %s46_s21, 2 }
   0xc   : > { %p387_p1 = scmp.ne.s32.totalorder %s1633_s15, %s1629_s30  ;;  %p388_p2 = scmp.eq.s32.totalorder %s1401_s19, 1 }
   0xd   : > { %p393_p3 = scmp.ne.s32.totalorder %s1629_s30, %s1625_s29  ;;  %s2056_s21 = smov (%p48_p0, %s46_s21), 0 }
   0xe   : > { %2043 = sst [smem:[#allocation9_spill]] %s2056_s21  ;;  %p1766_p4 = por %p388_p2, %p387_p1 }
   0xf   : > { %p394_p5 = scmp.eq.s32.totalorder %s1402_s20, 1  ;;  %s372_s24 = ssub.s32 %s1641_s17, %s2056_s21 }
  0x10   : > { %p1405_p6 = scmp.ge.s32.totalorder %s1645_s18, 1  ;;  %p375_p7 = scmp.eq.s32.totalorder %s372_s24, 0 }
  0x11   : > { %p1773_p8 = por %p394_p5, %p393_p3  ;;  %p485_p9 = scmp.lt.s32.totalorder %s1645_s18, 3 }
  0x12   : > { %s1779_s26 = scalar_select %p375_p7, %s1633_s15, %s377_s22  }
  0x13   : > { %p486_p10 = pnand %p1405_p6, %p485_p9 }
  0x14   : > { %p557_p11 = scmp.lt.s32.totalorder (!%p486_p10), %s1637_s16, 1  ;;  %s2046_s2 = sld [smem:[#allocation12_spill]] (!%p486_p10) }
  0x15   : > { %489 = sbr.rel (%p486_p10) target bundleno = 1652 (0x674), region = 76  ;;  %s2047_s1 = sld [smem:[#allocation11_spill]] (!%p486_p10) }
  0x16   : > { %s2048_s3 = sld [smem:[#allocation13_spill]] (!%p486_p10)  ;;  %s554_s22 = sand.u32 (!%p486_p10), 1, %s1629_s30  }
  0x17   : > { %s2049_s0 = sld [smem:[#allocation10_spill]] (!%p486_p10)  ;;  %s1454_s21 = sshll.u32 (!%p486_p10), %s1637_s16, 3 }
  0x1a   : > { %s1783_s27 = scalar_select %p557_p11, %s1637_s16, 1  ;;  %vm602_vm0 = vcmask 64512   ;;  %vm593_vm1 = vcmask 7168   ;;  %v1647_v12 = vmov -inf   ;;  %v1648_v25 = vmov 0  }
  0x1b   : > { %594 = vst.msk [vmem:[#allocation2] sm:$0xff] %vm593_vm1, %v1647_v12  ;;  %1526 = vset.pattern.permute.xlu0 %v1648_v25  ;;  %1525 = vset.pattern.permute.xlu2 %v1648_v25  ;;  %v1649_v26 = vmov 0.0   ;;  %vm824_vm2 = vcmask 1043456   ;;  %vm1033_vm3 = vcmask 261120   ;;  %vm1205_vm12 = vcmask 523264  }
  0x1c   : > { %s1786_s28 = sshll.u32 %s1783_s27, 4  ;;  %595 = vst.msk [vmem:[#allocation2 + $0x8] sm:$0xff] %vm593_vm1, %v1647_v12  ;;  %1527 = vset.pattern.permute.xlu1 %v1648_v25  ;;  %s1407_s20 = sshll.u32 %s1783_s27, 3 }
  0x1d   : > { %s579_s24 = scalar_lea.vmem %s2046_s2, %s1786_s28  ;;  %s571_s17 = scalar_lea.vmem %s2047_s1, %s1786_s28  ;;  %596 = vst.msk [vmem:[#allocation2 + $0x10] sm:$0xff] %vm593_vm1, %v1647_v12 }
  0x1e   : > { %v611_v0 = vld [vmem:[%s579_s24] sm:$0xf]  ;;  %v613_v1 = vld [vmem:[%s579_s24 + $0x8] sm:$0xf]  ;;  %v612_v4 = vld [vmem:[%s579_s24 + $0x4] sm:$0xf]  ;;  %s587_s19 = scalar_lea.vmem %s2048_s3, %s1786_s28 }
  0x1f   : > { %v624_v2 = vsel %vm602_vm0, %v611_v0, 0  ;;  %v662_v3 = vsel %vm602_vm0, %v613_v1, 0  ;;  %v643_v5 = vsel %vm602_vm0, %v612_v4, 0  ;;  %v614_v6 = vld [vmem:[%s579_s24 + $0xc] sm:$0xf]  ;;  %597 = vst.msk [vmem:[#allocation2 + $0x18] sm:$0xff] %vm593_vm1, %v1647_v12  ;;  %s1268_s24 = scalar_lea.hbm %s2035_s14, %s1454_s21 }
  0x20   : > { %633 = vmatpush.bf16.xpose.msra.mxu0 %v624_v2  ;;  %671 = vmatpush.bf16.xpose.msra.mxu2 %v662_v3  ;;  %v681_v7 = vsel %vm602_vm0, %v614_v6, 0  ;;  %v607_v8 = vld [vmem:[%s571_s17] sm:$0xf]  ;;  %v609_v9 = vld [vmem:[%s571_s17 + $0x8] sm:$0xf]  ;;  %600 = vst.msk [vmem:[#allocation3 + $0x10] sm:$0xff] %vm593_vm1, %v1649_v26 }
  0x21   : > { %652 = vmatpush.bf16.xpose.msra.mxu1 %v643_v5  ;;  %690 = vmatpush.bf16.xpose.msra.mxu3 %v681_v7  ;;  %v608_v10 = vld [vmem:[%s571_s17 + $0x4] sm:$0xf]  ;;  %v610_v11 = vld [vmem:[%s571_s17 + $0xc] sm:$0xf]  ;;  %598 = vst.msk [vmem:[#allocation3] sm:$0xff] %vm593_vm1, %v1649_v26  ;;  %s563_s17 = scalar_lea.vmem %s2049_s0, %s1407_s20  ;;  %s1272_s3 = sshll.u32 %s1268_s24, 4  ;;  %s1273_s3 = int_to_ptr.hbm [resolvable:$true] %s1272_s3 }
  0x22   : > { %599 = vst.msk [vmem:[#allocation3 + $0x8] sm:$0xff] %vm593_vm1, %v1649_v26  ;;  %v1832_v27 = vld [vmem:[#allocation2] sm:$0xff]  ;;  %v617_v43 = vld [vmem:[%s587_s19 + $0x8] sm:$0xf]  ;;  %v618_v45 = vld [vmem:[%s587_s19 + $0xc] sm:$0xf] }
  0x23   : > { %601 = vst.msk [vmem:[#allocation3 + $0x18] sm:$0xff] %vm593_vm1, %v1649_v26  ;;  %v1844_v33 = vld [vmem:[#allocation2 + $0x8] sm:$0xff]  ;;  %v864_v44 = vsel %vm824_vm2, %v617_v43, 0  ;;  %v883_v46 = vsel %vm824_vm2, %v618_v45, 0  ;;  %v615_v47 = vld [vmem:[%s587_s19] sm:$0xf] }
  0x24   : > { %603 = vst.msk [vmem:[#allocation4] sm:$0xff] %vm602_vm0, %v1649_v26  ;;  %v1842_v31 = vld [vmem:[#allocation2 + $0x10] sm:$0xff]  ;;  %v826_v48 = vsel %vm824_vm2, %v615_v47, 0  ;;  %v616_v50 = vld [vmem:[%s587_s19 + $0x4] sm:$0xf]  ;;  %s1257_s19 = scalar_lea.sflag [#allocation6], %s554_s22 }
  0x25   : > { %604 = vst.msk [vmem:[#allocation4 + $0x8] sm:$0xff] %vm602_vm0, %v1649_v26  ;;  %v845_v52 = vsel %vm824_vm2, %v616_v50, 0  ;;  %s1581_s27 = sshra.s32 %s1273_s3, 4  ;;  %s1587_s1 = scalar_lea.hbm %s2035_s14, 16  ;;  %s1582_s27 = int_to_ptr.hbm [resolvable:$true] %s1581_s27 }
  0x26   : > { %605 = vst.msk [vmem:[#allocation4 + $0x10] sm:$0xff] %vm602_vm0, %v1649_v26  ;;  %v699_v39 = vld [vmem:[#allocation2 + $0x18] sm:$0xff]  ;;  %s1583_s21 = scalar_lea.hbm %s1582_s27, 8  ;;  %p1588_p1 = scmp.lt.s32.totalorder %s1582_s27, %s2035_s14 }
  0x27   : > { %1414 = vmatmul.msk.bf16.vlgmr.msra.gmra.mxu0 %vm602_vm0, %v607_v8  ;;  %1416 = vmatmul.msk.bf16.vlgmr.msra.gmra.mxu2 %vm602_vm0, %v609_v9  ;;  %606 = vst.msk [vmem:[#allocation4 + $0x18] sm:$0xff] %vm602_vm0, %v1649_v26  ;;  %p1584_p12 = scmp.ne.s32.totalorder %s1582_s27, %s1583_s21  ;;  %p1589_p2 = scmp.lt.s32.totalorder %s1587_s1, %s1583_s21 }
  0x28   : > { %1415 = vmatmul.msk.bf16.vlgmr.msra.gmra.mxu1 %vm602_vm0, %v608_v10  ;;  %1417 = vmatmul.msk.bf16.vlgmr.msra.gmra.mxu3 %vm602_vm0, %v610_v11 }
  0x29   : > { %873 = vmatpush.bf16.msrb.mxu2 %v864_v44  ;;  %892 = vmatpush.bf16.msrb.mxu3 %v883_v46  ;;  %p1585_p13 = pnand %p1584_p12, %p1766_p4  ;;  %p1590_p3 = por %p1589_p2, %p1588_p1 }
  0x2a   : > { %835 = vmatpush.bf16.msrb.mxu0 %v826_v48  ;;  %854 = vmatpush.bf16.msrb.mxu1 %v845_v52 }
  0x2b   : > { %p1586_p0 = pneg %p1585_p13 }
  0x2d   : > { %v791_v46 = vld [vmem:[#allocation4 + $0x10] sm:$0xff]  ;;  %p1591_p5 = pnand %p1590_p3, %p1586_p0 }
  0x2e   : > { %v792_v44 = vld [vmem:[#allocation4 + $0x18] sm:$0xff] }
  0xa4   : > { %v1808_v13 = vpop.f32.mrf.mxu0 }
  0xa5   : > { %v700_v14 = vsel %vm602_vm0, %v1808_v13, -inf  ;;  %v1812_v15 = vpop.f32.mrf.mxu1 }
  0xa6   : > { %701 = vmax.xlane.f32.xlu1 %v700_v14  ;;  %v703_v18 = vsel %vm602_vm0, %v1812_v15, -inf }
  0xaa   : > { %v1814_v16 = vpop.f32.mrf.mxu2 }
  0xab   : > { %v706_v17 = vsel %vm602_vm0, %v1814_v16, -inf  ;;  %v1820_v20 = vpop.f32.mrf.mxu3 }
  0xac   : > { %707 = vmax.xlane.f32.xlu0 %v706_v17  ;;  %v637_v19 = vpop.f32.mrf.mxu0  ;;  %v709_v22 = vsel %vm602_vm0, %v1820_v20, -inf }
  0xad   : > { %v656_v21 = vpop.f32.mrf.mxu1  ;;  %v762_v19 = vld [vmem:[#allocation3 + $0x10] sm:$0xff] }
  0xae   : > { %704 = vmax.xlane.f32.xlu1 %v703_v18 }
  0xb2   : > { %v675_v23 = vpop.f32.mrf.mxu2 }
  0xb3   : > { %v694_v24 = vpop.f32.mrf.mxu3  ;;  %v763_v23 = vld [vmem:[#allocation3 + $0x18] sm:$0xff] }
  0xb4   : > { %710 = vmax.xlane.f32.xlu0 %v709_v22 }
 0x119   : > { %v702_v28 = vpop.xlane.xlu1 %701 }
 0x11a   : > { %v1835_v29 = vmax.f32 %v1832_v27, %v702_v28  ;;  %v760_v28 = vld [vmem:[#allocation3] sm:$0xff] }
 0x11c   : > { %v716_v30 = vsub.f32 %v1832_v27, %v1835_v29  ;;  %906 = vst.msk [vmem:[#allocation2] sm:$0xff] %vm593_vm1, %v1835_v29  ;;  %730 = vperm.xlu0 %1526, %v1835_v29  }
 0x11e   : > { %v720_v14 = vmul.f32 1.442695, %v716_v30 }
 0x11f   : > { %v708_v32 = vpop.xlane.xlu0 %707 }
 0x120   : > { %v1847_v34 = vmax.f32 %v1842_v31, %v708_v32 }
 0x121   : > { %v705_v35 = vpop.xlane.xlu1 %704 }
 0x122   : > { %v718_v36 = vsub.f32 %v1842_v31, %v1847_v34  ;;  %908 = vst.msk [vmem:[#allocation2 + $0x10] sm:$0xff] %vm593_vm1, %v1847_v34  ;;  %v1854_v37 = vmax.f32 %v1844_v33, %v705_v35  ;;  %740 = vperm.xlu2 %1525, %v1847_v34   ;;  %v761_v35 = vld [vmem:[#allocation3 + $0x8] sm:$0xff] }
 0x124   : > { %v717_v38 = vsub.f32 %v1844_v33, %v1854_v37  ;;  %907 = vst.msk [vmem:[#allocation2 + $0x8] sm:$0xff] %vm593_vm1, %v1854_v37  ;;  %735 = vperm.xlu1 %1527, %v1854_v37  }
 0x127   : > { %v711_v40 = vpop.xlane.xlu0 %710 }
 0x128   : > { %v715_v41 = vmax.f32 %v699_v39, %v711_v40 }
 0x12a   : > { %v719_v42 = vsub.f32 %v699_v39, %v715_v41  ;;  %909 = vst.msk [vmem:[#allocation2 + $0x18] sm:$0xff] %vm593_vm1, %v715_v41  ;;  %745 = vperm.xlu2 %1525, %v715_v41  }
 0x12c   : > { %v726_v8 = vmul.f32 1.442695, %v719_v42 }
 0x17c   : > { %v741_v49 = vpop.permute.xlu2 %740 }
 0x17d   : > { %v750_v51 = vsub.f32 %v1814_v16, %v741_v49  ;;  %v722_v16 = vmul.f32 1.442695, %v717_v38 }
 0x17f   : > { %v756_v53 = vmul.f32 1.442695, %v750_v51 }
 0x181   : > { %1535 = vpow2.f32 %v756_v53 }
 0x184   : > { %v746_v54 = vpop.permute.xlu2 %745 }
 0x185   : > { %v751_v55 = vsub.f32 %v1820_v20, %v746_v54 }
 0x187   : > { %v1536_v56 = vpop.eup %1535  ;;  %v758_v57 = vmul.f32 1.442695, %v751_v55 }
 0x188   : > { %v774_v58 = vsel %vm602_vm0, %v1536_v56, 0.0  ;;  %v819_v59 = vpack.c.bf16 %v1536_v56, %v1536_v56 }
 0x189   : > { %1537 = vpow2.f32 %v758_v57  ;;  %775 = vadd.xlane.f32.xlu2 %v774_v58  ;;  %v789_v57 = vld [vmem:[#allocation4] sm:$0xff] }
 0x18a   : > { %1420 = vmatmul.msk.bf16.vlgmr.msrb.gmra.mxu2 %vm602_vm0, %v819_v59 }
 0x18e   : > { %v731_v60 = vpop.permute.xlu0 %730 }
 0x18f   : > { %v1538_v61 = vpop.eup %1537  ;;  %v748_v62 = vsub.f32 %v1808_v13, %v731_v60  ;;  %v724_v13 = vmul.f32 1.442695, %v718_v36 }
 0x190   : > { %v777_v63 = vsel %vm602_vm0, %v1538_v61, 0.0  ;;  %v820_v0 = vpack.c.bf16 %v1538_v61, %v1538_v61 }
 0x191   : > { %v752_v1 = vmul.f32 1.442695, %v748_v62  ;;  %778 = vadd.xlane.f32.xlu1 %v777_v63  ;;  %v790_v63 = vld [vmem:[#allocation4 + $0x8] sm:$0xff] }
 0x192   : > { %1421 = vmatmul.msk.bf16.vlgmr.msrb.gmra.mxu3 %vm602_vm0, %v820_v0 }
 0x193   : > { %1539 = vpow2.f32 %v752_v1 }
 0x196   : > { %v736_v2 = vpop.permute.xlu1 %735 }
 0x197   : > { %v749_v3 = vsub.f32 %v1812_v15, %v736_v2 }
 0x199   : > { %v1540_v4 = vpop.eup %1539  ;;  %v754_v5 = vmul.f32 1.442695, %v749_v3  ;;  %v956_v3 = vld [vmem:[%s2025_s4 + $0xc] sm:$0xf] }
 0x19a   : > { %v768_v6 = vsel %vm602_vm0, %v1540_v4, 0.0  ;;  %v817_v7 = vpack.c.bf16 %v1540_v4, %v1540_v4  ;;  %v1018_v4 = vsel %vm824_vm2, %v956_v3, 0 }
 0x19b   : > { %1541 = vpow2.f32 %v754_v5  ;;  %769 = vadd.xlane.f32.xlu0 %v768_v6  ;;  %1027 = vmatpush.bf16.msra.mxu3 %v1018_v4  ;;  %v955_v5 = vld [vmem:[%s2025_s4 + $0x8] sm:$0xf] }
 0x19c   : > { %1418 = vmatmul.msk.bf16.vlgmr.msrb.gmra.mxu0 %vm602_vm0, %v817_v7  ;;  %1543 = vpow2.f32 %v726_v8  ;;  %v999_v6 = vsel %vm824_vm2, %v955_v5, 0  ;;  %v954_v7 = vld [vmem:[%s2025_s4 + $0x4] sm:$0xf] }
 0x19d   : > { %1545 = vpow2.f32 %v724_v13  ;;  %1008 = vmatpush.bf16.msra.mxu2 %v999_v6  ;;  %v980_v8 = vsel %vm824_vm2, %v954_v7, 0  ;;  %v1529_v6 = vld [vmem:[%s2027_s6] ss:$0 sm:$0xff] }
 0x19e   : > { %1547 = vpow2.f32 %v720_v14  ;;  %989 = vmatpush.bf16.msra.mxu1 %v980_v8 }
 0x19f   : > { %1549 = vpow2.f32 %v722_v16 }
 0x1a1   : > { %v1542_v9 = vpop.eup %1541 }
 0x1a2   : > { %v771_v10 = vsel %vm602_vm0, %v1542_v9, 0.0  ;;  %v818_v11 = vpack.c.bf16 %v1542_v9, %v1542_v9  ;;  %v1544_v12 = vpop.eup %1543  ;;  %v953_v9 = vld [vmem:[%s2025_s4] sm:$0xf] }
 0x1a3   : > { %772 = vadd.xlane.f32.xlu2 %v771_v10  ;;  %v1546_v15 = vpop.eup %1545  ;;  %v767_v24 = vmul.f32 %v1544_v12, %v763_v23  ;;  %v961_v10 = vsel %vm824_vm2, %v953_v9, 0  ;;  %v1530_v9 = vld [vmem:[%s2028_s7] ss:$0 sm:$0xff] }
 0x1a4   : > { %1419 = vmatmul.msk.bf16.vlgmr.msrb.gmra.mxu1 %vm602_vm0, %v818_v11  ;;  %v1548_v17 = vpop.eup %1547  ;;  %v766_v20 = vmul.f32 %v1546_v15, %v762_v19  ;;  %970 = vmatpush.bf16.msra.mxu0 %v961_v10 }
 0x1a5   : > { %v1550_v18 = vpop.eup %1549  ;;  %v764_v31 = vmul.f32 %v1548_v17, %v760_v28 }
 0x1a6   : > { %v765_v39 = vmul.f32 %v1550_v18, %v761_v35 }
 0x1aa   : > { %810 = vperm.xlu1 %1527, %v1544_v12  }
 0x1bb   : > { %805 = vperm.xlu2 %1525, %v1546_v15  }
 0x1c3   : > { %795 = vperm.xlu2 %1525, %v1548_v17  }
 0x1cb   : > { %800 = vperm.xlu2 %1525, %v1550_v18  }
 0x1fc   : > { %v776_v21 = vpop.xlane.xlu2 %775 }
 0x1fd   : > { %v782_v22 = vadd.f32 %v776_v21, %v766_v20 }
 0x1ff   : > { %787 = vst.msk [vmem:[#allocation3 + $0x10] sm:$0xff] %vm593_vm1, %v782_v22 }
 0x204   : > { %v779_v25 = vpop.xlane.xlu1 %778 }
 0x205   : > { %v783_v26 = vadd.f32 %v779_v25, %v767_v24 }
 0x206   : > { %v919_v27 = vld [vmem:[#allocation3 + $0x10] sm:$0xff] }
 0x207   : > { %788 = vst.msk [vmem:[#allocation3 + $0x18] sm:$0xff] %vm593_vm1, %v783_v26  ;;  %1551 = vrcp.f32 %v919_v27 }
 0x20d   : > { %v1552_v29 = vpop.eup %1551  ;;  %v875_v30 = vpop.f32.mrf.mxu2 }
 0x20e   : > { %937 = vperm.xlu0 %1526, %v1552_v29   ;;  %v770_v32 = vpop.xlane.xlu0 %769  ;;  %v920_v33 = vld [vmem:[#allocation3 + $0x18] sm:$0xff] }
 0x20f   : > { %v780_v34 = vadd.f32 %v770_v32, %v764_v31  ;;  %1553 = vrcp.f32 %v920_v33 }
 0x211   : > { %785 = vst.msk [vmem:[#allocation3] sm:$0xff] %vm593_vm1, %v780_v34 }
 0x215   : > { %v1554_v36 = vpop.eup %1553  ;;  %v877_v37 = vpop.f32.mrf.mxu2 }
 0x216   : > { %v894_v38 = vpop.f32.mrf.mxu3  ;;  %v773_v40 = vpop.xlane.xlu2 %772  ;;  %942 = vperm.xlu2 %1525, %v1554_v36  }
 0x217   : > { %v781_v41 = vadd.f32 %v773_v40, %v765_v39  ;;  %v1528_v39 = vld [vmem:[%s2026_s5] ss:$0 sm:$0xff] }
 0x218   : > { %v917_v42 = vld [vmem:[#allocation3] sm:$0xff] }
 0x219   : > { %786 = vst.msk [vmem:[#allocation3 + $0x8] sm:$0xff] %vm593_vm1, %v781_v41  ;;  %v837_v43 = vpop.f32.mrf.mxu0  ;;  %1555 = vrcp.f32 %v917_v42  ;;  %v1046_v42 = vld [vmem:[%s563_s17] sm:$0xff]  ;;  %s1406_s17 = sshll.u32 %s554_s22, 3 }
 0x21a   : > { %s556_s2 = scalar_lea.vmem [#allocation5], %s1406_s17 }
 0x21b   : > { %s1270_s16 = sshll.u32 %s556_s2, 4  ;;  %s1271_s16 = int_to_ptr.vmem [resolvable:$true] %s1270_s16 }
 0x21c   : > { %v811_v45 = vpop.permute.xlu1 %810 }
 0x21d   : > { %v816_v47 = vmul.f32 %v811_v45, %v792_v44 }
 0x21e   : > { %v896_v48 = vpop.f32.mrf.mxu3  ;;  %v806_v49 = vpop.permute.xlu2 %805 }
 0x21f   : > { %v1556_v50 = vpop.eup %1555  ;;  %v901_v51 = vadd.f32 %v894_v38, %v816_v47  ;;  %v815_v52 = vmul.f32 %v806_v49, %v791_v46  ;;  %v1650_v47 = vmov 32.0  }
 0x220   : > { %927 = vperm.xlu1 %1527, %v1556_v50   ;;  %v918_v53 = vld [vmem:[#allocation3 + $0x8] sm:$0xff] }
 0x221   : > { %905 = vst.msk [vmem:[#allocation4 + $0x18] sm:$0xff] %vm602_vm0, %v901_v51  ;;  %v900_v54 = vadd.f32 %v875_v30, %v815_v52  ;;  %v839_v55 = vpop.f32.mrf.mxu0  ;;  %v856_v56 = vpop.f32.mrf.mxu1  ;;  %1557 = vrcp.f32 %v918_v53 }
 0x222   : > { %1559 = vrcp.f32 %v1650_v47 }
 0x223   : > { %904 = vst.msk [vmem:[#allocation4 + $0x10] sm:$0xff] %vm602_vm0, %v900_v54 }
 0x226   : > { %v796_v58 = vpop.permute.xlu2 %795 }
 0x227   : > { %v1558_v59 = vpop.eup %1557  ;;  %v813_v60 = vmul.f32 %v796_v58, %v789_v57 }
 0x228   : > { %932 = vperm.xlu2 %1525, %v1558_v59   ;;  %v916_v11 = vld [vmem:[#allocation4 + $0x18] sm:$0xff]  ;;  %v1560_v48 = vpop.eup %1559  ;;  %v1461_v59 = vld [vmem:[%s2029_s8 + $0x8] sm:$0xff] }
 0x229   : > { %v898_v61 = vadd.f32 %v837_v43, %v813_v60  ;;  %v858_v62 = vpop.f32.mrf.mxu1  ;;  %v1054_v49 = vmul.f32 32.0, %v1560_v48  ;;  %vm1058_vm4 = vweird.f32 %v1560_v48  ;;  %1117 = vmatpush.bf16.msrb.mxu0 %v1461_v59  ;;  %v1460_v60 = vld [vmem:[%s2029_s8] sm:$0xff] }
 0x22a   : > { %v915_v16 = vld [vmem:[#allocation4 + $0x10] sm:$0xff] }
 0x22b   : > { %902 = vst.msk [vmem:[#allocation4] sm:$0xff] %vm602_vm0, %v898_v61  ;;  %v1055_v50 = vsub.f32 1.0, %v1054_v49 }
 0x22d   : > { %v1056_v51 = vmul.f32 %v1560_v48, %v1055_v50  ;;  %1118 = vmatpush.bf16.msrb.mxu0 %v1460_v60 }
 0x22e   : > { %v801_v0 = vpop.permute.xlu2 %800 }
 0x22f   : > { %v814_v1 = vmul.f32 %v801_v0, %v790_v63  ;;  %v1057_v52 = vadd.f32 %v1560_v48, %v1056_v51 }
 0x231   : > { %v899_v2 = vadd.f32 %v856_v56, %v814_v1  ;;  %v1935_v53 = vsel %vm1058_vm4, %v1560_v48, %v1057_v52 }
 0x232   : > { %v913_v24 = vld [vmem:[#allocation4] sm:$0xff] }
 0x233   : > { %903 = vst.msk [vmem:[#allocation4 + $0x8] sm:$0xff] %vm602_vm0, %v899_v2 }
 0x23a   : > { %v914_v18 = vld [vmem:[#allocation4 + $0x8] sm:$0xff] }
 0x270   : > { %v943_v12 = vpop.permute.xlu2 %942 }
 0x271   : > { %v948_v13 = vmul.f32 %v943_v12, %v916_v11 }
 0x273   : > { %v952_v14 = vpack.c.bf16 %v948_v13, %v948_v13  ;;  %v1531_v13 = vld [vmem:[%s2030_s9] ss:$0 sm:$0xff] }
 0x275   : > { %1425 = vmatmul.msk.bf16.vlgmr.msra.gmra.mxu3 %vm602_vm0, %v952_v14 }
 0x280   : > { %v938_v15 = vpop.permute.xlu0 %937 }
 0x281   : > { %v947_v17 = vmul.f32 %v938_v15, %v915_v16 }
 0x282   : > { %v933_v19 = vpop.permute.xlu2 %932 }
 0x283   : > { %v951_v20 = vpack.c.bf16 %v947_v17, %v947_v17  ;;  %v946_v21 = vmul.f32 %v933_v19, %v914_v18 }
 0x285   : > { %v950_v22 = vpack.c.bf16 %v946_v21, %v946_v21  ;;  %1424 = vmatmul.msk.bf16.vlgmr.msra.gmra.mxu2 %vm602_vm0, %v951_v20  ;;  %v1465_v20 = vld [vmem:[%s2031_s10 + $0x18] sm:$0xff] }
 0x286   : > { %1213 = vmatpush.bf16.msrb.mxu1 %v1465_v20  ;;  %v1534_v20 = vld [vmem:[%s2034_s13] ss:$0 sm:$0xff] }
 0x287   : > { %1423 = vmatmul.msk.bf16.vlgmr.msra.gmra.mxu1 %vm602_vm0, %v950_v22 }
 0x292   : > { %v928_v23 = vpop.permute.xlu1 %927 }
 0x293   : > { %v945_v25 = vmul.f32 %v928_v23, %v913_v24 }
 0x295   : > { %v949_v26 = vpack.c.bf16 %v945_v25, %v945_v25  ;;  %v1464_v25 = vld [vmem:[%s2031_s10 + $0x10] sm:$0xff] }
 0x296   : > { %1214 = vmatpush.bf16.msrb.mxu1 %v1464_v25 }
 0x297   : > { %1422 = vmatmul.msk.bf16.vlgmr.msra.gmra.mxu0 %vm602_vm0, %v949_v26 }
 0x2f8   : > { %v1029_v27 = vpop.f32.mrf.mxu3 }
 0x2f9   : > { %v1039_v40 = vsel %vm1033_vm3, %v1029_v27, 0.0 }
 0x300   : > { %v1031_v28 = vpop.f32.mrf.mxu3 }
 0x304   : > { %v991_v29 = vpop.f32.mrf.mxu1 }
 0x305   : > { %v1035_v34 = vsel %vm1033_vm3, %v991_v29, 0.0 }
 0x308   : > { %v1010_v30 = vpop.f32.mrf.mxu2 }
 0x309   : > { %v1037_v37 = vsel %vm1033_vm3, %v1010_v30, 0.0  ;;  %v1463_v30 = vld [vmem:[%s2031_s10 + $0x8] sm:$0xff] }
 0x30a   : > { %1215 = vmatpush.bf16.msrb.mxu1 %v1463_v30 }
 0x30c   : > { %v993_v31 = vpop.f32.mrf.mxu1 }
 0x310   : > { %v1012_v32 = vpop.f32.mrf.mxu2 }
 0x314   : > { %v972_v33 = vpop.f32.mrf.mxu0 }
 0x315   : > { %v1034_v35 = vsel %vm1033_vm3, %v972_v33, 0.0 }
 0x316   : > { %v1036_v36 = vadd.f32 %v1035_v34, %v1034_v35  ;;  %v1462_v34 = vld [vmem:[%s2031_s10] sm:$0xff] }
 0x317   : > { %1216 = vmatpush.bf16.msrb.mxu1 %v1462_v34 }
 0x318   : > { %v1038_v38 = vadd.f32 %v1037_v37, %v1036_v36 }
 0x31a   : > { %v1040_v41 = vadd.f32 %v1039_v40, %v1038_v38 }
 0x31c   : > { %v974_v43 = vpop.f32.mrf.mxu0  ;;  %v1045_v44 = vadd.f32 %v1528_v39, %v1040_v41 }
 0x31e   : > { %v1931_v45 = vadd.f32 %v1046_v42, %v1045_v44 }
 0x320   : > { %v1050_v46 = vsel %vm1033_vm3, %v1931_v45, 0.0 }
 0x321   : > { %1051 = vadd.xlane.f32.xlu1 %v1050_v46 }
 0x394   : > { %v1052_v54 = vpop.xlane.xlu1 %1051 }
 0x395   : > { %v1060_v55 = vmul.f32 %v1935_v53, %v1052_v54 }
 0x397   : > { %v1061_v56 = vsub.f32 %v1931_v45, %v1060_v55 }
 0x399   : > { %v1062_v57 = vmul.f32 %v1061_v56, %v1061_v56 }
 0x39b   : > { %v1063_v58 = vsel %vm1033_vm3, %v1062_v57, 0.0 }
 0x39c   : > { %1064 = vadd.xlane.f32.xlu0 %v1063_v58 }
 0x40f   : > { %v1065_v61 = vpop.xlane.xlu0 %1064 }
 0x410   : > { %v1066_v62 = vmul.f32 %v1065_v61, %v1935_v53 }
 0x412   : > { %v1067_v63 = vadd.f32 1e-05, %v1066_v62 }
 0x414   : > { %1561 = vrsqrt.f32 %v1067_v63  ;;  %vm1074_vm6 = vweird.f32 %v1067_v63 }
 0x41a   : > { %v1562_v0 = vpop.eup %1561 }
 0x41b   : > { %v1069_v1 = vmul.f32 %v1562_v0, %v1067_v63  ;;  %vm1075_vm5 = vweird.f32 %v1562_v0  ;;  %v1532_v63 = vld [vmem:[%s2032_s11] ss:$0 sm:$0xff] }
 0x41c   : > { %vm1076_vm7 = vmor %vm1074_vm6, %vm1075_vm5 }
 0x41d   : > { %v1070_v2 = vmul.f32 %v1562_v0, %v1069_v1 }
 0x41f   : > { %v1071_v3 = vmul.f32 0.5, %v1070_v2 }
 0x421   : > { %v1072_v4 = vsub.f32 1.5, %v1071_v3 }
 0x423   : > { %v1073_v5 = vmul.f32 %v1562_v0, %v1072_v4 }
 0x425   : > { %v1077_v7 = vsel %vm1076_vm7, %v1562_v0, %v1073_v5 }
 0x426   : > { %v1078_v8 = vmul.f32 %v1077_v7, %v1061_v56 }
 0x428   : > { %v1082_v10 = vmul.f32 %v1529_v6, %v1078_v8 }
 0x42a   : > { %v1086_v11 = vadd.f32 %v1530_v9, %v1082_v10 }
 0x42c   : > { %v1087_v12 = vpack.c.bf16 %v1086_v11, %v1086_v11 }
 0x42e   : > { %1434 = vmatmul.msk.bf16.vlgmr.msrb.gmra.mxu0 %vm1033_vm3, %v1087_v12 }
 0x4ab   : > { %v1120_v14 = vpop.f32.mrf.mxu0 }
 0x4ac   : > { %v1121_v15 = vadd.f32 %v1531_v13, %v1120_v14 }
 0x4ae   : > { %v1125_v16 = vmul.f32 0.70710677, %v1121_v15  ;;  %v1124_v59 = vmul.f32 0.5, %v1121_v15 }
 0x4b0   : > { %v1126_v17 = vmul.f32 %v1125_v16, %v1125_v16 }
 0x4b2   : > { %v1127_v18 = vmin.f32 %v1126_v17, 16.0 }
 0x4b3   : > { %v1122_v19 = vpop.f32.mrf.mxu0 }
 0x4b4   : > { %v1128_v21 = vmul.f32 2.1237322e-06, %v1127_v18  ;;  %v1139_v22 = vmul.f32 3.8918573e-05, %v1127_v18 }
 0x4b6   : > { %v1129_v23 = vadd.f32 0.00028619796, %v1128_v21  ;;  %v1140_v24 = vadd.f32 0.001143296, %v1139_v22 }
 0x4b8   : > { %v1130_v26 = vmul.f32 %v1129_v23, %v1127_v18  ;;  %v1141_v27 = vmul.f32 %v1140_v24, %v1127_v18 }
 0x4ba   : > { %v1142_v28 = vadd.f32 0.014752088, %v1141_v27  ;;  %v1131_v29 = vadd.f32 0.0036580483, %v1130_v26 }
 0x4bc   : > { %v1143_v31 = vmul.f32 %v1142_v28, %v1127_v18  ;;  %v1132_v33 = vmul.f32 %v1131_v29, %v1127_v18 }
 0x4be   : > { %v1144_v32 = vadd.f32 0.112945676, %v1143_v31  ;;  %v1133_v37 = vadd.f32 0.05243302, %v1132_v33 }
 0x4c0   : > { %v1145_v35 = vmul.f32 %v1144_v32, %v1127_v18  ;;  %v1134_v40 = vmul.f32 %v1133_v37, %v1127_v18 }
 0x4c2   : > { %v1146_v36 = vadd.f32 0.4994258, %v1145_v35  ;;  %v1135_v41 = vadd.f32 0.18741608, %v1134_v40 }
 0x4c4   : > { %v1147_v38 = vmul.f32 %v1146_v36, %v1127_v18  ;;  %v1136_v43 = vmul.f32 %v1135_v41, %v1127_v18  ;;  %v1533_v18 = vld [vmem:[%s2033_s12] ss:$0 sm:$0xff] }
 0x4c6   : > { %v1148_v39 = vadd.f32 1.0, %v1147_v38  ;;  %v1137_v48 = vadd.f32 1.1283791, %v1136_v43 }
 0x4c8   : > { %1563 = vrcp.f32 %v1148_v39  ;;  %v1160_v47 = vand.u32 2147483648, %v1148_v39  ;;  %v1158_v50 = vand.u32 2147483647, %v1148_v39  ;;  %vm1154_vm9 = vweird.f32 %v1148_v39 }
 0x4c9   : > { %v1138_v54 = vmul.f32 %v1137_v48, %v1125_v16 }
 0x4ca   : > { %v1161_v52 = vor.u32 1.1754944e-38, %v1160_v47  ;;  %vm1159_vm11 = vcmp.eq.f32.partialorder %v1158_v50, 8.507059e+37 }
 0x4ce   : > { %v1564_v42 = vpop.eup %1563 }
 0x4cf   : > { %v1150_v44 = vmul.f32 %v1564_v42, %v1148_v39  ;;  %vm1155_vm8 = vweird.f32 %v1564_v42 }
 0x4d0   : > { %vm1156_vm10 = vmor %vm1154_vm9, %vm1155_vm8 }
 0x4d1   : > { %v1151_v46 = vsub.f32 1.0, %v1150_v44 }
 0x4d3   : > { %v1152_v49 = vmul.f32 %v1564_v42, %v1151_v46 }
 0x4d5   : > { %v1153_v51 = vadd.f32 %v1564_v42, %v1152_v49 }
 0x4d7   : > { %v1157_v55 = vsel %vm1156_vm10, %v1564_v42, %v1153_v51 }
 0x4d8   : > { %v1162_v56 = vsel %vm1159_vm11, %v1161_v52, %v1157_v55 }
 0x4d9   : > { %v1163_v57 = vmul.f32 %v1162_v56, %v1138_v54 }
 0x4db   : > { %v1435_v58 = vclamps-f32 %v1163_v57, 1.0 }
 0x4dd   : > { %v1166_v60 = vadd.f32 1.0, %v1435_v58 }
 0x4df   : > { %v1167_v61 = vmul.f32 %v1166_v60, %v1124_v59 }
 0x4e1   : > { %v1168_v62 = vpack.c.bf16 %v1167_v61, %v1167_v61 }
 0x4e3   : > { %1452 = vmatmul.msk.bf16.vlgmr.msrb.gmra.mxu1 %vm1205_vm12, %v1168_v62 }
 0x560   : > { %v1218_v0 = vpop.f32.mrf.mxu1 }
 0x561   : > { %v1219_v1 = vadd.f32 %v1532_v63, %v1218_v0 }
 0x563   : > { %v1222_v2 = vadd.f32 %v1219_v1, %v1931_v45 }
 0x565   : > { %v1225_v3 = vsel %vm1033_vm3, %v1222_v2, 0.0 }
 0x566   : > { %1226 = vadd.xlane.f32.xlu2 %v1225_v3 }
 0x568   : > { %v1220_v4 = vpop.f32.mrf.mxu1 }
 0x5d9   : > { %v1227_v5 = vpop.xlane.xlu2 %1226 }
 0x5da   : > { %v1228_v6 = vmul.f32 %v1227_v5, %v1935_v53 }
 0x5dc   : > { %v1229_v7 = vsub.f32 %v1222_v2, %v1228_v6 }
 0x5de   : > { %v1230_v8 = vmul.f32 %v1229_v7, %v1229_v7 }
 0x5e0   : > { %v1231_v9 = vsel %vm1033_vm3, %v1230_v8, 0.0 }
 0x5e1   : > { %1232 = vadd.xlane.f32.xlu1 %v1231_v9 }
 0x654   : > { %v1233_v10 = vpop.xlane.xlu1 %1232 }
 0x655   : > { %v1234_v11 = vmul.f32 %v1233_v10, %v1935_v53 }
 0x657   : > { %v1235_v12 = vadd.f32 1e-05, %v1234_v11 }
 0x659   : > { %1565 = vrsqrt.f32 %v1235_v12  ;;  %vm1242_vm14 = vweird.f32 %v1235_v12 }
 0x65f   : > { %v1566_v45 = vpop.eup %1565 }
 0x660   : > { %v1237_v13 = vmul.f32 %v1566_v45, %v1235_v12  ;;  %vm1243_vm13 = vweird.f32 %v1566_v45 }
 0x661   : > { %vm1244_vm15 = vmor %vm1242_vm14, %vm1243_vm13 }
 0x662   : > { %v1238_v14 = vmul.f32 %v1566_v45, %v1237_v13 }
 0x664   : > { %v1239_v15 = vmul.f32 0.5, %v1238_v14 }
 0x666   : > { %v1240_v16 = vsub.f32 1.5, %v1239_v15 }
 0x668   : > { %v1241_v17 = vmul.f32 %v1566_v45, %v1240_v16 }
 0x66a   : > { %v1245_v53 = vsel %vm1244_vm15, %v1566_v45, %v1241_v17 }
 0x66b   : > { %v1246_v19 = vmul.f32 %v1245_v53, %v1229_v7 }
 0x66d   : > { %v1250_v21 = vmul.f32 %v1533_v18, %v1246_v19 }
 0x66f   : > { %v1254_v22 = vadd.f32 %v1534_v20, %v1250_v21 }
 0x671   : > { %1255 = vst.msk [vmem:[%s556_s2] sm:$0xff] %vm1033_vm3, %v1254_v22 }
 0x672   : > { %1594 = shalt.err (!%p1591_p5)
}
 0x673   : > { %1466 = dma.vmem_to_hbm [thread:$0]  (%p1766_p4), %s1271_s16, 128, %s1273_s3, %s1257_s19  }
 0x674 PF: > { %p1472_p6 = scmp.ge.s32.totalorder %s1645_s18, 2  ;;  %s1284_s2 = sand.u32 1, %s1625_s29  }
 0x675   : > { %s1285_s22 = scalar_lea.sflag [#allocation6], %s1284_s2 }
 0x676   : > { %p1469_p7 = pnand %p1472_p6, %p1773_p8 }
 0x678   : > { %p1470_p9 = pneg %p1469_p7 }
 0x67a   : > { %1620 = dma.done.wait (%p1470_p9), %s1285_s22, 128  }
 0x67b   : > { %1622 = vsyncadd (%p1470_p9), %s1285_s22, 4294967168  ;;  %s27_s18 = sadd.s32 1, %s1645_s18   ;;  %s2050_s16 = sld [smem:[#allocation8_spill]] }
 0x67c   : > { %p24_p10 = scmp.ge.s32.totalorder %s27_s18, 4   ;;  %s2051_s17 = sld [smem:[#allocation9_spill]] }
 0x67d   : > { %s2052_s29 = smov %s1629_s30  ;;  %s2053_s30 = smov %s1633_s15 }
 0x67e   : > { %s2054_s15 = smov %s1779_s26  ;;  %26 = sbr.rel (!%p24_p10) target bundleno = 9 (0x9), region = 128 }
 0x683   :  { %1291 = vsyncpa [#allocation6], 1 }
 0x684   :  { %1293 = vsyncpa [#allocation6 + $0x1], 1 }

</bundles_post_ra>
